<compile_context>
chip_gen: v5e
topology: v5e:2x2
jax: 0.10.0
libtpu: 0.0.40
codegen_flags: <defaults>
</compile_context>

<pallas_src>
from math import ceil

import jax
import jax.numpy as jnp
from jax.experimental import pallas as pl
from jax.experimental.pallas import tpu as pltpu

LANE = 128
SUBLANE = 8


def _rup(n, m):
    return ((int(n) + m - 1) // m) * m


def _lane_pad(v, n):
    """Zero-pad the last (lane) dim of a value up to n channels (no-op if already n)."""
    c = v.shape[-1]
    if c == n:
        return v
    z = jnp.zeros(v.shape[:-1] + (n - c,), v.dtype)
    return jnp.concatenate([v, z], axis=-1)


def build_stage_configs(H, W, in_channels, out_channels, stride, kernel_size,
                        expansion_factor, se_ratio, num_layers):
    """Static per-block geometry for the whole stage (mirrors EnetStage.__init__)."""
    cfgs = []
    h, w, cin, st = int(H), int(W), int(in_channels), int(stride)
    n_in_lanes = int(in_channels)          # lane width of the activation entering block 0
    for _ in range(num_layers):
        se_size = max(1, cin // se_ratio)
        cexp = cin * expansion_factor
        s = st
        ho, wo = int(ceil(h / s)), int(ceil(w / s))
        pad_h = max((ho - 1) * s + kernel_size - h, 0)
        pad_w = max((wo - 1) * s + kernel_size - w, 0)
        pt, pleft = pad_h // 2, pad_w // 2
        pr = pad_w - pleft
        col0 = 0 if pleft == 0 else _rup(pleft, SUBLANE)   # sublane-aligned interior col
        cfg = dict(
            H=h, W=w, Cin=cin, Cout=int(out_channels),
            KH=kernel_size, KW=kernel_size, stride=s,
            expansion=expansion_factor, se_size=se_size,
            Ho=ho, Wo=wo, pt=pt, pleft=pleft, Hp=h + pad_h,
            col0=col0, Wp_alloc=_rup(col0 + w + pr, SUBLANE),
            W_wide=(wo - 1) * s + 1,
            Cexp=cexp, Cpe=_rup(cexp, LANE), Cpo=_rup(out_channels, LANE),
            Sp=_rup(se_size, LANE), n_in_lanes=n_in_lanes,
            has_expand=(expansion_factor != 1),
            skip=(cin == out_channels and s == 1),
        )
        cfgs.append(cfg)
        h, w, cin, st = ho, wo, int(out_channels), 1
        n_in_lanes = cfg['Cpo']            # later blocks see the lane-padded activation
    return cfgs


def _block_param_names(cfg):
    names = ['w_exp', 'bn1_scale', 'bn1_shift'] if cfg['has_expand'] else []
    return names + ['w_dw', 'bn2_scale', 'bn2_shift',
                    'w_se1', 'b_se1', 'w_se2', 'b_se2',
                    'w_proj', 'bn3_scale', 'bn3_shift']


def _mbconv_block(inp, prm, pad_ref, dw_ref, cfg):
    """One MBConv block on in-VMEM values; returns the (lane-padded) block output."""
    H, W, KH, KW, s = cfg['H'], cfg['W'], cfg['KH'], cfg['KW'], cfg['stride']
    Ho, Wo = cfg['Ho'], cfg['Wo']
    pt, pleft, Hp = cfg['pt'], cfg['pleft'], cfg['Hp']
    col0, Wp_alloc, W_wide = cfg['col0'], cfg['Wp_alloc'], cfg['W_wide']
    Cpe, Cpo = cfg['Cpe'], cfg['Cpo']

    # ---- 1x1 expand on the MXU (bf16 operands, f32 accumulation) + BN + SiLU ----
    if cfg['has_expand']:
        n_in = inp.shape[-1]
        y = jnp.dot(inp.reshape(H * W, n_in).astype(jnp.bfloat16),
                    prm['w_exp'][...],                     # bf16 weights, VMEM-resident
                    preferred_element_type=jnp.float32)
        y = y * prm['bn1_scale'][...] + prm['bn1_shift'][...]
        y = y * jax.nn.sigmoid(y)                          # SiLU (EUP)
        y = y.reshape(1, H, W, Cpe)
    else:
        y = _lane_pad(inp, Cpe)

    # ---- TF "same" padding: zero only the thin border stripes, write interior once.
    # Done every step (not @pl.when(pid==0)): with a "parallel" batch grid each core
    # has its own scratch, so step 0 may never run on a given core.  The column stripes
    # start at multiples of 8 columns, so these stores are unmasked.
    pb = Hp - pt - H
    if pt > 0:
        pad_ref[:, 0:pt, :, :] = jnp.zeros((1, pt, Wp_alloc, Cpe), jnp.float32)
    if pb > 0:
        pad_ref[:, pt + H:Hp, :, :] = jnp.zeros((1, pb, Wp_alloc, Cpe), jnp.float32)
    if col0 > 0:
        pad_ref[:, :, 0:col0, :] = jnp.zeros((1, Hp, col0, Cpe), jnp.float32)
    if col0 + W < Wp_alloc:
        pad_ref[:, :, col0 + W:Wp_alloc, :] = jnp.zeros(
            (1, Hp, Wp_alloc - col0 - W, Cpe), jnp.float32)
    pad_ref[:, pt:pt + H, col0:col0 + W, :] = y            # sublane-aligned interior store

    # ---- depthwise KHxKW conv, stride s, f32 MAC + BN + SiLU ----
    w_dw = prm['w_dw'][...]                                # (KH, KW, Cpe), loaded once
    wc0 = col0 - pleft                                     # physical col of padded col 0
    acc = None
    if s == 1:
        for kh in range(KH):
            rows = pad_ref[:, kh:kh + Ho, :, :]            # contiguous row window
            for kw in range(KW):
                t = rows[:, :, wc0 + kw:wc0 + kw + Wo, :] * w_dw[kh, kw]
                acc = t if acc is None else acc + t        # first tap seeds the acc
        y = acc
    else:
        # Stride only the (cheap) H axis per row-tap; keep W contiguous and do a single
        # strided column subsample at the end (avoids KH*KW strided sublane gathers).
        for kh in range(KH):
            rows = pad_ref[:, pl.ds(kh, Ho, s), :, :]      # (1, Ho, Wp_alloc, Cpe)
            for kw in range(KW):
                t = rows[:, :, wc0 + kw:wc0 + kw + W_wide, :] * w_dw[kh, kw]
                acc = t if acc is None else acc + t
        # TODO(synk): subsample W directly on the in-register value (drops this ~60 KiB
        # VMEM round-trip) once strided sublane value-slices lower cleanly.
        dw_ref[...] = acc
        y = dw_ref[:, :, pl.ds(0, Wo, s), :]               # (1, Ho, Wo, Cpe)
    y = y * prm['bn2_scale'][...] + prm['bn2_shift'][...]
    y = y * jax.nn.sigmoid(y)                              # SiLU

    # ---- Squeeze-and-Excite (tiny; f32) ----
    pooled = jnp.sum(y.reshape(Ho * Wo, Cpe), axis=0, keepdims=True) * (1.0 / float(Ho * Wo))
    r = jnp.dot(pooled, prm['w_se1'][...],
                preferred_element_type=jnp.float32) + prm['b_se1'][...]
    r = r * jax.nn.sigmoid(r)                              # SiLU
    g = jax.nn.sigmoid(jnp.dot(r, prm['w_se2'][...],
                               preferred_element_type=jnp.float32) + prm['b_se2'][...])
    y = y * g.reshape(1, 1, 1, Cpe)

    # ---- 1x1 project on the MXU (bf16) + BN (no activation) ----
    z = jnp.dot(y.reshape(Ho * Wo, Cpe).astype(jnp.bfloat16),
                prm['w_proj'][...],                        # bf16 weights
                preferred_element_type=jnp.float32)
    z = z * prm['bn3_scale'][...] + prm['bn3_shift'][...]
    z = z.reshape(1, Ho, Wo, Cpo)

    if cfg['skip']:
        # DropConnect is identity at inference; padded lanes of both operands are zero.
        z = z + _lane_pad(inp, Cpo)
    return z


def make_stage_call(B, cfgs, out_dtype=jnp.float32):
    """Build a single fused pallas_call running every MBConv block of the stage."""
    H0, W0, Cin0 = cfgs[0]['H'], cfgs[0]['W'], cfgs[0]['Cin']
    Ho_l, Wo_l, Cout_l = cfgs[-1]['Ho'], cfgs[-1]['Wo'], cfgs[-1]['Cout']
    names_per_block = [_block_param_names(cfg) for cfg in cfgs]

    def kernel(*refs):
        it = iter(refs)
        x_ref = next(it)
        prm = [{n: next(it) for n in names} for names in names_per_block]
        o_ref = next(it)
        scratch = list(it)

        act = x_ref[...]                                   # (1, H0, W0, Cin0), unpadded C
        si = 0
        for i, cfg in enumerate(cfgs):
            pad_ref = scratch[si]; si += 1
            dw_ref = None
            if cfg['stride'] > 1:
                dw_ref = scratch[si]; si += 1
            act = _mbconv_block(act, prm[i], pad_ref, dw_ref, cfg)

        # Final store: drop the in-VMEM lane padding; HBM output stays unpadded in C.
        o_ref[...] = act[:, :, :, :Cout_l].astype(o_ref.dtype)

    def _vmem_limit_bytes(est_bytes):
        # ~72% of physical VMEM (~46 MiB on v7x's 64 MiB, ~92 MiB on v5e/v6e's 128 MiB);
        # never below the 32 MiB scoped default.
        try:
            cap = int(pltpu.get_tpu_info().vmem_capacity_bytes)
        except Exception:
            cap = 64 << 20                                 # conservative (v7x-sized)
        return int(max(32 << 20, min(int(0.72 * cap), est_bytes)))

    def call(x, per_block_params):
        ins = [x]
        specs = [pl.BlockSpec((1, H0, W0, Cin0), lambda b: (b, 0, 0, 0))]
        # TODO(synk): mark these constant-index weight specs pipeline_mode=pl.Buffered(1)
        # once single-buffered pipelining is available, to halve resident-weight VMEM.
        for q, names in zip(per_block_params, names_per_block):
            for n in names:
                arr = q[n]
                ins.append(arr)
                specs.append(pl.BlockSpec(arr.shape,
                                          lambda b, _nd=arr.ndim: (0,) * _nd))

        scratch = []
        est = 2 * 4 * H0 * W0 * Cin0 + 2 * 4 * Ho_l * Wo_l * Cout_l
        for q in per_block_params:
            for a in q.values():
                est += 2 * int(a.size) * a.dtype.itemsize  # double-buffered by pipeline
        for cfg in cfgs:
            scratch.append(pltpu.VMEM((1, cfg['Hp'], cfg['Wp_alloc'], cfg['Cpe']),
                                      jnp.float32))
            est += 4 * cfg['Hp'] * cfg['Wp_alloc'] * cfg['Cpe']
            if cfg['stride'] > 1:
                scratch.append(pltpu.VMEM((1, cfg['Ho'], cfg['W_wide'], cfg['Cpe']),
                                          jnp.float32))
                est += 4 * cfg['Ho'] * cfg['W_wide'] * cfg['Cpe']
            est += 4 * 4 * cfg['Ho'] * cfg['Wo'] * cfg['Cpe']   # live values (rough)
        est += 8 << 20                                     # compiler scratch headroom

        return pl.pallas_call(
            kernel,
            out_shape=jax.ShapeDtypeStruct((B, Ho_l, Wo_l, Cout_l), out_dtype),
            grid=(B,),
            in_specs=specs,
            out_specs=pl.BlockSpec((1, Ho_l, Wo_l, Cout_l), lambda b: (b, 0, 0, 0)),
            scratch_shapes=scratch,
            compiler_params=pltpu.CompilerParams(
                dimension_semantics=("parallel",),
                vmem_limit_bytes=_vmem_limit_bytes(est)),
        )(*ins)

    return call


def init_layer_params(key, Cin, Cout, KH, KW, expansion, se_size, eps=1e-5):
    """Deterministic synthetic parameters matching the module's shapes (eval-mode BN folded)."""
    Cexp = Cin * expansion
    ks = jax.random.split(key, 8)

    def bn(k, C):
        gamma = 1.0 + 0.1 * jax.random.normal(k, (C,), jnp.float32)
        beta = 0.1 * jax.random.normal(jax.random.fold_in(k, 1), (C,), jnp.float32)
        mean = jnp.zeros((C,), jnp.float32)
        var = jnp.ones((C,), jnp.float32)
        scale = gamma / jnp.sqrt(var + eps)
        shift = beta - mean * scale
        return scale.reshape(1, C), shift.reshape(1, C)

    p = {}
    p["w_exp"] = 0.1 * jax.random.normal(ks[0], (Cin, Cexp), jnp.float32)
    p["bn1_scale"], p["bn1_shift"] = bn(ks[1], Cexp)
    p["w_dw"] = 0.1 * jax.random.normal(ks[2], (KH, KW, Cexp), jnp.float32)
    p["bn2_scale"], p["bn2_shift"] = bn(ks[3], Cexp)
    p["w_se1"] = 0.1 * jax.random.normal(ks[4], (Cexp, se_size), jnp.float32)
    p["b_se1"] = 0.05 * jax.random.normal(jax.random.fold_in(ks[4], 7),
                                          (1, se_size), jnp.float32)
    p["w_se2"] = 0.1 * jax.random.normal(ks[5], (se_size, Cexp), jnp.float32)
    p["b_se2"] = 0.05 * jax.random.normal(jax.random.fold_in(ks[5], 7),
                                          (1, Cexp), jnp.float32)
    p["w_proj"] = 0.1 * jax.random.normal(ks[6], (Cexp, Cout), jnp.float32)
    p["bn3_scale"], p["bn3_shift"] = bn(ks[7], Cout)
    return p


def pad_block_params(p, cfg):
    """Zero-pad channel dims to the kernel's lane-dense widths; cast MXU weights to bf16."""
    Cpe, Cpo, Sp, n_in = cfg['Cpe'], cfg['Cpo'], cfg['Sp'], cfg['n_in_lanes']

    def pad2(w, r, c, dt=jnp.float32):
        return jnp.zeros((r, c), dt).at[:w.shape[0], :w.shape[1]].set(w.astype(dt))

    q = {}
    if cfg['has_expand']:
        q['w_exp'] = pad2(p['w_exp'], n_in, Cpe, jnp.bfloat16)
        q['bn1_scale'] = pad2(p['bn1_scale'], 1, Cpe)
        q['bn1_shift'] = pad2(p['bn1_shift'], 1, Cpe)
    q['w_dw'] = jnp.zeros((cfg['KH'], cfg['KW'], Cpe), jnp.float32
                          ).at[:, :, :cfg['Cexp']].set(p['w_dw'])
    q['bn2_scale'] = pad2(p['bn2_scale'], 1, Cpe)
    q['bn2_shift'] = pad2(p['bn2_shift'], 1, Cpe)
    q['w_se1'] = pad2(p['w_se1'], Cpe, Sp)
    q['b_se1'] = pad2(p['b_se1'], 1, Sp)
    q['w_se2'] = pad2(p['w_se2'], Sp, Cpe)
    q['b_se2'] = pad2(p['b_se2'], 1, Cpe)
    q['w_proj'] = pad2(p['w_proj'], Cpe, Cpo, jnp.bfloat16)
    q['bn3_scale'] = pad2(p['bn3_scale'], 1, Cpo)
    q['bn3_shift'] = pad2(p['bn3_shift'], 1, Cpo)
    return q


def ref_mbconv(x_nhwc, p, stride, KH, KW, expansion, skip):
    """Pure-JAX reference for one MBConv block (same eval-mode semantics; the two big
    1x1 convs use the same bf16-operand / f32-accumulate scheme as the kernel)."""
    B, H, W, Cin = x_nhwc.shape
    Cexp = Cin * expansion
    hi = jax.lax.Precision.HIGHEST
    if expansion != 1:
        y = jnp.dot(x_nhwc.reshape(-1, Cin).astype(jnp.bfloat16),
                    p["w_exp"].astype(jnp.bfloat16),
                    preferred_element_type=jnp.float32).reshape(B, H, W, Cexp)
        y = y * p["bn1_scale"][0] + p["bn1_shift"][0]
        y = jax.nn.silu(y)
    else:
        y = x_nhwc
    Ho = int(ceil(H / stride))
    Wo = int(ceil(W / stride))
    pad_h = max((Ho - 1) * stride + KH - H, 0)
    pad_w = max((Wo - 1) * stride + KW - W, 0)
    pt = pad_h // 2
    pleft = pad_w // 2
    yp = jnp.pad(y, ((0, 0), (pt, pad_h - pt), (pleft, pad_w - pleft), (0, 0)))
    w = p["w_dw"][:, :, None, :]                          # HWIO, I=1 (depthwise)
    y = jax.lax.conv_general_dilated(
        yp, w, (stride, stride), "VALID",
        dimension_numbers=("NHWC", "HWIO", "NHWC"),
        feature_group_count=Cexp, precision=hi)
    y = y * p["bn2_scale"][0] + p["bn2_shift"][0]
    y = jax.nn.silu(y)
    pooled = jnp.mean(y, axis=(1, 2))
    r = jax.nn.silu(jnp.dot(pooled, p["w_se1"], precision=hi) + p["b_se1"][0])
    g = jax.nn.sigmoid(jnp.dot(r, p["w_se2"], precision=hi) + p["b_se2"][0])
    y = y * g[:, None, None, :]
    z = jnp.dot(y.reshape(-1, Cexp).astype(jnp.bfloat16),
                p["w_proj"].astype(jnp.bfloat16),
                preferred_element_type=jnp.float32).reshape(B, Ho, Wo, -1)
    z = z * p["bn3_scale"][0] + p["bn3_shift"][0]
    if skip:
        z = z + x_nhwc
    return z


if __name__ == "__main__":
    key = jax.random.PRNGKey(0)

    # EnetStage config (small, consistent with module semantics):
    B, Cin, H, W = 2, 4, 16, 16
    num_layers = 2
    out_channels = 8
    stride = 2
    kernel_size = 3
    expansion_factor = 6
    se_ratio = 4
    # drop_connect_rates = [0.1, 0.2]  -> identity at inference

    kx, kp = jax.random.split(key)
    x_nchw = jax.random.normal(kx, (B, Cin, H, W), jnp.float32)   # PyTorch NCHW input
    x = jnp.transpose(x_nchw, (0, 2, 3, 1))                       # -> NHWC (unpadded C)

    cfgs = build_stage_configs(H, W, Cin, out_channels, stride, kernel_size,
                               expansion_factor, se_ratio, num_layers)

    raw_params, padded_params = [], []
    for cfg in cfgs:
        kp, kl = jax.random.split(kp)
        p = init_layer_params(kl, cfg['Cin'], cfg['Cout'], cfg['KH'], cfg['KW'],
                              cfg['expansion'], cfg['se_size'])
        raw_params.append(p)
        padded_params.append(pad_block_params(p, cfg))

    stage_call = make_stage_call(B, cfgs, out_dtype=jnp.float32)
    y = jax.block_until_ready(stage_call(x, padded_params))       # (B, 8, 8, Cout)

    # Pure-JAX reference: chain the per-block reference with the same eval-mode params.
    ref = x
    for cfg, p in zip(cfgs, raw_params):
        ref = ref_mbconv(ref, p, cfg['stride'], cfg['KH'], cfg['KW'],
                         cfg['expansion'], cfg['skip'])

    out_nchw = jnp.transpose(y, (0, 3, 1, 2))
    ref_nchw = jnp.transpose(ref, (0, 3, 1, 2))

    assert out_nchw.shape == (B, out_channels, 8, 8), out_nchw.shape
    if not jnp.allclose(out_nchw, ref_nchw, atol=2e-3, rtol=2e-3):
        err = float(jnp.max(jnp.abs(out_nchw - ref_nchw)))
        raise AssertionError(
            "Pallas EnetStage mismatch vs reference (max abs err %.3e)" % err)
    print("KERNEL_OK")
</pallas_src>

<mosaic_0001>
module attributes {stable_mosaic.version = 11 : i64} {
  func.func @kernel(%arg0: i32, %arg1: memref<1x16x16x4xf32, #tpu.memory_space<vmem>>, %arg2: memref<4x128xbf16, #tpu.memory_space<vmem>>, %arg3: memref<1x128xf32, #tpu.memory_space<vmem>>, %arg4: memref<1x128xf32, #tpu.memory_space<vmem>>, %arg5: memref<3x3x128xf32, #tpu.memory_space<vmem>>, %arg6: memref<1x128xf32, #tpu.memory_space<vmem>>, %arg7: memref<1x128xf32, #tpu.memory_space<vmem>>, %arg8: memref<128x128xf32, #tpu.memory_space<vmem>>, %arg9: memref<1x128xf32, #tpu.memory_space<vmem>>, %arg10: memref<128x128xf32, #tpu.memory_space<vmem>>, %arg11: memref<1x128xf32, #tpu.memory_space<vmem>>, %arg12: memref<128x128xbf16, #tpu.memory_space<vmem>>, %arg13: memref<1x128xf32, #tpu.memory_space<vmem>>, %arg14: memref<1x128xf32, #tpu.memory_space<vmem>>, %arg15: memref<128x128xbf16, #tpu.memory_space<vmem>>, %arg16: memref<1x128xf32, #tpu.memory_space<vmem>>, %arg17: memref<1x128xf32, #tpu.memory_space<vmem>>, %arg18: memref<3x3x128xf32, #tpu.memory_space<vmem>>, %arg19: memref<1x128xf32, #tpu.memory_space<vmem>>, %arg20: memref<1x128xf32, #tpu.memory_space<vmem>>, %arg21: memref<128x128xf32, #tpu.memory_space<vmem>>, %arg22: memref<1x128xf32, #tpu.memory_space<vmem>>, %arg23: memref<128x128xf32, #tpu.memory_space<vmem>>, %arg24: memref<1x128xf32, #tpu.memory_space<vmem>>, %arg25: memref<128x128xbf16, #tpu.memory_space<vmem>>, %arg26: memref<1x128xf32, #tpu.memory_space<vmem>>, %arg27: memref<1x128xf32, #tpu.memory_space<vmem>>, %arg28: memref<1x8x8x8xf32, #tpu.memory_space<vmem>>, %arg29: memref<1x17x24x128xf32, #tpu.memory_space<vmem>>, %arg30: memref<1x8x15x128xf32, #tpu.memory_space<vmem>>, %arg31: memref<1x10x24x128xf32, #tpu.memory_space<vmem>>) attributes {dimension_semantics = [#tpu.dimension_semantics<parallel>], iteration_bounds = array<i64: 2>, scalar_prefetch = 0 : i64, scratch_operands = 3 : i64, tpu.core_type = #tpu.core_type<tc>, window_params = [{transform_indices = @transform_0, window_bounds = array<i64: 1, 16, 16, 4>}, {pipeline_mode = #tpu.pipeline_mode<synchronous>, transform_indices = @transform_1, window_bounds = array<i64: 4, 128>}, {pipeline_mode = #tpu.pipeline_mode<synchronous>, transform_indices = @transform_2, window_bounds = array<i64: 1, 128>}, {pipeline_mode = #tpu.pipeline_mode<synchronous>, transform_indices = @transform_3, window_bounds = array<i64: 1, 128>}, {pipeline_mode = #tpu.pipeline_mode<synchronous>, transform_indices = @transform_4, window_bounds = array<i64: 3, 3, 128>}, {pipeline_mode = #tpu.pipeline_mode<synchronous>, transform_indices = @transform_5, window_bounds = array<i64: 1, 128>}, {pipeline_mode = #tpu.pipeline_mode<synchronous>, transform_indices = @transform_6, window_bounds = array<i64: 1, 128>}, {pipeline_mode = #tpu.pipeline_mode<synchronous>, transform_indices = @transform_7, window_bounds = array<i64: 128, 128>}, {pipeline_mode = #tpu.pipeline_mode<synchronous>, transform_indices = @transform_8, window_bounds = array<i64: 1, 128>}, {pipeline_mode = #tpu.pipeline_mode<synchronous>, transform_indices = @transform_9, window_bounds = array<i64: 128, 128>}, {pipeline_mode = #tpu.pipeline_mode<synchronous>, transform_indices = @transform_10, window_bounds = array<i64: 1, 128>}, {pipeline_mode = #tpu.pipeline_mode<synchronous>, transform_indices = @transform_11, window_bounds = array<i64: 128, 128>}, {pipeline_mode = #tpu.pipeline_mode<synchronous>, transform_indices = @transform_12, window_bounds = array<i64: 1, 128>}, {pipeline_mode = #tpu.pipeline_mode<synchronous>, transform_indices = @transform_13, window_bounds = array<i64: 1, 128>}, {pipeline_mode = #tpu.pipeline_mode<synchronous>, transform_indices = @transform_14, window_bounds = array<i64: 128, 128>}, {pipeline_mode = #tpu.pipeline_mode<synchronous>, transform_indices = @transform_15, window_bounds = array<i64: 1, 128>}, {pipeline_mode = #tpu.pipeline_mode<synchronous>, transform_indices = @transform_16, window_bounds = array<i64: 1, 128>}, {pipeline_mode = #tpu.pipeline_mode<synchronous>, transform_indices = @transform_17, window_bounds = array<i64: 3, 3, 128>}, {pipeline_mode = #tpu.pipeline_mode<synchronous>, transform_indices = @transform_18, window_bounds = array<i64: 1, 128>}, {pipeline_mode = #tpu.pipeline_mode<synchronous>, transform_indices = @transform_19, window_bounds = array<i64: 1, 128>}, {pipeline_mode = #tpu.pipeline_mode<synchronous>, transform_indices = @transform_20, window_bounds = array<i64: 128, 128>}, {pipeline_mode = #tpu.pipeline_mode<synchronous>, transform_indices = @transform_21, window_bounds = array<i64: 1, 128>}, {pipeline_mode = #tpu.pipeline_mode<synchronous>, transform_indices = @transform_22, window_bounds = array<i64: 128, 128>}, {pipeline_mode = #tpu.pipeline_mode<synchronous>, transform_indices = @transform_23, window_bounds = array<i64: 1, 128>}, {pipeline_mode = #tpu.pipeline_mode<synchronous>, transform_indices = @transform_24, window_bounds = array<i64: 128, 128>}, {pipeline_mode = #tpu.pipeline_mode<synchronous>, transform_indices = @transform_25, window_bounds = array<i64: 1, 128>}, {pipeline_mode = #tpu.pipeline_mode<synchronous>, transform_indices = @transform_26, window_bounds = array<i64: 1, 128>}, {transform_indices = @transform_27, window_bounds = array<i64: 1, 8, 8, 8>}]} {
    %c0 = arith.constant 0 : index
    %c0_0 = arith.constant 0 : index
    %c0_1 = arith.constant 0 : index
    %c0_2 = arith.constant 0 : index
    %0 = vector.load %arg1[%c0, %c0_0, %c0_1, %c0_2] : memref<1x16x16x4xf32, #tpu.memory_space<vmem>>, vector<1x16x16x4xf32>
    %1 = vector.shape_cast %0 : vector<1x16x16x4xf32> to vector<256x4xf32>
    %2 = arith.truncf %1 : vector<256x4xf32> to vector<256x4xbf16>
    %c0_3 = arith.constant 0 : index
    %c0_4 = arith.constant 0 : index
    %3 = vector.load %arg2[%c0_3, %c0_4] : memref<4x128xbf16, #tpu.memory_space<vmem>>, vector<4x128xbf16>
    %cst = arith.constant dense<0.000000e+00> : vector<256x128xf32>
    %4 = tpu.matmul %2, %3, %cst {dimension_numbers = #tpu.dot_dimension_numbers<[1], [0], [0], [1], [0, 0, 1, 1], [], []>} : vector<256x4xbf16>, vector<4x128xbf16>, vector<256x128xf32> -> vector<256x128xf32>
    %c0_5 = arith.constant 0 : index
    %c0_6 = arith.constant 0 : index
    %5 = vector.load %arg3[%c0_5, %c0_6] : memref<1x128xf32, #tpu.memory_space<vmem>>, vector<1x128xf32>
    %6 = vector.broadcast %5 : vector<1x128xf32> to vector<256x128xf32>
    %7 = arith.mulf %4, %6 : vector<256x128xf32>
    %c0_7 = arith.constant 0 : index
    %c0_8 = arith.constant 0 : index
    %8 = vector.load %arg4[%c0_7, %c0_8] : memref<1x128xf32, #tpu.memory_space<vmem>>, vector<1x128xf32>
    %9 = vector.broadcast %8 : vector<1x128xf32> to vector<256x128xf32>
    %10 = arith.addf %7, %9 : vector<256x128xf32>
    %11 = arith.negf %10 : vector<256x128xf32>
    %12 = math.exp %11 : vector<256x128xf32>
    %cst_9 = arith.constant 1.000000e+00 : f32
    %13 = vector.broadcast %cst_9 : f32 to vector<256x128xf32>
    %14 = arith.addf %13, %12 : vector<256x128xf32>
    %15 = arith.divf %13, %14 : vector<256x128xf32>
    %16 = arith.mulf %10, %15 : vector<256x128xf32>
    %17 = vector.shape_cast %16 : vector<256x128xf32> to vector<1x16x16x128xf32>
    %cst_10 = arith.constant 0.000000e+00 : f32
    %18 = vector.broadcast %cst_10 : f32 to vector<1x1x24x128xf32>
    %c0_11 = arith.constant 0 : index
    %c16 = arith.constant 16 : index
    %c0_12 = arith.constant 0 : index
    %c0_13 = arith.constant 0 : index
    %19 = vector.load %arg29[%c0_11, %c16, %c0_12, %c0_13] : memref<1x17x24x128xf32, #tpu.memory_space<vmem>>, vector<1x1x24x128xf32>
    tpu.vector_store %arg29[%c0_11, %c16, %c0_12, %c0_13], %18 {strides = array<i32>} : memref<1x17x24x128xf32, #tpu.memory_space<vmem>>, vector<1x1x24x128xf32>,
    %cst_14 = arith.constant 0.000000e+00 : f32
    %20 = vector.broadcast %cst_14 : f32 to vector<1x17x8x128xf32>
    %c0_15 = arith.constant 0 : index
    %c0_16 = arith.constant 0 : index
    %c16_17 = arith.constant 16 : index
    %c0_18 = arith.constant 0 : index
    %21 = vector.load %arg29[%c0_15, %c0_16, %c16_17, %c0_18] : memref<1x17x24x128xf32, #tpu.memory_space<vmem>>, vector<1x17x8x128xf32>
    tpu.vector_store %arg29[%c0_15, %c0_16, %c16_17, %c0_18], %20 {strides = array<i32>} : memref<1x17x24x128xf32, #tpu.memory_space<vmem>>, vector<1x17x8x128xf32>,
    %c0_19 = arith.constant 0 : index
    %c0_20 = arith.constant 0 : index
    %c0_21 = arith.constant 0 : index
    %c0_22 = arith.constant 0 : index
    %22 = vector.load %arg29[%c0_19, %c0_20, %c0_21, %c0_22] : memref<1x17x24x128xf32, #tpu.memory_space<vmem>>, vector<1x16x16x128xf32>
    tpu.vector_store %arg29[%c0_19, %c0_20, %c0_21, %c0_22], %17 {strides = array<i32>} : memref<1x17x24x128xf32, #tpu.memory_space<vmem>>, vector<1x16x16x128xf32>,
    %c0_23 = arith.constant 0 : index
    %c0_24 = arith.constant 0 : index
    %c0_25 = arith.constant 0 : index
    %23 = vector.load %arg5[%c0_23, %c0_24, %c0_25] : memref<3x3x128xf32, #tpu.memory_space<vmem>>, vector<3x3x128xf32>
    %c0_26 = arith.constant 0 : index
    %c0_27 = arith.constant 0 : index
    %c0_28 = arith.constant 0 : index
    %c0_29 = arith.constant 0 : index
    %24 = tpu.strided_load %arg29[%c0_26, %c0_27, %c0_28, %c0_29] {strides = array<i32: 1, 2, 1, 1>} : memref<1x17x24x128xf32, #tpu.memory_space<vmem>>, vector<1x8x24x128xf32>
    %25 = vector.extract_strided_slice %24 {offsets = [0, 0, 0, 0], sizes = [1, 8, 15, 128], strides = [1, 1, 1, 1]} : vector<1x8x24x128xf32> to vector<1x8x15x128xf32>
    %26 = vector.extract_strided_slice %23 {offsets = [0, 0, 0], sizes = [1, 1, 128], strides = [1, 1, 1]} : vector<3x3x128xf32> to vector<1x1x128xf32>
    %27 = vector.shape_cast %26 : vector<1x1x128xf32> to vector<128xf32>
    %28 = vector.shape_cast %27 : vector<128xf32> to vector<1x1x1x128xf32>
    %29 = vector.broadcast %28 : vector<1x1x1x128xf32> to vector<1x8x15x128xf32>
    %30 = arith.mulf %25, %29 : vector<1x8x15x128xf32>
    %31 = vector.extract_strided_slice %24 {offsets = [0, 0, 1, 0], sizes = [1, 8, 15, 128], strides = [1, 1, 1, 1]} : vector<1x8x24x128xf32> to vector<1x8x15x128xf32>
    %32 = vector.extract_strided_slice %23 {offsets = [0, 1, 0], sizes = [1, 1, 128], strides = [1, 1, 1]} : vector<3x3x128xf32> to vector<1x1x128xf32>
    %33 = vector.shape_cast %32 : vector<1x1x128xf32> to vector<128xf32>
    %34 = vector.shape_cast %33 : vector<128xf32> to vector<1x1x1x128xf32>
    %35 = vector.broadcast %34 : vector<1x1x1x128xf32> to vector<1x8x15x128xf32>
    %36 = arith.mulf %31, %35 : vector<1x8x15x128xf32>
    %37 = arith.addf %30, %36 : vector<1x8x15x128xf32>
    %38 = vector.extract_strided_slice %24 {offsets = [0, 0, 2, 0], sizes = [1, 8, 15, 128], strides = [1, 1, 1, 1]} : vector<1x8x24x128xf32> to vector<1x8x15x128xf32>
    %39 = vector.extract_strided_slice %23 {offsets = [0, 2, 0], sizes = [1, 1, 128], strides = [1, 1, 1]} : vector<3x3x128xf32> to vector<1x1x128xf32>
    %40 = vector.shape_cast %39 : vector<1x1x128xf32> to vector<128xf32>
    %41 = vector.shape_cast %40 : vector<128xf32> to vector<1x1x1x128xf32>
    %42 = vector.broadcast %41 : vector<1x1x1x128xf32> to vector<1x8x15x128xf32>
    %43 = arith.mulf %38, %42 : vector<1x8x15x128xf32>
    %44 = arith.addf %37, %43 : vector<1x8x15x128xf32>
    %c0_30 = arith.constant 0 : index
    %c1 = arith.constant 1 : index
    %c0_31 = arith.constant 0 : index
    %c0_32 = arith.constant 0 : index
    %45 = tpu.strided_load %arg29[%c0_30, %c1, %c0_31, %c0_32] {strides = array<i32: 1, 2, 1, 1>} : memref<1x17x24x128xf32, #tpu.memory_space<vmem>>, vector<1x8x24x128xf32>
    %46 = vector.extract_strided_slice %45 {offsets = [0, 0, 0, 0], sizes = [1, 8, 15, 128], strides = [1, 1, 1, 1]} : vector<1x8x24x128xf32> to vector<1x8x15x128xf32>
    %47 = vector.extract_strided_slice %23 {offsets = [1, 0, 0], sizes = [1, 1, 128], strides = [1, 1, 1]} : vector<3x3x128xf32> to vector<1x1x128xf32>
    %48 = vector.shape_cast %47 : vector<1x1x128xf32> to vector<128xf32>
    %49 = vector.shape_cast %48 : vector<128xf32> to vector<1x1x1x128xf32>
    %50 = vector.broadcast %49 : vector<1x1x1x128xf32> to vector<1x8x15x128xf32>
    %51 = arith.mulf %46, %50 : vector<1x8x15x128xf32>
    %52 = arith.addf %44, %51 : vector<1x8x15x128xf32>
    %53 = vector.extract_strided_slice %45 {offsets = [0, 0, 1, 0], sizes = [1, 8, 15, 128], strides = [1, 1, 1, 1]} : vector<1x8x24x128xf32> to vector<1x8x15x128xf32>
    %54 = vector.extract_strided_slice %23 {offsets = [1, 1, 0], sizes = [1, 1, 128], strides = [1, 1, 1]} : vector<3x3x128xf32> to vector<1x1x128xf32>
    %55 = vector.shape_cast %54 : vector<1x1x128xf32> to vector<128xf32>
    %56 = vector.shape_cast %55 : vector<128xf32> to vector<1x1x1x128xf32>
    %57 = vector.broadcast %56 : vector<1x1x1x128xf32> to vector<1x8x15x128xf32>
    %58 = arith.mulf %53, %57 : vector<1x8x15x128xf32>
    %59 = arith.addf %52, %58 : vector<1x8x15x128xf32>
    %60 = vector.extract_strided_slice %45 {offsets = [0, 0, 2, 0], sizes = [1, 8, 15, 128], strides = [1, 1, 1, 1]} : vector<1x8x24x128xf32> to vector<1x8x15x128xf32>
    %61 = vector.extract_strided_slice %23 {offsets = [1, 2, 0], sizes = [1, 1, 128], strides = [1, 1, 1]} : vector<3x3x128xf32> to vector<1x1x128xf32>
    %62 = vector.shape_cast %61 : vector<1x1x128xf32> to vector<128xf32>
    %63 = vector.shape_cast %62 : vector<128xf32> to vector<1x1x1x128xf32>
    %64 = vector.broadcast %63 : vector<1x1x1x128xf32> to vector<1x8x15x128xf32>
    %65 = arith.mulf %60, %64 : vector<1x8x15x128xf32>
    %66 = arith.addf %59, %65 : vector<1x8x15x128xf32>
    %c0_33 = arith.constant 0 : index
    %c2 = arith.constant 2 : index
    %c0_34 = arith.constant 0 : index
    %c0_35 = arith.constant 0 : index
    %67 = tpu.strided_load %arg29[%c0_33, %c2, %c0_34, %c0_35] {strides = array<i32: 1, 2, 1, 1>} : memref<1x17x24x128xf32, #tpu.memory_space<vmem>>, vector<1x8x24x128xf32>
    %68 = vector.extract_strided_slice %67 {offsets = [0, 0, 0, 0], sizes = [1, 8, 15, 128], strides = [1, 1, 1, 1]} : vector<1x8x24x128xf32> to vector<1x8x15x128xf32>
    %69 = vector.extract_strided_slice %23 {offsets = [2, 0, 0], sizes = [1, 1, 128], strides = [1, 1, 1]} : vector<3x3x128xf32> to vector<1x1x128xf32>
    %70 = vector.shape_cast %69 : vector<1x1x128xf32> to vector<128xf32>
    %71 = vector.shape_cast %70 : vector<128xf32> to vector<1x1x1x128xf32>
    %72 = vector.broadcast %71 : vector<1x1x1x128xf32> to vector<1x8x15x128xf32>
    %73 = arith.mulf %68, %72 : vector<1x8x15x128xf32>
    %74 = arith.addf %66, %73 : vector<1x8x15x128xf32>
    %75 = vector.extract_strided_slice %67 {offsets = [0, 0, 1, 0], sizes = [1, 8, 15, 128], strides = [1, 1, 1, 1]} : vector<1x8x24x128xf32> to vector<1x8x15x128xf32>
    %76 = vector.extract_strided_slice %23 {offsets = [2, 1, 0], sizes = [1, 1, 128], strides = [1, 1, 1]} : vector<3x3x128xf32> to vector<1x1x128xf32>
    %77 = vector.shape_cast %76 : vector<1x1x128xf32> to vector<128xf32>
    %78 = vector.shape_cast %77 : vector<128xf32> to vector<1x1x1x128xf32>
    %79 = vector.broadcast %78 : vector<1x1x1x128xf32> to vector<1x8x15x128xf32>
    %80 = arith.mulf %75, %79 : vector<1x8x15x128xf32>
    %81 = arith.addf %74, %80 : vector<1x8x15x128xf32>
    %82 = vector.extract_strided_slice %67 {offsets = [0, 0, 2, 0], sizes = [1, 8, 15, 128], strides = [1, 1, 1, 1]} : vector<1x8x24x128xf32> to vector<1x8x15x128xf32>
    %83 = vector.extract_strided_slice %23 {offsets = [2, 2, 0], sizes = [1, 1, 128], strides = [1, 1, 1]} : vector<3x3x128xf32> to vector<1x1x128xf32>
    %84 = vector.shape_cast %83 : vector<1x1x128xf32> to vector<128xf32>
    %85 = vector.shape_cast %84 : vector<128xf32> to vector<1x1x1x128xf32>
    %86 = vector.broadcast %85 : vector<1x1x1x128xf32> to vector<1x8x15x128xf32>
    %87 = arith.mulf %82, %86 : vector<1x8x15x128xf32>
    %88 = arith.addf %81, %87 : vector<1x8x15x128xf32>
    %c0_36 = arith.constant 0 : index
    %c0_37 = arith.constant 0 : index
    %c0_38 = arith.constant 0 : index
    %c0_39 = arith.constant 0 : index
    %89 = vector.load %arg30[%c0_36, %c0_37, %c0_38, %c0_39] : memref<1x8x15x128xf32, #tpu.memory_space<vmem>>, vector<1x8x15x128xf32>
    tpu.vector_store %arg30[%c0_36, %c0_37, %c0_38, %c0_39], %88 {strides = array<i32>} : memref<1x8x15x128xf32, #tpu.memory_space<vmem>>, vector<1x8x15x128xf32>,
    %c0_40 = arith.constant 0 : index
    %c0_41 = arith.constant 0 : index
    %c0_42 = arith.constant 0 : index
    %c0_43 = arith.constant 0 : index
    %90 = tpu.strided_load %arg30[%c0_40, %c0_41, %c0_42, %c0_43] {strides = array<i32: 1, 1, 2, 1>} : memref<1x8x15x128xf32, #tpu.memory_space<vmem>>, vector<1x8x8x128xf32>
    %c0_44 = arith.constant 0 : index
    %c0_45 = arith.constant 0 : index
    %91 = vector.load %arg6[%c0_44, %c0_45] : memref<1x128xf32, #tpu.memory_space<vmem>>, vector<1x128xf32>
    %92 = vector.shape_cast %91 : vector<1x128xf32> to vector<1x1x1x128xf32>
    %93 = vector.broadcast %92 : vector<1x1x1x128xf32> to vector<1x8x8x128xf32>
    %94 = arith.mulf %90, %93 : vector<1x8x8x128xf32>
    %c0_46 = arith.constant 0 : index
    %c0_47 = arith.constant 0 : index
    %95 = vector.load %arg7[%c0_46, %c0_47] : memref<1x128xf32, #tpu.memory_space<vmem>>, vector<1x128xf32>
    %96 = vector.shape_cast %95 : vector<1x128xf32> to vector<1x1x1x128xf32>
    %97 = vector.broadcast %96 : vector<1x1x1x128xf32> to vector<1x8x8x128xf32>
    %98 = arith.addf %94, %97 : vector<1x8x8x128xf32>
    %99 = arith.negf %98 : vector<1x8x8x128xf32>
    %100 = math.exp %99 : vector<1x8x8x128xf32>
    %cst_48 = arith.constant 1.000000e+00 : f32
    %101 = vector.broadcast %cst_48 : f32 to vector<1x8x8x128xf32>
    %102 = arith.addf %101, %100 : vector<1x8x8x128xf32>
    %103 = arith.divf %101, %102 : vector<1x8x8x128xf32>
    %104 = arith.mulf %98, %103 : vector<1x8x8x128xf32>
    %105 = vector.shape_cast %104 : vector<1x8x8x128xf32> to vector<64x128xf32>
    %cst_49 = arith.constant dense<0.000000e+00> : vector<128xf32>
    %106 = vector.multi_reduction <add>, %105, %cst_49 [0] : vector<64x128xf32> to vector<128xf32>
    %107 = vector.shape_cast %106 : vector<128xf32> to vector<1x128xf32>
    %cst_50 = arith.constant 1.562500e-02 : f32
    %108 = vector.broadcast %cst_50 : f32 to vector<1x128xf32>
    %109 = arith.mulf %107, %108 : vector<1x128xf32>
    %c0_51 = arith.constant 0 : index
    %c0_52 = arith.constant 0 : index
    %110 = vector.load %arg8[%c0_51, %c0_52] : memref<128x128xf32, #tpu.memory_space<vmem>>, vector<128x128xf32>
    %cst_53 = arith.constant dense<0.000000e+00> : vector<1x128xf32>
    %111 = tpu.matmul %109, %110, %cst_53 {dimension_numbers = #tpu.dot_dimension_numbers<[1], [0], [0], [1], [0, 0, 1, 1], [], []>} : vector<1x128xf32>, vector<128x128xf32>, vector<1x128xf32> -> vector<1x128xf32>
    %c0_54 = arith.constant 0 : index
    %c0_55 = arith.constant 0 : index
    %112 = vector.load %arg9[%c0_54, %c0_55] : memref<1x128xf32, #tpu.memory_space<vmem>>, vector<1x128xf32>
    %113 = arith.addf %111, %112 : vector<1x128xf32>
    %114 = arith.negf %113 : vector<1x128xf32>
    %115 = math.exp %114 : vector<1x128xf32>
    %cst_56 = arith.constant 1.000000e+00 : f32
    %116 = vector.broadcast %cst_56 : f32 to vector<1x128xf32>
    %117 = arith.addf %116, %115 : vector<1x128xf32>
    %118 = arith.divf %116, %117 : vector<1x128xf32>
    %119 = arith.mulf %113, %118 : vector<1x128xf32>
    %c0_57 = arith.constant 0 : index
    %c0_58 = arith.constant 0 : index
    %120 = vector.load %arg10[%c0_57, %c0_58] : memref<128x128xf32, #tpu.memory_space<vmem>>, vector<128x128xf32>
    %cst_59 = arith.constant dense<0.000000e+00> : vector<1x128xf32>
    %121 = tpu.matmul %119, %120, %cst_59 {dimension_numbers = #tpu.dot_dimension_numbers<[1], [0], [0], [1], [0, 0, 1, 1], [], []>} : vector<1x128xf32>, vector<128x128xf32>, vector<1x128xf32> -> vector<1x128xf32>
    %c0_60 = arith.constant 0 : index
    %c0_61 = arith.constant 0 : index
    %122 = vector.load %arg11[%c0_60, %c0_61] : memref<1x128xf32, #tpu.memory_space<vmem>>, vector<1x128xf32>
    %123 = arith.addf %121, %122 : vector<1x128xf32>
    %124 = arith.negf %123 : vector<1x128xf32>
    %125 = math.exp %124 : vector<1x128xf32>
    %cst_62 = arith.constant 1.000000e+00 : f32
    %126 = vector.broadcast %cst_62 : f32 to vector<1x128xf32>
    %127 = arith.addf %126, %125 : vector<1x128xf32>
    %128 = arith.divf %126, %127 : vector<1x128xf32>
    %129 = vector.shape_cast %128 : vector<1x128xf32> to vector<1x1x1x128xf32>
    %130 = vector.broadcast %129 : vector<1x1x1x128xf32> to vector<1x8x8x128xf32>
    %131 = arith.mulf %104, %130 : vector<1x8x8x128xf32>
    %132 = vector.shape_cast %131 : vector<1x8x8x128xf32> to vector<64x128xf32>
    %133 = arith.truncf %132 : vector<64x128xf32> to vector<64x128xbf16>
    %c0_63 = arith.constant 0 : index
    %c0_64 = arith.constant 0 : index
    %134 = vector.load %arg12[%c0_63, %c0_64] : memref<128x128xbf16, #tpu.memory_space<vmem>>, vector<128x128xbf16>
    %cst_65 = arith.constant dense<0.000000e+00> : vector<64x128xf32>
    %135 = tpu.matmul %133, %134, %cst_65 {dimension_numbers = #tpu.dot_dimension_numbers<[1], [0], [0], [1], [0, 0, 1, 1], [], []>} : vector<64x128xbf16>, vector<128x128xbf16>, vector<64x128xf32> -> vector<64x128xf32>
    %c0_66 = arith.constant 0 : index
    %c0_67 = arith.constant 0 : index
    %136 = vector.load %arg13[%c0_66, %c0_67] : memref<1x128xf32, #tpu.memory_space<vmem>>, vector<1x128xf32>
    %137 = vector.broadcast %136 : vector<1x128xf32> to vector<64x128xf32>
    %138 = arith.mulf %135, %137 : vector<64x128xf32>
    %c0_68 = arith.constant 0 : index
    %c0_69 = arith.constant 0 : index
    %139 = vector.load %arg14[%c0_68, %c0_69] : memref<1x128xf32, #tpu.memory_space<vmem>>, vector<1x128xf32>
    %140 = vector.broadcast %139 : vector<1x128xf32> to vector<64x128xf32>
    %141 = arith.addf %138, %140 : vector<64x128xf32>
    %142 = vector.shape_cast %141 : vector<64x128xf32> to vector<1x8x8x128xf32>
    %143 = vector.shape_cast %142 : vector<1x8x8x128xf32> to vector<64x128xf32>
    %144 = arith.truncf %143 : vector<64x128xf32> to vector<64x128xbf16>
    %c0_70 = arith.constant 0 : index
    %c0_71 = arith.constant 0 : index
    %145 = vector.load %arg15[%c0_70, %c0_71] : memref<128x128xbf16, #tpu.memory_space<vmem>>, vector<128x128xbf16>
    %cst_72 = arith.constant dense<0.000000e+00> : vector<64x128xf32>
    %146 = tpu.matmul %144, %145, %cst_72 {dimension_numbers = #tpu.dot_dimension_numbers<[1], [0], [0], [1], [0, 0, 1, 1], [], []>} : vector<64x128xbf16>, vector<128x128xbf16>, vector<64x128xf32> -> vector<64x128xf32>
    %c0_73 = arith.constant 0 : index
    %c0_74 = arith.constant 0 : index
    %147 = vector.load %arg16[%c0_73, %c0_74] : memref<1x128xf32, #tpu.memory_space<vmem>>, vector<1x128xf32>
    %148 = vector.broadcast %147 : vector<1x128xf32> to vector<64x128xf32>
    %149 = arith.mulf %146, %148 : vector<64x128xf32>
    %c0_75 = arith.constant 0 : index
    %c0_76 = arith.constant 0 : index
    %150 = vector.load %arg17[%c0_75, %c0_76] : memref<1x128xf32, #tpu.memory_space<vmem>>, vector<1x128xf32>
    %151 = vector.broadcast %150 : vector<1x128xf32> to vector<64x128xf32>
    %152 = arith.addf %149, %151 : vector<64x128xf32>
    %153 = arith.negf %152 : vector<64x128xf32>
    %154 = math.exp %153 : vector<64x128xf32>
    %cst_77 = arith.constant 1.000000e+00 : f32
    %155 = vector.broadcast %cst_77 : f32 to vector<64x128xf32>
    %156 = arith.addf %155, %154 : vector<64x128xf32>
    %157 = arith.divf %155, %156 : vector<64x128xf32>
    %158 = arith.mulf %152, %157 : vector<64x128xf32>
    %159 = vector.shape_cast %158 : vector<64x128xf32> to vector<1x8x8x128xf32>
    %cst_78 = arith.constant 0.000000e+00 : f32
    %160 = vector.broadcast %cst_78 : f32 to vector<1x1x24x128xf32>
    %c0_79 = arith.constant 0 : index
    %c0_80 = arith.constant 0 : index
    %c0_81 = arith.constant 0 : index
    %c0_82 = arith.constant 0 : index
    %161 = vector.load %arg31[%c0_79, %c0_80, %c0_81, %c0_82] : memref<1x10x24x128xf32, #tpu.memory_space<vmem>>, vector<1x1x24x128xf32>
    tpu.vector_store %arg31[%c0_79, %c0_80, %c0_81, %c0_82], %160 {strides = array<i32>} : memref<1x10x24x128xf32, #tpu.memory_space<vmem>>, vector<1x1x24x128xf32>,
    %cst_83 = arith.constant 0.000000e+00 : f32
    %162 = vector.broadcast %cst_83 : f32 to vector<1x1x24x128xf32>
    %c0_84 = arith.constant 0 : index
    %c9 = arith.constant 9 : index
    %c0_85 = arith.constant 0 : index
    %c0_86 = arith.constant 0 : index
    %163 = vector.load %arg31[%c0_84, %c9, %c0_85, %c0_86] : memref<1x10x24x128xf32, #tpu.memory_space<vmem>>, vector<1x1x24x128xf32>
    tpu.vector_store %arg31[%c0_84, %c9, %c0_85, %c0_86], %162 {strides = array<i32>} : memref<1x10x24x128xf32, #tpu.memory_space<vmem>>, vector<1x1x24x128xf32>,
    %cst_87 = arith.constant 0.000000e+00 : f32
    %164 = vector.broadcast %cst_87 : f32 to vector<1x10x8x128xf32>
    %c0_88 = arith.constant 0 : index
    %c0_89 = arith.constant 0 : index
    %c0_90 = arith.constant 0 : index
    %c0_91 = arith.constant 0 : index
    %165 = vector.load %arg31[%c0_88, %c0_89, %c0_90, %c0_91] : memref<1x10x24x128xf32, #tpu.memory_space<vmem>>, vector<1x10x8x128xf32>
    tpu.vector_store %arg31[%c0_88, %c0_89, %c0_90, %c0_91], %164 {strides = array<i32>} : memref<1x10x24x128xf32, #tpu.memory_space<vmem>>, vector<1x10x8x128xf32>,
    %cst_92 = arith.constant 0.000000e+00 : f32
    %166 = vector.broadcast %cst_92 : f32 to vector<1x10x8x128xf32>
    %c0_93 = arith.constant 0 : index
    %c0_94 = arith.constant 0 : index
    %c16_95 = arith.constant 16 : index
    %c0_96 = arith.constant 0 : index
    %167 = vector.load %arg31[%c0_93, %c0_94, %c16_95, %c0_96] : memref<1x10x24x128xf32, #tpu.memory_space<vmem>>, vector<1x10x8x128xf32>
    tpu.vector_store %arg31[%c0_93, %c0_94, %c16_95, %c0_96], %166 {strides = array<i32>} : memref<1x10x24x128xf32, #tpu.memory_space<vmem>>, vector<1x10x8x128xf32>,
    %c0_97 = arith.constant 0 : index
    %c1_98 = arith.constant 1 : index
    %c8 = arith.constant 8 : index
    %c0_99 = arith.constant 0 : index
    %168 = vector.load %arg31[%c0_97, %c1_98, %c8, %c0_99] : memref<1x10x24x128xf32, #tpu.memory_space<vmem>>, vector<1x8x8x128xf32>
    tpu.vector_store %arg31[%c0_97, %c1_98, %c8, %c0_99], %159 {strides = array<i32>} : memref<1x10x24x128xf32, #tpu.memory_space<vmem>>, vector<1x8x8x128xf32>,
    %c0_100 = arith.constant 0 : index
    %c0_101 = arith.constant 0 : index
    %c0_102 = arith.constant 0 : index
    %169 = vector.load %arg18[%c0_100, %c0_101, %c0_102] : memref<3x3x128xf32, #tpu.memory_space<vmem>>, vector<3x3x128xf32>
    %c0_103 = arith.constant 0 : index
    %c0_104 = arith.constant 0 : index
    %c0_105 = arith.constant 0 : index
    %c0_106 = arith.constant 0 : index
    %170 = vector.load %arg31[%c0_103, %c0_104, %c0_105, %c0_106] : memref<1x10x24x128xf32, #tpu.memory_space<vmem>>, vector<1x8x24x128xf32>
    %171 = vector.extract_strided_slice %170 {offsets = [0, 0, 7, 0], sizes = [1, 8, 8, 128], strides = [1, 1, 1, 1]} : vector<1x8x24x128xf32> to vector<1x8x8x128xf32>
    %172 = vector.extract_strided_slice %169 {offsets = [0, 0, 0], sizes = [1, 1, 128], strides = [1, 1, 1]} : vector<3x3x128xf32> to vector<1x1x128xf32>
    %173 = vector.shape_cast %172 : vector<1x1x128xf32> to vector<128xf32>
    %174 = vector.shape_cast %173 : vector<128xf32> to vector<1x1x1x128xf32>
    %175 = vector.broadcast %174 : vector<1x1x1x128xf32> to vector<1x8x8x128xf32>
    %176 = arith.mulf %171, %175 : vector<1x8x8x128xf32>
    %177 = vector.extract_strided_slice %170 {offsets = [0, 0, 8, 0], sizes = [1, 8, 8, 128], strides = [1, 1, 1, 1]} : vector<1x8x24x128xf32> to vector<1x8x8x128xf32>
    %178 = vector.extract_strided_slice %169 {offsets = [0, 1, 0], sizes = [1, 1, 128], strides = [1, 1, 1]} : vector<3x3x128xf32> to vector<1x1x128xf32>
    %179 = vector.shape_cast %178 : vector<1x1x128xf32> to vector<128xf32>
    %180 = vector.shape_cast %179 : vector<128xf32> to vector<1x1x1x128xf32>
    %181 = vector.broadcast %180 : vector<1x1x1x128xf32> to vector<1x8x8x128xf32>
    %182 = arith.mulf %177, %181 : vector<1x8x8x128xf32>
    %183 = arith.addf %176, %182 : vector<1x8x8x128xf32>
    %184 = vector.extract_strided_slice %170 {offsets = [0, 0, 9, 0], sizes = [1, 8, 8, 128], strides = [1, 1, 1, 1]} : vector<1x8x24x128xf32> to vector<1x8x8x128xf32>
    %185 = vector.extract_strided_slice %169 {offsets = [0, 2, 0], sizes = [1, 1, 128], strides = [1, 1, 1]} : vector<3x3x128xf32> to vector<1x1x128xf32>
    %186 = vector.shape_cast %185 : vector<1x1x128xf32> to vector<128xf32>
    %187 = vector.shape_cast %186 : vector<128xf32> to vector<1x1x1x128xf32>
    %188 = vector.broadcast %187 : vector<1x1x1x128xf32> to vector<1x8x8x128xf32>
    %189 = arith.mulf %184, %188 : vector<1x8x8x128xf32>
    %190 = arith.addf %183, %189 : vector<1x8x8x128xf32>
    %c0_107 = arith.constant 0 : index
    %c1_108 = arith.constant 1 : index
    %c0_109 = arith.constant 0 : index
    %c0_110 = arith.constant 0 : index
    %191 = vector.load %arg31[%c0_107, %c1_108, %c0_109, %c0_110] : memref<1x10x24x128xf32, #tpu.memory_space<vmem>>, vector<1x8x24x128xf32>
    %192 = vector.extract_strided_slice %191 {offsets = [0, 0, 7, 0], sizes = [1, 8, 8, 128], strides = [1, 1, 1, 1]} : vector<1x8x24x128xf32> to vector<1x8x8x128xf32>
    %193 = vector.extract_strided_slice %169 {offsets = [1, 0, 0], sizes = [1, 1, 128], strides = [1, 1, 1]} : vector<3x3x128xf32> to vector<1x1x128xf32>
    %194 = vector.shape_cast %193 : vector<1x1x128xf32> to vector<128xf32>
    %195 = vector.shape_cast %194 : vector<128xf32> to vector<1x1x1x128xf32>
    %196 = vector.broadcast %195 : vector<1x1x1x128xf32> to vector<1x8x8x128xf32>
    %197 = arith.mulf %192, %196 : vector<1x8x8x128xf32>
    %198 = arith.addf %190, %197 : vector<1x8x8x128xf32>
    %199 = vector.extract_strided_slice %191 {offsets = [0, 0, 8, 0], sizes = [1, 8, 8, 128], strides = [1, 1, 1, 1]} : vector<1x8x24x128xf32> to vector<1x8x8x128xf32>
    %200 = vector.extract_strided_slice %169 {offsets = [1, 1, 0], sizes = [1, 1, 128], strides = [1, 1, 1]} : vector<3x3x128xf32> to vector<1x1x128xf32>
    %201 = vector.shape_cast %200 : vector<1x1x128xf32> to vector<128xf32>
    %202 = vector.shape_cast %201 : vector<128xf32> to vector<1x1x1x128xf32>
    %203 = vector.broadcast %202 : vector<1x1x1x128xf32> to vector<1x8x8x128xf32>
    %204 = arith.mulf %199, %203 : vector<1x8x8x128xf32>
    %205 = arith.addf %198, %204 : vector<1x8x8x128xf32>
    %206 = vector.extract_strided_slice %191 {offsets = [0, 0, 9, 0], sizes = [1, 8, 8, 128], strides = [1, 1, 1, 1]} : vector<1x8x24x128xf32> to vector<1x8x8x128xf32>
    %207 = vector.extract_strided_slice %169 {offsets = [1, 2, 0], sizes = [1, 1, 128], strides = [1, 1, 1]} : vector<3x3x128xf32> to vector<1x1x128xf32>
    %208 = vector.shape_cast %207 : vector<1x1x128xf32> to vector<128xf32>
    %209 = vector.shape_cast %208 : vector<128xf32> to vector<1x1x1x128xf32>
    %210 = vector.broadcast %209 : vector<1x1x1x128xf32> to vector<1x8x8x128xf32>
    %211 = arith.mulf %206, %210 : vector<1x8x8x128xf32>
    %212 = arith.addf %205, %211 : vector<1x8x8x128xf32>
    %c0_111 = arith.constant 0 : index
    %c2_112 = arith.constant 2 : index
    %c0_113 = arith.constant 0 : index
    %c0_114 = arith.constant 0 : index
    %213 = vector.load %arg31[%c0_111, %c2_112, %c0_113, %c0_114] : memref<1x10x24x128xf32, #tpu.memory_space<vmem>>, vector<1x8x24x128xf32>
    %214 = vector.extract_strided_slice %213 {offsets = [0, 0, 7, 0], sizes = [1, 8, 8, 128], strides = [1, 1, 1, 1]} : vector<1x8x24x128xf32> to vector<1x8x8x128xf32>
    %215 = vector.extract_strided_slice %169 {offsets = [2, 0, 0], sizes = [1, 1, 128], strides = [1, 1, 1]} : vector<3x3x128xf32> to vector<1x1x128xf32>
    %216 = vector.shape_cast %215 : vector<1x1x128xf32> to vector<128xf32>
    %217 = vector.shape_cast %216 : vector<128xf32> to vector<1x1x1x128xf32>
    %218 = vector.broadcast %217 : vector<1x1x1x128xf32> to vector<1x8x8x128xf32>
    %219 = arith.mulf %214, %218 : vector<1x8x8x128xf32>
    %220 = arith.addf %212, %219 : vector<1x8x8x128xf32>
    %221 = vector.extract_strided_slice %213 {offsets = [0, 0, 8, 0], sizes = [1, 8, 8, 128], strides = [1, 1, 1, 1]} : vector<1x8x24x128xf32> to vector<1x8x8x128xf32>
    %222 = vector.extract_strided_slice %169 {offsets = [2, 1, 0], sizes = [1, 1, 128], strides = [1, 1, 1]} : vector<3x3x128xf32> to vector<1x1x128xf32>
    %223 = vector.shape_cast %222 : vector<1x1x128xf32> to vector<128xf32>
    %224 = vector.shape_cast %223 : vector<128xf32> to vector<1x1x1x128xf32>
    %225 = vector.broadcast %224 : vector<1x1x1x128xf32> to vector<1x8x8x128xf32>
    %226 = arith.mulf %221, %225 : vector<1x8x8x128xf32>
    %227 = arith.addf %220, %226 : vector<1x8x8x128xf32>
    %228 = vector.extract_strided_slice %213 {offsets = [0, 0, 9, 0], sizes = [1, 8, 8, 128], strides = [1, 1, 1, 1]} : vector<1x8x24x128xf32> to vector<1x8x8x128xf32>
    %229 = vector.extract_strided_slice %169 {offsets = [2, 2, 0], sizes = [1, 1, 128], strides = [1, 1, 1]} : vector<3x3x128xf32> to vector<1x1x128xf32>
    %230 = vector.shape_cast %229 : vector<1x1x128xf32> to vector<128xf32>
    %231 = vector.shape_cast %230 : vector<128xf32> to vector<1x1x1x128xf32>
    %232 = vector.broadcast %231 : vector<1x1x1x128xf32> to vector<1x8x8x128xf32>
    %233 = arith.mulf %228, %232 : vector<1x8x8x128xf32>
    %234 = arith.addf %227, %233 : vector<1x8x8x128xf32>
    %c0_115 = arith.constant 0 : index
    %c0_116 = arith.constant 0 : index
    %235 = vector.load %arg19[%c0_115, %c0_116] : memref<1x128xf32, #tpu.memory_space<vmem>>, vector<1x128xf32>
    %236 = vector.shape_cast %235 : vector<1x128xf32> to vector<1x1x1x128xf32>
    %237 = vector.broadcast %236 : vector<1x1x1x128xf32> to vector<1x8x8x128xf32>
    %238 = arith.mulf %234, %237 : vector<1x8x8x128xf32>
    %c0_117 = arith.constant 0 : index
    %c0_118 = arith.constant 0 : index
    %239 = vector.load %arg20[%c0_117, %c0_118] : memref<1x128xf32, #tpu.memory_space<vmem>>, vector<1x128xf32>
    %240 = vector.shape_cast %239 : vector<1x128xf32> to vector<1x1x1x128xf32>
    %241 = vector.broadcast %240 : vector<1x1x1x128xf32> to vector<1x8x8x128xf32>
    %242 = arith.addf %238, %241 : vector<1x8x8x128xf32>
    %243 = arith.negf %242 : vector<1x8x8x128xf32>
    %244 = math.exp %243 : vector<1x8x8x128xf32>
    %cst_119 = arith.constant 1.000000e+00 : f32
    %245 = vector.broadcast %cst_119 : f32 to vector<1x8x8x128xf32>
    %246 = arith.addf %245, %244 : vector<1x8x8x128xf32>
    %247 = arith.divf %245, %246 : vector<1x8x8x128xf32>
    %248 = arith.mulf %242, %247 : vector<1x8x8x128xf32>
    %249 = vector.shape_cast %248 : vector<1x8x8x128xf32> to vector<64x128xf32>
    %cst_120 = arith.constant dense<0.000000e+00> : vector<128xf32>
    %250 = vector.multi_reduction <add>, %249, %cst_120 [0] : vector<64x128xf32> to vector<128xf32>
    %251 = vector.shape_cast %250 : vector<128xf32> to vector<1x128xf32>
    %cst_121 = arith.constant 1.562500e-02 : f32
    %252 = vector.broadcast %cst_121 : f32 to vector<1x128xf32>
    %253 = arith.mulf %251, %252 : vector<1x128xf32>
    %c0_122 = arith.constant 0 : index
    %c0_123 = arith.constant 0 : index
    %254 = vector.load %arg21[%c0_122, %c0_123] : memref<128x128xf32, #tpu.memory_space<vmem>>, vector<128x128xf32>
    %cst_124 = arith.constant dense<0.000000e+00> : vector<1x128xf32>
    %255 = tpu.matmul %253, %254, %cst_124 {dimension_numbers = #tpu.dot_dimension_numbers<[1], [0], [0], [1], [0, 0, 1, 1], [], []>} : vector<1x128xf32>, vector<128x128xf32>, vector<1x128xf32> -> vector<1x128xf32>
    %c0_125 = arith.constant 0 : index
    %c0_126 = arith.constant 0 : index
    %256 = vector.load %arg22[%c0_125, %c0_126] : memref<1x128xf32, #tpu.memory_space<vmem>>, vector<1x128xf32>
    %257 = arith.addf %255, %256 : vector<1x128xf32>
    %258 = arith.negf %257 : vector<1x128xf32>
    %259 = math.exp %258 : vector<1x128xf32>
    %cst_127 = arith.constant 1.000000e+00 : f32
    %260 = vector.broadcast %cst_127 : f32 to vector<1x128xf32>
    %261 = arith.addf %260, %259 : vector<1x128xf32>
    %262 = arith.divf %260, %261 : vector<1x128xf32>
    %263 = arith.mulf %257, %262 : vector<1x128xf32>
    %c0_128 = arith.constant 0 : index
    %c0_129 = arith.constant 0 : index
    %264 = vector.load %arg23[%c0_128, %c0_129] : memref<128x128xf32, #tpu.memory_space<vmem>>, vector<128x128xf32>
    %cst_130 = arith.constant dense<0.000000e+00> : vector<1x128xf32>
    %265 = tpu.matmul %263, %264, %cst_130 {dimension_numbers = #tpu.dot_dimension_numbers<[1], [0], [0], [1], [0, 0, 1, 1], [], []>} : vector<1x128xf32>, vector<128x128xf32>, vector<1x128xf32> -> vector<1x128xf32>
    %c0_131 = arith.constant 0 : index
    %c0_132 = arith.constant 0 : index
    %266 = vector.load %arg24[%c0_131, %c0_132] : memref<1x128xf32, #tpu.memory_space<vmem>>, vector<1x128xf32>
    %267 = arith.addf %265, %266 : vector<1x128xf32>
    %268 = arith.negf %267 : vector<1x128xf32>
    %269 = math.exp %268 : vector<1x128xf32>
    %cst_133 = arith.constant 1.000000e+00 : f32
    %270 = vector.broadcast %cst_133 : f32 to vector<1x128xf32>
    %271 = arith.addf %270, %269 : vector<1x128xf32>
    %272 = arith.divf %270, %271 : vector<1x128xf32>
    %273 = vector.shape_cast %272 : vector<1x128xf32> to vector<1x1x1x128xf32>
    %274 = vector.broadcast %273 : vector<1x1x1x128xf32> to vector<1x8x8x128xf32>
    %275 = arith.mulf %248, %274 : vector<1x8x8x128xf32>
    %276 = vector.shape_cast %275 : vector<1x8x8x128xf32> to vector<64x128xf32>
    %277 = arith.truncf %276 : vector<64x128xf32> to vector<64x128xbf16>
    %c0_134 = arith.constant 0 : index
    %c0_135 = arith.constant 0 : index
    %278 = vector.load %arg25[%c0_134, %c0_135] : memref<128x128xbf16, #tpu.memory_space<vmem>>, vector<128x128xbf16>
    %cst_136 = arith.constant dense<0.000000e+00> : vector<64x128xf32>
    %279 = tpu.matmul %277, %278, %cst_136 {dimension_numbers = #tpu.dot_dimension_numbers<[1], [0], [0], [1], [0, 0, 1, 1], [], []>} : vector<64x128xbf16>, vector<128x128xbf16>, vector<64x128xf32> -> vector<64x128xf32>
    %c0_137 = arith.constant 0 : index
    %c0_138 = arith.constant 0 : index
    %280 = vector.load %arg26[%c0_137, %c0_138] : memref<1x128xf32, #tpu.memory_space<vmem>>, vector<1x128xf32>
    %281 = vector.broadcast %280 : vector<1x128xf32> to vector<64x128xf32>
    %282 = arith.mulf %279, %281 : vector<64x128xf32>
    %c0_139 = arith.constant 0 : index
    %c0_140 = arith.constant 0 : index
    %283 = vector.load %arg27[%c0_139, %c0_140] : memref<1x128xf32, #tpu.memory_space<vmem>>, vector<1x128xf32>
    %284 = vector.broadcast %283 : vector<1x128xf32> to vector<64x128xf32>
    %285 = arith.addf %282, %284 : vector<64x128xf32>
    %286 = vector.shape_cast %285 : vector<64x128xf32> to vector<1x8x8x128xf32>
    %287 = arith.addf %286, %142 : vector<1x8x8x128xf32>
    %288 = vector.extract_strided_slice %287 {offsets = [0, 0, 0, 0], sizes = [1, 8, 8, 8], strides = [1, 1, 1, 1]} : vector<1x8x8x128xf32> to vector<1x8x8x8xf32>
    %c0_141 = arith.constant 0 : index
    %c0_142 = arith.constant 0 : index
    %c0_143 = arith.constant 0 : index
    %c0_144 = arith.constant 0 : index
    %289 = vector.load %arg28[%c0_141, %c0_142, %c0_143, %c0_144] : memref<1x8x8x8xf32, #tpu.memory_space<vmem>>, vector<1x8x8x8xf32>
    tpu.vector_store %arg28[%c0_141, %c0_142, %c0_143, %c0_144], %288 {strides = array<i32>} : memref<1x8x8x8xf32, #tpu.memory_space<vmem>>, vector<1x8x8x8xf32>,
    return
  }
  func.func @transform_0(%arg0: i32) -> (i32, i32, i32, i32) {
    %c0_i32 = arith.constant 0 : i32
    %c0_i32_0 = arith.constant 0 : i32
    %c0_i32_1 = arith.constant 0 : i32
    %c0_i32_2 = arith.constant 0 : i32
    return %arg0, %c0_i32, %c0_i32_0, %c0_i32_1 : i32, i32, i32, i32
  }
  func.func @transform_1(%arg0: i32) -> (i32, i32) {
    %c0_i32 = arith.constant 0 : i32
    %c0_i32_0 = arith.constant 0 : i32
    %c0_i32_1 = arith.constant 0 : i32
    return %c0_i32, %c0_i32_0 : i32, i32
  }
  func.func @transform_2(%arg0: i32) -> (i32, i32) {
    %c0_i32 = arith.constant 0 : i32
    %c0_i32_0 = arith.constant 0 : i32
    %c0_i32_1 = arith.constant 0 : i32
    return %c0_i32, %c0_i32_0 : i32, i32
  }
  func.func @transform_3(%arg0: i32) -> (i32, i32) {
    %c0_i32 = arith.constant 0 : i32
    %c0_i32_0 = arith.constant 0 : i32
    %c0_i32_1 = arith.constant 0 : i32
    return %c0_i32, %c0_i32_0 : i32, i32
  }
  func.func @transform_4(%arg0: i32) -> (i32, i32, i32) {
    %c0_i32 = arith.constant 0 : i32
    %c0_i32_0 = arith.constant 0 : i32
    %c0_i32_1 = arith.constant 0 : i32
    %c0_i32_2 = arith.constant 0 : i32
    return %c0_i32, %c0_i32_0, %c0_i32_1 : i32, i32, i32
  }
  func.func @transform_5(%arg0: i32) -> (i32, i32) {
    %c0_i32 = arith.constant 0 : i32
    %c0_i32_0 = arith.constant 0 : i32
    %c0_i32_1 = arith.constant 0 : i32
    return %c0_i32, %c0_i32_0 : i32, i32
  }
  func.func @transform_6(%arg0: i32) -> (i32, i32) {
    %c0_i32 = arith.constant 0 : i32
    %c0_i32_0 = arith.constant 0 : i32
    %c0_i32_1 = arith.constant 0 : i32
    return %c0_i32, %c0_i32_0 : i32, i32
  }
  func.func @transform_7(%arg0: i32) -> (i32, i32) {
    %c0_i32 = arith.constant 0 : i32
    %c0_i32_0 = arith.constant 0 : i32
    %c0_i32_1 = arith.constant 0 : i32
    return %c0_i32, %c0_i32_0 : i32, i32
  }
  func.func @transform_8(%arg0: i32) -> (i32, i32) {
    %c0_i32 = arith.constant 0 : i32
    %c0_i32_0 = arith.constant 0 : i32
    %c0_i32_1 = arith.constant 0 : i32
    return %c0_i32, %c0_i32_0 : i32, i32
  }
  func.func @transform_9(%arg0: i32) -> (i32, i32) {
    %c0_i32 = arith.constant 0 : i32
    %c0_i32_0 = arith.constant 0 : i32
    %c0_i32_1 = arith.constant 0 : i32
    return %c0_i32, %c0_i32_0 : i32, i32
  }
  func.func @transform_10(%arg0: i32) -> (i32, i32) {
    %c0_i32 = arith.constant 0 : i32
    %c0_i32_0 = arith.constant 0 : i32
    %c0_i32_1 = arith.constant 0 : i32
    return %c0_i32, %c0_i32_0 : i32, i32
  }
  func.func @transform_11(%arg0: i32) -> (i32, i32) {
    %c0_i32 = arith.constant 0 : i32
    %c0_i32_0 = arith.constant 0 : i32
    %c0_i32_1 = arith.constant 0 : i32
    return %c0_i32, %c0_i32_0 : i32, i32
  }
  func.func @transform_12(%arg0: i32) -> (i32, i32) {
    %c0_i32 = arith.constant 0 : i32
    %c0_i32_0 = arith.constant 0 : i32
    %c0_i32_1 = arith.constant 0 : i32
    return %c0_i32, %c0_i32_0 : i32, i32
  }
  func.func @transform_13(%arg0: i32) -> (i32, i32) {
    %c0_i32 = arith.constant 0 : i32
    %c0_i32_0 = arith.constant 0 : i32
    %c0_i32_1 = arith.constant 0 : i32
    return %c0_i32, %c0_i32_0 : i32, i32
  }
  func.func @transform_14(%arg0: i32) -> (i32, i32) {
    %c0_i32 = arith.constant 0 : i32
    %c0_i32_0 = arith.constant 0 : i32
    %c0_i32_1 = arith.constant 0 : i32
    return %c0_i32, %c0_i32_0 : i32, i32
  }
  func.func @transform_15(%arg0: i32) -> (i32, i32) {
    %c0_i32 = arith.constant 0 : i32
    %c0_i32_0 = arith.constant 0 : i32
    %c0_i32_1 = arith.constant 0 : i32
    return %c0_i32, %c0_i32_0 : i32, i32
  }
  func.func @transform_16(%arg0: i32) -> (i32, i32) {
    %c0_i32 = arith.constant 0 : i32
    %c0_i32_0 = arith.constant 0 : i32
    %c0_i32_1 = arith.constant 0 : i32
    return %c0_i32, %c0_i32_0 : i32, i32
  }
  func.func @transform_17(%arg0: i32) -> (i32, i32, i32) {
    %c0_i32 = arith.constant 0 : i32
    %c0_i32_0 = arith.constant 0 : i32
    %c0_i32_1 = arith.constant 0 : i32
    %c0_i32_2 = arith.constant 0 : i32
    return %c0_i32, %c0_i32_0, %c0_i32_1 : i32, i32, i32
  }
  func.func @transform_18(%arg0: i32) -> (i32, i32) {
    %c0_i32 = arith.constant 0 : i32
    %c0_i32_0 = arith.constant 0 : i32
    %c0_i32_1 = arith.constant 0 : i32
    return %c0_i32, %c0_i32_0 : i32, i32
  }
  func.func @transform_19(%arg0: i32) -> (i32, i32) {
    %c0_i32 = arith.constant 0 : i32
    %c0_i32_0 = arith.constant 0 : i32
    %c0_i32_1 = arith.constant 0 : i32
    return %c0_i32, %c0_i32_0 : i32, i32
  }
  func.func @transform_20(%arg0: i32) -> (i32, i32) {
    %c0_i32 = arith.constant 0 : i32
    %c0_i32_0 = arith.constant 0 : i32
    %c0_i32_1 = arith.constant 0 : i32
    return %c0_i32, %c0_i32_0 : i32, i32
  }
  func.func @transform_21(%arg0: i32) -> (i32, i32) {
    %c0_i32 = arith.constant 0 : i32
    %c0_i32_0 = arith.constant 0 : i32
    %c0_i32_1 = arith.constant 0 : i32
    return %c0_i32, %c0_i32_0 : i32, i32
  }
  func.func @transform_22(%arg0: i32) -> (i32, i32) {
    %c0_i32 = arith.constant 0 : i32
    %c0_i32_0 = arith.constant 0 : i32
    %c0_i32_1 = arith.constant 0 : i32
    return %c0_i32, %c0_i32_0 : i32, i32
  }
  func.func @transform_23(%arg0: i32) -> (i32, i32) {
    %c0_i32 = arith.constant 0 : i32
    %c0_i32_0 = arith.constant 0 : i32
    %c0_i32_1 = arith.constant 0 : i32
    return %c0_i32, %c0_i32_0 : i32, i32
  }
  func.func @transform_24(%arg0: i32) -> (i32, i32) {
    %c0_i32 = arith.constant 0 : i32
    %c0_i32_0 = arith.constant 0 : i32
    %c0_i32_1 = arith.constant 0 : i32
    return %c0_i32, %c0_i32_0 : i32, i32
  }
  func.func @transform_25(%arg0: i32) -> (i32, i32) {
    %c0_i32 = arith.constant 0 : i32
    %c0_i32_0 = arith.constant 0 : i32
    %c0_i32_1 = arith.constant 0 : i32
    return %c0_i32, %c0_i32_0 : i32, i32
  }
  func.func @transform_26(%arg0: i32) -> (i32, i32) {
    %c0_i32 = arith.constant 0 : i32
    %c0_i32_0 = arith.constant 0 : i32
    %c0_i32_1 = arith.constant 0 : i32
    return %c0_i32, %c0_i32_0 : i32, i32
  }
  func.func @transform_27(%arg0: i32) -> (i32, i32, i32, i32) {
    %c0_i32 = arith.constant 0 : i32
    %c0_i32_0 = arith.constant 0 : i32
    %c0_i32_1 = arith.constant 0 : i32
    %c0_i32_2 = arith.constant 0 : i32
    return %arg0, %c0_i32, %c0_i32_0, %c0_i32_1 : i32, i32, i32, i32
  }
}

</mosaic_0001>

<bundles_post_ra>
// kernel: tpu_custom_call.1
= control target key start
LH: loop header
LB: loop body
LE: loop exit
PB: predicated region body
PF: predicated region fallthrough
CT: control target
= control target key end

     0   :  { %s9840_s0 = inlined_call_operand.vmem [shape: f32[2,16,16,4], index: 0, kind: input, shape index: {}]   ;;  %s9841_s1 = inlined_call_operand.hbm [shape: bf16[4,128], index: 1, kind: input, shape index: {}]   ;;  %s9842_s2 = inlined_call_operand.hbm [shape: f32[1,128], index: 2, kind: input, shape index: {}]   ;;  %s9843_s3 = inlined_call_operand.hbm [shape: f32[1,128], index: 3, kind: input, shape index: {}]   ;;  %s9844_s4 = inlined_call_operand.hbm [shape: f32[3,3,128], index: 4, kind: input, shape index: {}]   ;;  %s9845_s5 = inlined_call_operand.hbm [shape: f32[1,128], index: 5, kind: input, shape index: {}]   ;;  %s9846_s6 = inlined_call_operand.hbm [shape: f32[1,128], index: 6, kind: input, shape index: {}]   ;;  %s9847_s7 = inlined_call_operand.vmem [shape: f32[128,128], index: 7, kind: input, shape index: {}]   ;;  %s9848_s8 = inlined_call_operand.vmem [shape: f32[1,128], index: 8, kind: input, shape index: {}]   ;;  %s9849_s9 = inlined_call_operand.vmem [shape: f32[128,128], index: 9, kind: input, shape index: {}]   ;;  %s9850_s10 = inlined_call_operand.hbm [shape: f32[1,128], index: 10, kind: input, shape index: {}]   ;;  %s9851_s11 = inlined_call_operand.vmem [shape: bf16[128,128], index: 11, kind: input, shape index: {}]   ;;  %s9852_s12 = inlined_call_operand.hbm [shape: f32[1,128], index: 12, kind: input, shape index: {}]   ;;  %s9853_s13 = inlined_call_operand.hbm [shape: f32[1,128], index: 13, kind: input, shape index: {}]   ;;  %s9854_s14 = inlined_call_operand.vmem [shape: bf16[128,128], index: 14, kind: input, shape index: {}]   ;;  %s9855_s15 = inlined_call_operand.hbm [shape: f32[1,128], index: 15, kind: input, shape index: {}]   ;;  %s9856_s16 = inlined_call_operand.hbm [shape: f32[1,128], index: 16, kind: input, shape index: {}]   ;;  %s9857_s17 = inlined_call_operand.vmem [shape: f32[3,3,128], index: 17, kind: input, shape index: {}]   ;;  %s9858_s18 = inlined_call_operand.hbm [shape: f32[1,128], index: 18, kind: input, shape index: {}]   ;;  %s9859_s19 = inlined_call_operand.hbm [shape: f32[1,128], index: 19, kind: input, shape index: {}]   ;;  %s9860_s20 = inlined_call_operand.vmem [shape: f32[128,128], index: 20, kind: input, shape index: {}]   ;;  %s9861_s21 = inlined_call_operand.vmem [shape: f32[1,128], index: 21, kind: input, shape index: {}]   ;;  %s9862_s22 = inlined_call_operand.vmem [shape: f32[128,128], index: 22, kind: input, shape index: {}]   ;;  %s9863_s23 = inlined_call_operand.vmem [shape: f32[1,128], index: 23, kind: input, shape index: {}]   ;;  %s9864_s24 = inlined_call_operand.hbm [shape: bf16[128,128], index: 24, kind: input, shape index: {}]   ;;  %s9865_s25 = inlined_call_operand.vmem [shape: f32[1,128], index: 25, kind: input, shape index: {}]   ;;  %s9866_s26 = inlined_call_operand.vmem [shape: f32[1,128], index: 26, kind: input, shape index: {}]   ;;  %s9867_s27 = inlined_call_operand.hbm [shape: f32[2,8,8,8], index: 27, kind: output, shape index: {}]  }
   0x1   :  { %9900 = sst [smem:[#allocation62_spill]] %s9840_s0 }
   0x2   :  { %9901 = sst [smem:[#allocation63_spill]] %s9841_s1 }
   0x3   :  { %9902 = sst [smem:[#allocation64_spill]] %s9842_s2 }
   0x4   :  { %9903 = sst [smem:[#allocation65_spill]] %s9843_s3 }
   0x5   :  { %9904 = sst [smem:[#allocation66_spill]] %s9844_s4 }
   0x6   :  { %9905 = sst [smem:[#allocation67_spill]] %s9845_s5 }
   0x7   :  { %9906 = sst [smem:[#allocation68_spill]] %s9846_s6 }
   0x8   :  { %9907 = sst [smem:[#allocation69_spill]] %s9847_s7 }
   0x9   :  { %9908 = sst [smem:[#allocation70_spill]] %s9848_s8 }
   0xa   :  { %9909 = sst [smem:[#allocation71_spill]] %s9849_s9 }
   0xb   :  { %9910 = sst [smem:[#allocation72_spill]] %s9850_s10 }
   0xc   :  { %9911 = sst [smem:[#allocation73_spill]] %s9851_s11 }
   0xd   :  { %9912 = sst [smem:[#allocation74_spill]] %s9863_s23 }
   0xe   :  { %9913 = sst [smem:[#allocation75_spill]] %s9865_s25 }
   0xf   :  { %9914 = sst [smem:[#allocation76_spill]] %s9866_s26 }
  0x10   :  { %9915 = sst [smem:[#allocation77_spill]] %s9867_s27 }
  0x11   :  { %32 = vsyncpa [#allocation6], 0 }
  0x12   :  { %33 = vsyncpa [#allocation9], 0 }
  0x13   :  { %34 = vsyncpa [#allocation12], 0 }
  0x14   :  { %35 = vsyncpa [#allocation15], 0 }
  0x15   :  { %36 = vsyncpa [#allocation18], 0 }
  0x16   :  { %37 = vsyncpa [#allocation21], 0 }
  0x17   :  { %38 = vsyncpa [#allocation24], 0 }
  0x18   :  { %39 = vsyncpa [#allocation27], 0 }
  0x19   :  { %40 = vsyncpa [#allocation7], 0 }
  0x1a   :  { %42 = vsyncpa [#allocation7 + $0x1], 0  ;;  %s6480_s7 = smov 0   ;;  %s6482_s4 = smov 0  }
  0x1b   :  { %s6484_s8 = smov 0   ;;  %s6486_s30 = smov 0  }
  0x1c LB: > { %9916 = sst [smem:[#allocation38_spill]] %s6308_s7  ;;  %s6501_s9 = sadd.s32 4294967295, %s6320_s30   ;;  %s6320_s30 = sphi %s6486_s30, %s10172_s30   ;;  %s6316_s8 = sphi %s6484_s8, %s10175_s8   ;;  %s6312_s4 = sphi %s6482_s4, %s10174_s4   ;;  %s6308_s7 = sphi %s6480_s7, %s10173_s7  }
  0x1d   : > { %9917 = sst [smem:[#allocation39_spill]] %s6312_s4  ;;  %s5089_s5 = sadd.s32 4294967294, %s6320_s30  }
  0x1e   : > { %9918 = sst [smem:[#allocation40_spill]] %s6316_s8  ;;  %s6505_s28 = sadd.s32 1, %s6320_s30  }
  0x1f   : > { %9919 = sst [smem:[#allocation41_spill]] %s6320_s30  ;;  %s627_s0 = sadd.s32 1, %s6316_s8 }
  0x20   : > { %9920 = sst [smem:[#allocation42_spill]] %s6505_s28  ;;  %s624_s10 = ssub.s32 %s6320_s30, %s6505_s28 }
  0x21   : > { %p637_p0 = scmp.ne.s32.totalorder %s6316_s8, %s6312_s4  ;;  %p625_p1 = scmp.eq.s32.totalorder %s624_s10, 0 }
  0x22   : > { %p638_p2 = scmp.eq.s32.totalorder %s6501_s9, 1  ;;  %p643_p3 = scmp.ne.s32.totalorder %s6312_s4, %s6308_s7 }
  0x23   : > { %p644_p4 = scmp.eq.s32.totalorder %s5089_s5, 1  ;;  %p5090_p7 = scmp.ge.s32.totalorder %s6320_s30, 1 }
  0x24   : > { %s6516_s29 = scalar_select %p625_p1, %s6316_s8, %s627_s0  }
  0x25   : > { %p6518_p5 = por %p638_p2, %p637_p0  ;;  %p6522_p6 = por %p644_p4, %p643_p3 }
  0x26   : > { %9921 = sst [smem:[#allocation43_spill]] %s6516_s29  ;;  %p651_p8 = scmp.lt.s32.totalorder %s6320_s30, 3 }
  0x27   : > { %s9922_s1 = scalar_select %p6518_p5, 1, 0 }
  0x28   : > { %s9924_s6 = scalar_select %p6522_p6, 1, 0 }
  0x29   : > { %9923 = sst [smem:[#allocation44_spill]] %s9922_s1  ;;  %p5441_p9 = scmp.eq.s32.totalorder %s6501_s9, 0 }
  0x2a   : > { %9925 = sst [smem:[#allocation45_spill]] %s9924_s6  ;;  %p6529_p10 = pnand %p5090_p7, %p651_p8 }
  0x2b   : > { %s9927_s5 = sld [smem:[#allocation64_spill]]  ;;  %s6322_s10 = smov [#allocation8]  }
  0x2c   : > { %p5394_p11 = pneg %p6529_p10  ;;  %s677_s29 = sshll.u32 %s6322_s10, 4  ;;  %s678_s29 = int_to_ptr.vmem [resolvable:$true] %s677_s29 }
  0x2d   : > { %s9928_s6 = sld [smem:[#allocation66_spill]]  ;;  %s6323_s2 = smov [#allocation11]  }
  0x2e   : > { %p6543_p12 = pnand %p5441_p9, %p5394_p11  ;;  %s700_s3 = sshll.u32 %s6323_s2, 4  ;;  %s701_s3 = int_to_ptr.vmem [resolvable:$true] %s700_s3 }
  0x2f   : > { %s6325_s10 = smov 4   ;;  %s6326_s27 = smov [#allocation14]  }
  0x30   : > { %s727_s26 = sshll.u32 %s6326_s27, 4  ;;  %s6327_s25 = smov [#allocation17]   ;;  %s728_s26 = int_to_ptr.vmem [resolvable:$true] %s727_s26 }
  0x31   : > { %s675_s0 = sshll.u32 %s9927_s5, 4  ;;  %s9882_s5 = smov 64   ;;  %s676_s0 = int_to_ptr.hbm [resolvable:$true] %s675_s0 }
  0x32   : > { %5400 = dma.hbm_to_vmem [thread:$0]  (!%p6543_p12), %s676_s0, 16, %s678_s29, [#allocation9]  }
  0x33   : > { %s698_s7 = sshll.u32 %s9928_s6, 4  ;;  %s9930_s6 = sld [smem:[#allocation68_spill]]  ;;  %s699_s7 = int_to_ptr.hbm [resolvable:$true] %s698_s7 }
  0x34   : > { %5406 = dma.hbm_to_vmem [thread:$0]  (!%p6543_p12), %s699_s7, 192, %s701_s3, [#allocation12], %s9882_s5, %s9882_s5, %s6325_s10  }
  0x35   : > { %s761_s0 = sshll.u32 %s9852_s12, 4  ;;  %s763_s4 = sshll.u32 %s6327_s25, 4  ;;  %s762_s0 = int_to_ptr.hbm [resolvable:$true] %s761_s0  ;;  %s764_s4 = int_to_ptr.vmem [resolvable:$true] %s763_s4 }
  0x36   : > { %s788_s3 = sshll.u32 %s9855_s15, 4  ;;  %s815_s28 = sshll.u32 %s9858_s18, 4  ;;  %s789_s3 = int_to_ptr.hbm [resolvable:$true] %s788_s3  ;;  %s816_s28 = int_to_ptr.hbm [resolvable:$true] %s815_s28 }
  0x37   : > { %5418 = dma.hbm_to_vmem [thread:$0]  (!%p6543_p12), %s762_s0, 16, %s764_s4, [#allocation18]  }
  0x38   : > { %s6329_s25 = smov [#allocation23]   ;;  %s9931_s29 = sld [smem:[#allocation63_spill]] }
  0x39   : > { %s725_s1 = sshll.u32 %s9930_s6, 4  ;;  %s6328_s6 = smov [#allocation20]   ;;  %s726_s1 = int_to_ptr.hbm [resolvable:$true] %s725_s1 }
  0x3a   : > { %5412 = dma.hbm_to_vmem [thread:$0]  (!%p6543_p12), %s726_s1, 16, %s728_s26, [#allocation15]  }
  0x3b   : > { %s790_s2 = sshll.u32 %s6328_s6, 4  ;;  %s817_s26 = sshll.u32 %s6329_s25, 4  ;;  %s791_s2 = int_to_ptr.vmem [resolvable:$true] %s790_s2  ;;  %s818_s26 = int_to_ptr.vmem [resolvable:$true] %s817_s26 }
  0x3c   : > { %5424 = dma.hbm_to_vmem [thread:$0]  (!%p6543_p12), %s789_s3, 16, %s791_s2, [#allocation21]  }
  0x3d   : > { %5430 = dma.hbm_to_vmem [thread:$0]  (!%p6543_p12), %s816_s28, 16, %s818_s26, [#allocation24]  }
  0x3e   : > { %s663_s7 = sshll.u32 %s9931_s29, 4  ;;  %s9932_s27 = sld [smem:[#allocation65_spill]]  ;;  %s664_s7 = int_to_ptr.hbm [resolvable:$true] %s663_s7 }
  0x3f   : > { %s6330_s6 = smov [#allocation5]   ;;  %s6331_s3 = smov [#allocation10]  }
  0x40   : > { %s665_s5 = sshll.u32 %s6330_s6, 4  ;;  %s689_s2 = sshll.u32 %s6331_s3, 4  ;;  %s666_s5 = int_to_ptr.vmem [resolvable:$true] %s665_s5  ;;  %s690_s2 = int_to_ptr.vmem [resolvable:$true] %s689_s2 }
  0x41   : > { %5397 = dma.hbm_to_vmem [thread:$0]  (!%p6543_p12), %s664_s7, 32, %s666_s5, [#allocation6]  }
  0x42   : > { %s9933_s1 = sld [smem:[#allocation67_spill]]  ;;  %s6333_s5 = smov [#allocation16]  }
  0x43   : > { %s9934_s4 = sld [smem:[#allocation72_spill]]  ;;  %s748_s7 = sshll.u32 %s6333_s5, 4  ;;  %s749_s7 = int_to_ptr.vmem [resolvable:$true] %s748_s7 }
  0x44   : > { %s687_s8 = sshll.u32 %s9932_s27, 4  ;;  %s6332_s27 = smov [#allocation13]   ;;  %s688_s8 = int_to_ptr.hbm [resolvable:$true] %s687_s8 }
  0x45   : > { %5403 = dma.hbm_to_vmem [thread:$0]  (!%p6543_p12), %s688_s8, 16, %s690_s2, [#allocation9]  }
  0x46   : > { %s715_s6 = sshll.u32 %s6332_s27, 4  ;;  %s773_s23 = sshll.u32 %s9853_s13, 4  ;;  %s716_s6 = int_to_ptr.vmem [resolvable:$true] %s715_s6  ;;  %s774_s23 = int_to_ptr.hbm [resolvable:$true] %s773_s23 }
  0x47   : > { %s6334_s28 = smov [#allocation19]   ;;  %s827_s5 = sshll.u32 %s9859_s19, 4  ;;  %s828_s5 = int_to_ptr.hbm [resolvable:$true] %s827_s5 }
  0x48   : > { %s713_s29 = sshll.u32 %s9933_s1, 4  ;;  %s800_s1 = sshll.u32 %s9856_s16, 4  ;;  %s714_s29 = int_to_ptr.hbm [resolvable:$true] %s713_s29  ;;  %s801_s1 = int_to_ptr.hbm [resolvable:$true] %s800_s1 }
  0x49   : > { %s746_s0 = sshll.u32 %s9934_s4, 4  ;;  %s775_s26 = sshll.u32 %s6334_s28, 4  ;;  %s747_s0 = int_to_ptr.hbm [resolvable:$true] %s746_s0  ;;  %s776_s26 = int_to_ptr.vmem [resolvable:$true] %s775_s26 }
  0x4a   : > { %5409 = dma.hbm_to_vmem [thread:$0]  (!%p6543_p12), %s714_s29, 16, %s716_s6, [#allocation12]  }
  0x4b   : > { %5415 = dma.hbm_to_vmem [thread:$0]  (!%p6543_p12), %s747_s0, 16, %s749_s7, [#allocation15]  }
  0x4c   : > { %5421 = dma.hbm_to_vmem [thread:$0]  (!%p6543_p12), %s774_s23, 16, %s776_s26, [#allocation18]  }
  0x4d   : > { %s6335_s29 = smov [#allocation22]   ;;  %s850_s3 = sshll.u32 %s9864_s24, 4  ;;  %s851_s3 = int_to_ptr.hbm [resolvable:$true] %s850_s3 }
  0x4e   : > { %s802_s4 = sshll.u32 %s6335_s29, 4  ;;  %s6336_s25 = smov [#allocation25]   ;;  %s803_s4 = int_to_ptr.vmem [resolvable:$true] %s802_s4 }
  0x4f   : > { %5427 = dma.hbm_to_vmem [thread:$0]  (!%p6543_p12), %s801_s1, 16, %s803_s4, [#allocation21]  }
  0x50   : > { %s829_s8 = sshll.u32 %s6336_s25, 4  ;;  %s6337_s23 = smov [#allocation26]   ;;  %s830_s8 = int_to_ptr.vmem [resolvable:$true] %s829_s8 }
  0x51   : > { %5433 = dma.hbm_to_vmem [thread:$0]  (!%p6543_p12), %s828_s5, 16, %s830_s8, [#allocation24]  }
  0x52   : > { %s852_s2 = sshll.u32 %s6337_s23, 4  ;;  %s9935_s28 = smov 64   ;;  %s853_s2 = int_to_ptr.vmem [resolvable:$true] %s852_s2 }
  0x53   : > { %5436 = dma.hbm_to_vmem [thread:$0]  (!%p6543_p12), %s851_s3, 1024, %s853_s2, [#allocation27], %s9935_s28, %s9935_s28, %s6325_s10  }
  0x54   : > { %882 = sbr.rel (%p6529_p10) target bundleno = 1960 (0x7a8), region = 128 }
  0x59   : > { %6271 = dma.done.wait (%p5441_p9), [#allocation6], 32  }
  0x5a   : > { %6273 = vsyncadd (%p5441_p9), [#allocation6], 4294967264 }
  0x5b   : > { %6275 = dma.done.wait (%p5441_p9), [#allocation9], 32  }
  0x5c   : > { %6277 = vsyncadd (%p5441_p9), [#allocation9], 4294967264 }
  0x5d   : > { %6279 = dma.done.wait (%p5441_p9), [#allocation12], 208  }
  0x5e   : > { %6281 = vsyncadd (%p5441_p9), [#allocation12], 4294967088 }
  0x5f   : > { %6283 = dma.done.wait (%p5441_p9), [#allocation15], 32  }
  0x60   : > { %6285 = vsyncadd (%p5441_p9), [#allocation15], 4294967264 }
  0x61   : > { %6287 = dma.done.wait (%p5441_p9), [#allocation18], 32  }
  0x62   : > { %6289 = vsyncadd (%p5441_p9), [#allocation18], 4294967264 }
  0x63   : > { %6291 = dma.done.wait (%p5441_p9), [#allocation21], 32  }
  0x64   : > { %6293 = vsyncadd (%p5441_p9), [#allocation21], 4294967264 }
  0x65   : > { %6295 = dma.done.wait (%p5441_p9), [#allocation24], 32  }
  0x66   : > { %6297 = vsyncadd (%p5441_p9), [#allocation24], 4294967264 }
  0x67   : > { %6299 = dma.done.wait (%p5441_p9), [#allocation27], 1024  }
  0x68   : > { %6301 = vsyncadd (%p5441_p9), [#allocation27], 4294966272  ;;  %p1020_p13 = scmp.lt.s32.totalorder %s6501_s9, 1  ;;  %vm1124_vm0 = vcmask 1041408   ;;  %s9936_s26 = sld [smem:[#allocation62_spill]]  ;;  %vm1075_vm1 = vcmask 31744  }
  0x69   : > { %v1074_v0 = vld [vmem:[#allocation5] sm:$0x3]  ;;  %v6702_v46 = vld [vmem:[#allocation8] ss:$0 sm:$0xff]  ;;  %v6704_v47 = vld [vmem:[#allocation10] ss:$0 sm:$0xff] }
  0x6a   : > { %s1021_s30 = scalar_select %p1020_p13, %s6501_s9, 1  ;;  %v1126_v3 = vsel %vm1124_vm0, %v1074_v0, 0 }
  0x6b   : > { %1135 = vmatpush.bf16.msra.mxu0 %v1126_v3  ;;  %5335 = vmatpush.bf16.msra.mxu2 %v1126_v3  ;;  %s10013_s6 = sld [smem:[#allocation69_spill]] }
  0x6c   : > { %s5309_s11 = sshll.u32 %s1021_s30, 8  ;;  %s10032_s4 = sld [smem:[#allocation71_spill]] }
  0x6d   : > { %s10042_s23 = sld [smem:[#allocation70_spill]] }
  0x6e   : > { %s6656_s29 = scalar_lea.vmem %s9936_s26, %s5309_s11  ;;  %s10043_s3 = sld [smem:[#allocation73_spill]] }
  0x6f   : > { %v1026_v1 = vld [vmem:[%s6656_s29] sm:$0xff]  ;;  %v1027_v2 = vld [vmem:[%s6656_s29 + $0x8] sm:$0xff]  ;;  %v1028_v8 = vld [vmem:[%s6656_s29 + $0x10] sm:$0xff]  ;;  %s10155_s7 = sld [smem:[#allocation74_spill]] }
  0x70   : > { %v1058_v4 = vpack.c.bf16 %v1027_v2, %v1026_v1  ;;  %v1046_v5 = vld [vmem:[%s6656_s29 + $0xa0] sm:$0xff]  ;;  %v1047_v6 = vld [vmem:[%s6656_s29 + $0xa8] sm:$0xff]  ;;  %v1029_v9 = vld [vmem:[%s6656_s29 + $0x18] sm:$0xff]  ;;  %s10156_s25 = sld [smem:[#allocation39_spill]] }
  0x71   : > { %v1068_v7 = vpack.c.bf16 %v1047_v6, %v1046_v5  ;;  %v1048_v10 = vld [vmem:[%s6656_s29 + $0xb0] sm:$0xff]  ;;  %v1049_v11 = vld [vmem:[%s6656_s29 + $0xb8] sm:$0xff]  ;;  %v1059_v12 = vpack.c.bf16 %v1029_v9, %v1028_v8  ;;  %v1030_v14 = vld [vmem:[%s6656_s29 + $0x20] sm:$0xff]  ;;  %s10157_s2 = sld [smem:[#allocation75_spill]] }
  0x72   : > { %5124 = vmatmul.msk.bf16.vlgmr.msra.gmra.mxu0 %vm1075_vm1, %v1058_v4  ;;  %v1069_v13 = vpack.c.bf16 %v1049_v11, %v1048_v10  ;;  %v1031_v15 = vld [vmem:[%s6656_s29 + $0x28] sm:$0xff]  ;;  %v1050_v16 = vld [vmem:[%s6656_s29 + $0xc0] sm:$0xff]  ;;  %v1032_v20 = vld [vmem:[%s6656_s29 + $0x30] sm:$0xff]  ;;  %s10033_s27 = smov %s10032_s4  ;;  %s10158_s10 = sld [smem:[#allocation76_spill]] }
  0x73   : > { %5134 = vmatmul.msk.bf16.vlgmr.msra.gmra.mxu2 %vm1075_vm1, %v1068_v7  ;;  %v1051_v17 = vld [vmem:[%s6656_s29 + $0xc8] sm:$0xff]  ;;  %v1060_v18 = vpack.c.bf16 %v1031_v15, %v1030_v14  ;;  %v1033_v21 = vld [vmem:[%s6656_s29 + $0x38] sm:$0xff]  ;;  %v1052_v22 = vld [vmem:[%s6656_s29 + $0xd0] sm:$0xff]  ;;  %s10166_s0 = sld [smem:[#allocation77_spill]] }
  0x74   : > { %v1070_v19 = vpack.c.bf16 %v1051_v17, %v1050_v16  ;;  %v1053_v23 = vld [vmem:[%s6656_s29 + $0xd8] sm:$0xff]  ;;  %v1061_v24 = vpack.c.bf16 %v1033_v21, %v1032_v20  ;;  %v1034_v26 = vld [vmem:[%s6656_s29 + $0x40] sm:$0xff]  ;;  %v1035_v27 = vld [vmem:[%s6656_s29 + $0x48] sm:$0xff] }
  0x75   : > { %v1071_v25 = vpack.c.bf16 %v1053_v23, %v1052_v22  ;;  %v1054_v28 = vld [vmem:[%s6656_s29 + $0xe0] sm:$0xff]  ;;  %v1055_v29 = vld [vmem:[%s6656_s29 + $0xe8] sm:$0xff]  ;;  %v1062_v30 = vpack.c.bf16 %v1035_v27, %v1034_v26  ;;  %v1036_v32 = vld [vmem:[%s6656_s29 + $0x50] sm:$0xff] }
  0x76   : > { %v1072_v31 = vpack.c.bf16 %v1055_v29, %v1054_v28  ;;  %v1037_v33 = vld [vmem:[%s6656_s29 + $0x58] sm:$0xff]  ;;  %v1056_v34 = vld [vmem:[%s6656_s29 + $0xf0] sm:$0xff]  ;;  %v1038_v38 = vld [vmem:[%s6656_s29 + $0x60] sm:$0xff]  ;;  %s1017_s28 = sand.u32 1, %s10156_s25  }
  0x77   : > { %v1057_v35 = vld [vmem:[%s6656_s29 + $0xf8] sm:$0xff]  ;;  %v1063_v36 = vpack.c.bf16 %v1037_v33, %v1036_v32  ;;  %v1039_v39 = vld [vmem:[%s6656_s29 + $0x68] sm:$0xff]  ;;  %v1040_v41 = vld [vmem:[%s6656_s29 + $0x70] sm:$0xff]  ;;  %s5121_s1 = sshll.u32 %s1017_s28, 6 }
  0x78   : > { %v1073_v37 = vpack.c.bf16 %v1057_v35, %v1056_v34  ;;  %v1064_v40 = vpack.c.bf16 %v1039_v39, %v1038_v38  ;;  %v1041_v42 = vld [vmem:[%s6656_s29 + $0x78] sm:$0xff]  ;;  %v1042_v44 = vld [vmem:[%s6656_s29 + $0x80] sm:$0xff]  ;;  %v1043_v45 = vld [vmem:[%s6656_s29 + $0x88] sm:$0xff]  ;;  %s9781_s26 = scalar_lea.vmem [#allocation28], %s5121_s1 }
  0x79   : > { %v1065_v43 = vpack.c.bf16 %v1041_v42, %v1040_v41  ;;  %v1066_v48 = vpack.c.bf16 %v1043_v45, %v1042_v44  ;;  %v1044_v60 = vld [vmem:[%s6656_s29 + $0x90] sm:$0xff]  ;;  %v1045_v61 = vld [vmem:[%s6656_s29 + $0x98] sm:$0xff]  ;;  %v6747_v29 = vld [vmem:[#allocation11] sm:$0x7]  ;;  %s5334_s29 = sshll.u32 %s6501_s9, 6  ;;  %s4876_s9 = scalar_lea.sflag [#allocation7], %s1017_s28 }
  0x7a   : > { %v1067_v3 = vpack.c.bf16 %v1045_v61, %v1044_v60  ;;  %s4887_s8 = scalar_lea.hbm %s10166_s0, %s5334_s29  ;;  %s6246_s29 = scalar_lea.hbm %s10166_s0, 128 }
  0x82   : > { %5125 = vmatmul.msk.bf16.gmra.mxu0 %vm1075_vm1, %v1059_v12 }
  0x83   : > { %5135 = vmatmul.msk.bf16.gmra.mxu2 %vm1075_vm1, %v1069_v13 }
  0x92   : > { %5126 = vmatmul.msk.bf16.gmra.mxu0 %vm1075_vm1, %v1060_v18 }
  0x93   : > { %5136 = vmatmul.msk.bf16.gmra.mxu2 %vm1075_vm1, %v1070_v19 }
  0xa2   : > { %5127 = vmatmul.msk.bf16.gmra.mxu0 %vm1075_vm1, %v1061_v24 }
  0xa3   : > { %5137 = vmatmul.msk.bf16.gmra.mxu2 %vm1075_vm1, %v1071_v25 }
  0xb2   : > { %5128 = vmatmul.msk.bf16.gmra.mxu0 %vm1075_vm1, %v1062_v30 }
  0xb3   : > { %5138 = vmatmul.msk.bf16.gmra.mxu2 %vm1075_vm1, %v1072_v31 }
  0xc2   : > { %5129 = vmatmul.msk.bf16.gmra.mxu0 %vm1075_vm1, %v1063_v36 }
  0xc3   : > { %5139 = vmatmul.msk.bf16.gmra.mxu2 %vm1075_vm1, %v1073_v37 }
  0xd2   : > { %5130 = vmatmul.msk.bf16.gmra.mxu0 %vm1075_vm1, %v1064_v40  ;;  %v6763_v40 = vperm.slane %v6747_v29, 1 }
  0xe2   : > { %5131 = vmatmul.msk.bf16.gmra.mxu0 %vm1075_vm1, %v1065_v43 }
  0xef   : > { %v1137_v49 = vpop.f32.mrf.mxu0 }
  0xf0   : > { %v1221_v50 = vmul.f32 %v6702_v46, %v1137_v49 }
  0xf2   : > { %v6708_v51 = vadd.f32 %v6704_v47, %v1221_v50  ;;  %5132 = vmatmul.msk.bf16.gmra.mxu0 %vm1075_vm1, %v1066_v48 }
  0xf4   : > { %v5140_v52 = vmul.f32 -1.442695, %v6708_v51 }
  0xf6   : > { %v1187_v53 = vpop.f32.mrf.mxu2  ;;  %5532 = vpow2.f32 %v5140_v52 }
  0xf7   : > { %v1241_v54 = vmul.f32 %v6702_v46, %v1187_v53  ;;  %v1139_v55 = vpop.f32.mrf.mxu0 }
  0xf8   : > { %v1222_v57 = vmul.f32 %v6702_v46, %v1139_v55 }
  0xf9   : > { %v6714_v56 = vadd.f32 %v6704_v47, %v1241_v54 }
  0xfa   : > { %v6719_v59 = vadd.f32 %v6704_v47, %v1222_v57 }
  0xfb   : > { %v5160_v58 = vmul.f32 -1.442695, %v6714_v56 }
  0xfc   : > { %v5533_v62 = vpop.eup %5532  ;;  %v5141_v63 = vmul.f32 -1.442695, %v6719_v59 }
  0xfd   : > { %5534 = vpow2.f32 %v5160_v58  ;;  %v1385_v0 = vadd.f32 1.0, %v5533_v62 }
  0xfe   : > { %v1189_v1 = vpop.f32.mrf.mxu2  ;;  %5536 = vpow2.f32 %v5141_v63 }
  0xff   : > { %v1242_v2 = vmul.f32 %v6702_v46, %v1189_v1  ;;  %5538 = vrcp.f32 %v1385_v0  ;;  %v1142_v4 = vpop.f32.mrf.mxu0  ;;  %v1426_v23 = vand.u32 2147483647, %v1385_v0  ;;  %vm1422_vm2 = vweird.f32 %v1385_v0 }
 0x100   : > { %v1223_v6 = vmul.f32 %v6702_v46, %v1142_v4  ;;  %v1428_v31 = vand.u32 2147483648, %v1385_v0 }
 0x101   : > { %v6726_v5 = vadd.f32 %v6704_v47, %v1242_v2  ;;  %vm6758_vm5 = vcmp.eq.f32.partialorder %v1426_v23, 8.507059e+37 }
 0x102   : > { %v6731_v9 = vadd.f32 %v6704_v47, %v1223_v6  ;;  %5133 = vmatmul.msk.bf16.gmra.mxu0 %vm1075_vm1, %v1067_v3  ;;  %v1429_v48 = vor.u32 1.1754944e-38, %v1428_v31 }
 0x103   : > { %v5535_v7 = vpop.eup %5534  ;;  %v5161_v8 = vmul.f32 -1.442695, %v6726_v5 }
 0x104   : > { %v1405_v10 = vadd.f32 1.0, %v5535_v7  ;;  %v5537_v11 = vpop.eup %5536  ;;  %v5142_v12 = vmul.f32 -1.442695, %v6731_v9 }
 0x105   : > { %5540 = vpow2.f32 %v5161_v8  ;;  %v5539_v13 = vpop.eup %5538  ;;  %v6735_v15 = vadd.f32 1.0, %v5537_v11 }
 0x106   : > { %5542 = vrcp.f32 %v1405_v10  ;;  %v1418_v14 = vmul.f32 %v5539_v13, %v1385_v0  ;;  %v1192_v16 = vpop.f32.mrf.mxu2  ;;  %vm1423_vm3 = vweird.f32 %v5539_v13  ;;  %v1726_v32 = vand.u32 2147483647, %v1405_v10 }
 0x107   : > { %5544 = vpow2.f32 %v5142_v12  ;;  %v1243_v17 = vmul.f32 %v6702_v46, %v1192_v16  ;;  %v1144_v26 = vpop.f32.mrf.mxu0  ;;  %v1728_v33 = vand.u32 2147483648, %v1405_v10  ;;  %vm6754_vm4 = vmor %vm1422_vm2, %vm1423_vm3  ;;  %v1441_v42 = vand.u32 2147483647, %v6735_v15 }
 0x108   : > { %v1419_v18 = vsub.f32 1.0, %v1418_v14  ;;  %5546 = vrcp.f32 %v6735_v15  ;;  %v1224_v37 = vmul.f32 %v6702_v46, %v1144_v26  ;;  %v1443_v45 = vand.u32 2147483648, %v6735_v15 }
 0x109   : > { %v6740_v19 = vadd.f32 %v6704_v47, %v1243_v17  ;;  %vm1722_vm6 = vweird.f32 %v1405_v10  ;;  %vm6773_vm8 = vcmp.eq.f32.partialorder %v1726_v32, 8.507059e+37  ;;  %v1729_v52 = vor.u32 1.1754944e-38, %v1728_v33 }
 0x10a   : > { %v1420_v21 = vmul.f32 %v5539_v13, %v1419_v18  ;;  %vm1437_vm9 = vweird.f32 %v6735_v15  ;;  %v6779_v53 = vadd.f32 %v6704_v47, %v1224_v37  ;;  %vm6788_vm12 = vcmp.eq.f32.partialorder %v1441_v42, 8.507059e+37  ;;  %v1983_v42 = vld [vmem:[#allocation11 + $0x4] sm:$0x7] }
 0x10b   : > { %v5541_v20 = vpop.eup %5540  ;;  %v5162_v25 = vmul.f32 -1.442695, %v6740_v19  ;;  %v1444_v63 = vor.u32 1.1754944e-38, %v1443_v45  ;;  %v6808_v14 = vperm.slane %v6747_v29, 2  ;;  %vm2059_vm3 = vcmask 1046528  }
 0x10c   : > { %v6742_v22 = vpop.eup %5542  ;;  %v6744_v24 = vadd.f32 1.0, %v5541_v20  ;;  %v1421_v28 = vadd.f32 %v5539_v13, %v1420_v21  ;;  %v6903_v20 = vperm.slane %v1983_v42, 2 }
 0x10d   : > { %v5545_v27 = vpop.eup %5544  ;;  %v1718_v30 = vmul.f32 %v6742_v22, %v1405_v10  ;;  %vm1723_vm7 = vweird.f32 %v6742_v22  ;;  %v5143_v10 = vmul.f32 -1.442695, %v6779_v53  ;;  %v2119_v61 = vmul.f32 0.0, %v6808_v14 }
 0x10e   : > { %5548 = vrcp.f32 %v6744_v24  ;;  %v5547_v34 = vpop.eup %5546  ;;  %v6751_v36 = vadd.f32 1.0, %v5545_v27  ;;  %v1425_v43 = vsel %vm6754_vm4, %v5539_v13, %v1421_v28  ;;  %vm6784_vm11 = vmor %vm1722_vm6, %vm1723_vm7  ;;  %vm1737_vm13 = vweird.f32 %v6744_v24  ;;  %v1194_v16 = vpop.f32.mrf.mxu2 }
 0x10f   : > { %v1719_v35 = vsub.f32 1.0, %v1718_v30  ;;  %5550 = vpow2.f32 %v5162_v25  ;;  %v1433_v41 = vmul.f32 %v5547_v34, %v6735_v15  ;;  %v1430_v55 = vsel %vm6758_vm5, %v1429_v48, %v1425_v43  ;;  %v6812_v17 = vpop.f32.mrf.mxu0 }
 0x110   : > { %5552 = vrcp.f32 %v6751_v36  ;;  %vm1438_vm10 = vweird.f32 %v5547_v34  ;;  %v1741_v2 = vand.u32 2147483647, %v6744_v24  ;;  %v1743_v3 = vand.u32 2147483648, %v6744_v24 }
 0x111   : > { %v1720_v44 = vmul.f32 %v6742_v22, %v1719_v35  ;;  %v1434_v49 = vsub.f32 1.0, %v1433_v41  ;;  %v1897_v7 = vmul.f32 %v1430_v55, %v6708_v51  ;;  %vm1439_vm14 = vmor %vm1437_vm9, %vm1438_vm10  ;;  %v6836_v30 = vperm.slane %v6747_v29, 0 }
 0x112   : > { %vm6823_vm1 = vcmp.eq.f32.partialorder %v1741_v2, 8.507059e+37  ;;  %v1456_v32 = vand.u32 2147483647, %v6751_v36  ;;  %vm1452_vm4 = vweird.f32 %v6751_v36  ;;  %vm2165_vm7 = vcmask 1045504  }
 0x113   : > { %v1721_v57 = vadd.f32 %v6742_v22, %v1720_v44  ;;  %v1435_v58 = vmul.f32 %v5547_v34, %v1434_v49  ;;  %v2027_v25 = vmul.f32 %v6763_v40, %v1897_v7  ;;  %v2117_v29 = vmul.f32 %v6808_v14, %v1897_v7 }
 0x114   : > { %v5549_v54 = vpop.eup %5548  ;;  %vm1457_vm6 = vcmp.eq.f32.partialorder %v1456_v32, 8.507059e+37  ;;  %v6869_v55 = vperm.slane %v1983_v42, 1 }
 0x115   : > { %v5551_v60 = vpop.eup %5550  ;;  %v1733_v0 = vmul.f32 %v5549_v54, %v6744_v24  ;;  %v1436_v1 = vadd.f32 %v5547_v34, %v1435_v58  ;;  %vm1738_vm15 = vweird.f32 %v5549_v54  ;;  %v1725_v11 = vsel %vm6784_vm11, %v6742_v22, %v1721_v57 }
 0x116   : > { %v6796_v4 = vadd.f32 1.0, %v5551_v60  ;;  %v5553_v6 = vpop.eup %5552  ;;  %vm6819_vm0 = vmor %vm1737_vm13, %vm1738_vm15  ;;  %v1744_v22 = vor.u32 1.1754944e-38, %v1743_v3  ;;  %v1730_v26 = vsel %vm6773_vm8, %v1729_v52, %v1725_v11  ;;  %v2060_v44 = vrot.slane %v2027_v25, 1  ;;  %v1197_v62 = vpop.f32.mrf.mxu2 }
 0x117   : > { %v1734_v8 = vsub.f32 1.0, %v1733_v0  ;;  %v1440_v12 = vsel %vm1439_vm14, %v5547_v34, %v1436_v1  ;;  %v1448_v13 = vmul.f32 %v5553_v6, %v6751_v36  ;;  %vm1453_vm2 = vweird.f32 %v5553_v6  ;;  %v6843_v34 = vld [vmem:[#allocation11 + $0x8] sm:$0x7] }
 0x118   : > { %5554 = vrcp.f32 %v6796_v4  ;;  %v1445_v51 = vsel %vm6788_vm12, %v1444_v63, %v1440_v12  ;;  %v6851_v39 = vmul.f32 %v1730_v26, %v6714_v56  ;;  %vm1454_vm5 = vmor %vm1452_vm4, %vm1453_vm2  ;;  %v6864_v49 = vperm.slane %v6843_v34, 1  ;;  %v1149_v63 = vpop.f32.mrf.mxu0 }
 0x119   : > { %v1735_v15 = vmul.f32 %v5549_v54, %v1734_v8  ;;  %v6815_v18 = vmul.f32 %v1445_v51, %v6719_v59  ;;  %v1449_v23 = vsub.f32 1.0, %v1448_v13  ;;  %v1458_v59 = vand.u32 2147483648, %v6751_v36 }
 0x11a   : > { %5556 = vpow2.f32 %v5143_v10  ;;  %v2010_v57 = vmul.f32 %v6836_v30, %v1897_v7  ;;  %v2037_v58 = vmul.f32 %v6763_v40, %v6851_v39  ;;  %v2166_v0 = vrot.slane %v2117_v29, 2 }
 0x11b   : > { %v1736_v27 = vadd.f32 %v5549_v54, %v1735_v15  ;;  %v6833_v24 = vmul.f32 %v6763_v40, %v6815_v18  ;;  %v1450_v28 = vmul.f32 %v5553_v6, %v1449_v23  ;;  %v6861_v45 = vmul.f32 %v6808_v14, %v6815_v18 }
 0x11c   : > { %v1459_v48 = vor.u32 1.1754944e-38, %v1458_v59  ;;  %v1244_v3 = vmul.f32 %v6702_v46, %v1194_v16  ;;  %vm1752_vm8 = vweird.f32 %v6796_v4  ;;  %v1756_v10 = vand.u32 2147483647, %v6796_v4 }
 0x11d   : > { %v1740_v31 = vsel %vm6819_vm0, %v5549_v54, %v1736_v27  ;;  %v2061_v35 = vrot.slane %v6833_v24, 1  ;;  %v1451_v38 = vadd.f32 %v5553_v6, %v1450_v28  ;;  %v6867_v54 = vperm.slane %v1983_v42, 0 }
 0x11e   : > { %v6841_v33 = vpop.eup %5554  ;;  %v1745_v37 = vsel %vm6823_vm1, %v1744_v22, %v1740_v31  ;;  %v2167_v1 = vrot.slane %v6861_v45, 2  ;;  %v2132_v11 = vmul.f32 %v6808_v14, %v6851_v39  ;;  %v1758_v13 = vand.u32 2147483648, %v6796_v4 }
 0x11f   : > { %v6854_v41 = vmul.f32 %v1745_v37, %v6726_v5  ;;  %v1748_v43 = vmul.f32 %v6841_v33, %v6796_v4  ;;  %v1455_v36 = vsel %vm1454_vm5, %v5553_v6, %v1451_v38  ;;  %v2062_v50 = vsel %vm2059_vm3, %v2060_v44, %v2061_v35 }
 0x120   : > { %v5557_v5 = vpop.eup %5556  ;;  %v1460_v52 = vsel %vm1457_vm6, %v1459_v48, %v1455_v36  ;;  %v2100_v7 = vadd.f32 %v2062_v50, %v2010_v57  ;;  %vm1753_vm9 = vweird.f32 %v6841_v33  ;;  %v2075_v51 = vrot.slane %v2037_v58, 1  ;;  %v1152_v50 = vpop.f32.mrf.mxu0 }
 0x121   : > { %v1749_v56 = vsub.f32 1.0, %v1748_v43  ;;  %v6876_v60 = vmul.f32 %v6763_v40, %v6854_v41  ;;  %v1899_v6 = vmul.f32 %v1460_v52, %v6731_v9  ;;  %v6884_v8 = vadd.f32 1.0, %v5557_v5  ;;  %vm6916_vm10 = vmor %vm1752_vm8, %vm1753_vm9 }
 0x122   : > { %v6892_v12 = vmul.f32 %v6808_v14, %v6854_v41  ;;  %v6898_v15 = vperm.slane %v6843_v34, 2  ;;  %v2168_v16 = vsel %vm2165_vm7, %v2166_v0, %v2167_v1  ;;  %v2011_v22 = vmul.f32 %v6836_v30, %v6815_v18 }
 0x123   : > { %v1750_v2 = vmul.f32 %v6841_v33, %v1749_v56  ;;  %v2076_v9 = vrot.slane %v6876_v60, 1  ;;  %5558 = vrcp.f32 %v6884_v8  ;;  %v2222_v23 = vadd.f32 %v2168_v16, %v2100_v7 }
 0x124   : > { %v2264_v25 = vmul.f32 %v6867_v54, %v1899_v6  ;;  %v6910_v26 = vmul.f32 %v6869_v55, %v1899_v6  ;;  %v2020_v59 = vmul.f32 %v6836_v30, %v6851_v39  ;;  %v2191_v24 = vrot.slane %v2132_v11, 2 }
 0x125   : > { %v1751_v21 = vadd.f32 %v6841_v33, %v1750_v2  ;;  %v2192_v18 = vrot.slane %v6892_v12, 2  ;;  %v6924_v28 = vadd.f32 %v6704_v47, %v1244_v3  ;;  %vm6926_vm11 = vcmp.eq.f32.partialorder %v1756_v10, 8.507059e+37 }
 0x126   : > { %v1759_v32 = vor.u32 1.1754944e-38, %v1758_v13  ;;  %v2077_v4 = vsel %vm2059_vm3, %v2075_v51, %v2076_v9  ;;  %v6933_v37 = vrot.slane %v2119_v61, 2  ;;  %v2101_v38 = vadd.f32 %v2061_v35, %v2011_v22  ;;  %v1199_v35 = vpop.f32.mrf.mxu2 }
 0x127   : > { %v1755_v29 = vsel %vm6916_vm10, %v6841_v33, %v1751_v21  ;;  %v5163_v42 = vmul.f32 -1.442695, %v6924_v28  ;;  %v1225_v43 = vmul.f32 %v6702_v46, %v6812_v17  ;;  %v6941_v36 = vadd.f32 %v2264_v25, %v2222_v23 }
 0x128   : > { %v2329_v48 = vrot.slane %v6910_v26, 1  ;;  %v6945_v56 = vmul.f32 %v6903_v20, %v1899_v6  ;;  %v1245_v5 = vmul.f32 %v6702_v46, %v1197_v62  ;;  %v2110_v52 = vadd.f32 %v2077_v4, %v2020_v59 }
 0x129   : > { %v5559_v44 = vpop.eup %5558  ;;  %v2193_v33 = vsel %vm2165_vm7, %v2191_v24, %v2192_v18  ;;  %5560 = vpow2.f32 %v5163_v42  ;;  %v1760_v17 = vsel %vm6926_vm11, %v1759_v32, %v1755_v29  ;;  %v6955_v58 = vadd.f32 %v6704_v47, %v1225_v43 }
 0x12a   : > { %v1463_v57 = vmul.f32 %v5559_v44, %v6884_v8  ;;  %v6958_v61 = vadd.f32 %v6704_v47, %v1245_v5  ;;  %v1226_v62 = vmul.f32 %v6702_v46, %v1149_v63  ;;  %vm1467_vm12 = vweird.f32 %v6884_v8 }
 0x12b   : > { %v1246_v2 = vmul.f32 %v6702_v46, %v1199_v35  ;;  %v1227_v3 = vmul.f32 %v6702_v46, %v1152_v50  ;;  %v1473_v6 = vand.u32 2147483648, %v6884_v8  ;;  %v5144_v7 = vmul.f32 -1.442695, %v6955_v58 }
 0x12c   : > { %v1464_v0 = vsub.f32 1.0, %v1463_v57  ;;  %v5164_v10 = vmul.f32 -1.442695, %v6958_v61  ;;  %v6968_v11 = vadd.f32 %v6704_v47, %v1226_v62  ;;  %vm1468_vm13 = vweird.f32 %v5559_v44 }
 0x12d   : > { %v1471_v63 = vand.u32 2147483647, %v6884_v8  ;;  %v6972_v51 = vadd.f32 %v6704_v47, %v1246_v2  ;;  %v1919_v16 = vmul.f32 %v1760_v17, %v6740_v19  ;;  %v2170_v21 = vsel %vm2165_vm7, %v2167_v1, %v6933_v37  ;;  %vm1469_vm14 = vmor %vm1467_vm12, %vm1468_vm13 }
 0x12e   : > { %v1465_v13 = vmul.f32 %v5559_v44, %v1464_v0  ;;  %5562 = vpow2.f32 %v5144_v7  ;;  %v5145_v22 = vmul.f32 -1.442695, %v6968_v11  ;;  %v2388_v27 = vmul.f32 0.0, %v6903_v20 }
 0x12f   : > { %v5561_v23 = vpop.eup %5560  ;;  %5564 = vpow2.f32 %v5164_v10  ;;  %v6982_v59 = vadd.f32 %v6704_v47, %v1227_v3  ;;  %v1474_v19 = vor.u32 1.1754944e-38, %v1473_v6  ;;  %v2021_v45 = vmul.f32 %v6836_v30, %v6854_v41  ;;  %v1154_v6 = vpop.f32.mrf.mxu0 }
 0x130   : > { %v1466_v25 = vadd.f32 %v5559_v44, %v1465_v13  ;;  %v6986_v24 = vadd.f32 1.0, %v5561_v23  ;;  %5566 = vpow2.f32 %v5145_v22  ;;  %v2232_v1 = vadd.f32 %v2193_v33, %v2110_v52 }
 0x131   : > { %vm1472_vm15 = vcmp.eq.f32.partialorder %v1471_v63, 8.507059e+37  ;;  %v5165_v32 = vmul.f32 -1.442695, %v6972_v51  ;;  %v2274_v4 = vmul.f32 %v6867_v54, %v1919_v16  ;;  %v6993_v29 = vmul.f32 %v6869_v55, %v1919_v16 }
 0x132   : > { %v1470_v31 = vsel %vm1469_vm14, %v5559_v44, %v1466_v25  ;;  %5568 = vrcp.f32 %v6986_v24  ;;  %v2434_v8 = vrot.slane %v6945_v56, 2  ;;  %v2223_v5 = vadd.f32 %v2170_v21, %v2101_v38 }
 0x133   : > { %v1475_v42 = vsel %vm1472_vm15, %v1474_v19, %v1470_v31  ;;  %v5146_v35 = vmul.f32 -1.442695, %v6982_v59  ;;  %v7000_v44 = vmul.f32 %v6903_v20, %v1919_v16  ;;  %v7002_v52 = vrot.slane %v2388_v27, 2 }
 0x134   : > { %v1900_v43 = vmul.f32 %v1475_v42, %v6779_v53  ;;  %v5563_v50 = vpop.eup %5562  ;;  %v2111_v33 = vadd.f32 %v2076_v9, %v2021_v45  ;;  %v2195_v57 = vsel %vm2165_vm7, %v2192_v18, %v6933_v37  ;;  %5570 = vpow2.f32 %v5165_v32 }
 0x135   : > { %v5565_v56 = vpop.eup %5564  ;;  %v7013_v0 = vadd.f32 %v2274_v4, %v2232_v1  ;;  %v2344_v2 = vrot.slane %v6993_v29, 1  ;;  %v1771_v60 = vand.u32 2147483647, %v6986_v24  ;;  %v7017_v9 = vadd.f32 1.0, %v5563_v50 }
 0x136   : > { %v2265_v53 = vmul.f32 %v6867_v54, %v1900_v43  ;;  %v2298_v38 = vmul.f32 %v6869_v55, %v1900_v43  ;;  %v2387_v17 = vmul.f32 %v6903_v20, %v1900_v43  ;;  %v5567_v62 = vpop.eup %5566  ;;  %v7019_v18 = vadd.f32 1.0, %v5565_v56 }
 0x137   : > { %5572 = vpow2.f32 %v5146_v35  ;;  %v2459_v10 = vrot.slane %v7000_v44, 2  ;;  %v7024_v63 = vperm.slane %v6843_v34, 0  ;;  %v1773_v16 = vand.u32 2147483648, %v6986_v24 }
 0x138   : > { %v2281_v12 = vadd.f32 %v2265_v53, %v2223_v5  ;;  %v2330_v3 = vrot.slane %v2298_v38, 1  ;;  %v5569_v7 = vpop.eup %5568  ;;  %v2435_v13 = vrot.slane %v2387_v17, 2  ;;  %5574 = vrcp.f32 %v7017_v9 }
 0x139   : > { %v7027_v21 = vadd.f32 %v2195_v57, %v2111_v33  ;;  %v7029_v22 = vadd.f32 1.0, %v5567_v62  ;;  %v2656_v23 = vmul.f32 0.0, %v6898_v15  ;;  %v1763_v27 = vmul.f32 %v5569_v7, %v6986_v24 }
 0x13a   : > { %v2331_v25 = vsel %vm2059_vm3, %v2329_v48, %v2330_v3  ;;  %vm1767_vm0 = vweird.f32 %v6986_v24  ;;  %v7038_v19 = vmul.f32 %v6702_v46, %v1154_v6  ;;  %v5571_v34 = vpop.eup %5570  ;;  %v2370_v45 = vadd.f32 %v2330_v3, %v2281_v12 }
 0x13b   : > { %vm7040_vm1 = vcmp.eq.f32.partialorder %v1771_v60, 8.507059e+37  ;;  %v1486_v31 = vand.u32 2147483647, %v7017_v9  ;;  %5576 = vrcp.f32 %v7019_v18  ;;  %v2438_v26 = vsel %vm2165_vm7, %v2435_v13, %v7002_v52 }
 0x13c   : > { %v1764_v48 = vsub.f32 1.0, %v1763_v27  ;;  %vm1768_vm2 = vweird.f32 %v5569_v7  ;;  %v1488_v32 = vand.u32 2147483648, %v7017_v9  ;;  %v2369_v42 = vadd.f32 %v2331_v25, %v6941_v36 }
 0x13d   : > { %v5573_v4 = vpop.eup %5572  ;;  %v1774_v43 = vor.u32 1.1754944e-38, %v1773_v16  ;;  %5578 = vrcp.f32 %v7029_v22  ;;  %v7051_v5 = vrot.slane %v2656_v23, 2  ;;  %v2436_v50 = vsel %vm2165_vm7, %v2434_v8, %v2435_v13  ;;  %vm7061_vm5 = vmor %vm1767_vm0, %vm1768_vm2 }
 0x13e   : > { %v5575_v35 = vpop.eup %5574  ;;  %v1765_v33 = vmul.f32 %v5569_v7, %v1764_v48  ;;  %vm1482_vm4 = vweird.f32 %v7017_v9  ;;  %v7055_v57 = vadd.f32 1.0, %v5571_v34  ;;  %v7057_v56 = vadd.f32 %v2438_v26, %v2370_v45 }
 0x13f   : > { %v1478_v36 = vmul.f32 %v5575_v35, %v7017_v9  ;;  %vm7066_vm6 = vcmp.eq.f32.partialorder %v1486_v31, 8.507059e+37  ;;  %v1786_v8 = vand.u32 2147483647, %v7019_v18  ;;  %v1489_v62 = vor.u32 1.1754944e-38, %v1488_v32 }
 0x140   : > { %v1766_v17 = vadd.f32 %v5569_v7, %v1765_v33  ;;  %vm1782_vm8 = vweird.f32 %v7019_v18  ;;  %5580 = vrcp.f32 %v7055_v57  ;;  %v7075_v24 = vadd.f32 %v2436_v50, %v2369_v42 }
 0x141   : > { %v7073_v60 = vpop.eup %5576  ;;  %v1479_v12 = vsub.f32 1.0, %v1478_v36  ;;  %v1788_v3 = vand.u32 2147483648, %v7019_v18  ;;  %v7078_v6 = vadd.f32 1.0, %v5573_v4  ;;  %v1501_v23 = vand.u32 2147483647, %v7029_v22 }
 0x142   : > { %v1770_v13 = vsel %vm7061_vm5, %v5569_v7, %v1766_v17  ;;  %v1778_v16 = vmul.f32 %v7073_v60, %v7019_v18  ;;  %v1503_v25 = vand.u32 2147483648, %v7029_v22  ;;  %vm1483_vm9 = vweird.f32 %v5575_v35 }
 0x143   : > { %v5579_v27 = vpop.eup %5578  ;;  %v1775_v34 = vsel %vm7040_vm1, %v1774_v43, %v1770_v13  ;;  %v1480_v45 = vmul.f32 %v5575_v35, %v1479_v12  ;;  %vm7088_vm10 = vcmp.eq.f32.partialorder %v1786_v8, 8.507059e+37  ;;  %vm1497_vm11 = vweird.f32 %v7029_v22  ;;  %vm1484_vm13 = vmor %vm1482_vm4, %vm1483_vm9 }
 0x144   : > { %v1920_v7 = vmul.f32 %v1775_v34, %v6924_v28  ;;  %v1779_v26 = vsub.f32 1.0, %v1778_v16  ;;  %v1493_v48 = vmul.f32 %v5579_v27, %v7029_v22  ;;  %v1801_v32 = vand.u32 2147483647, %v7055_v57  ;;  %v1202_v22 = vpop.f32.mrf.mxu2 }
 0x145   : > { %v1481_v4 = vadd.f32 %v5575_v35, %v1480_v45  ;;  %vm1783_vm12 = vweird.f32 %v7073_v60  ;;  %v1803_v1 = vand.u32 2147483648, %v7055_v57  ;;  %5582 = vrcp.f32 %v7078_v6 }
 0x146   : > { %v5581_v42 = vpop.eup %5580  ;;  %v2275_v43 = vmul.f32 %v6867_v54, %v1920_v7  ;;  %v2308_v50 = vmul.f32 %v6869_v55, %v1920_v7  ;;  %v2402_v33 = vmul.f32 %v6903_v20, %v1920_v7  ;;  %v1780_v28 = vmul.f32 %v7073_v60, %v1779_v26  ;;  %vm7118_vm15 = vmor %vm1782_vm8, %vm1783_vm12 }
 0x147   : > { %v1485_v53 = vsel %vm1484_vm13, %v5575_v35, %v1481_v4  ;;  %v1494_v36 = vsub.f32 1.0, %v1493_v48  ;;  %vm1498_vm14 = vweird.f32 %v5579_v27  ;;  %v1793_v8 = vmul.f32 %v5581_v42, %v7055_v57 }
 0x148   : > { %v2291_v17 = vadd.f32 %v2275_v43, %v7027_v21  ;;  %v2345_v12 = vrot.slane %v2308_v50, 1  ;;  %v2460_v13 = vrot.slane %v2402_v33, 2  ;;  %v1490_v16 = vsel %vm7066_vm6, %v1489_v62, %v1485_v53  ;;  %vm1499_vm5 = vmor %vm1497_vm11, %vm1498_vm14 }
 0x149   : > { %v7111_v34 = vmul.f32 %v1490_v16, %v6955_v58  ;;  %v1781_v9 = vadd.f32 %v7073_v60, %v1780_v28  ;;  %v1495_v45 = vmul.f32 %v5579_v27, %v1494_v36  ;;  %v1794_v21 = vsub.f32 1.0, %v1793_v8 }
 0x14a   : > { %v2346_v38 = vsel %vm2059_vm3, %v2344_v2, %v2345_v12  ;;  %v1789_v62 = vor.u32 1.1754944e-38, %v1788_v3  ;;  %vm1797_vm0 = vweird.f32 %v7055_v57  ;;  %vm1798_vm1 = vweird.f32 %v5581_v42 }
 0x14b   : > { %v7126_v58 = vpop.eup %5582  ;;  %v2380_v7 = vadd.f32 %v2345_v12, %v2291_v17  ;;  %vm7128_vm2 = vcmp.eq.f32.partialorder %v1501_v23, 8.507059e+37  ;;  %v1504_v18 = vor.u32 1.1754944e-38, %v1503_v25  ;;  %vm7132_vm4 = vcmp.eq.f32.partialorder %v1801_v32, 8.507059e+37  ;;  %vm7152_vm6 = vmor %vm1797_vm0, %vm1798_vm1 }
 0x14c   : > { %v2379_v29 = vadd.f32 %v2346_v38, %v7013_v0  ;;  %v1785_v2 = vsel %vm7118_vm15, %v7073_v60, %v1781_v9  ;;  %v1496_v3 = vadd.f32 %v5579_v27, %v1495_v45  ;;  %v1795_v23 = vmul.f32 %v5581_v42, %v1794_v21  ;;  %v1204_v60 = vpop.f32.mrf.mxu2 }
 0x14d   : > { %v2461_v25 = vsel %vm2165_vm7, %v2459_v10, %v2460_v13  ;;  %v2463_v32 = vsel %vm2165_vm7, %v2460_v13, %v7002_v52  ;;  %v2532_v0 = vmul.f32 %v7024_v63, %v7111_v34  ;;  %v1804_v4 = vor.u32 1.1754944e-38, %v1803_v1 }
 0x14e   : > { %v2565_v43 = vmul.f32 %v6864_v49, %v7111_v34  ;;  %v1790_v44 = vsel %vm7088_vm10, %v1789_v62, %v1785_v2  ;;  %v1500_v10 = vsel %vm1499_vm5, %v5579_v27, %v1496_v3  ;;  %v1796_v50 = vadd.f32 %v5581_v42, %v1795_v23 }
 0x14f   : > { %v2654_v33 = vmul.f32 %v6898_v15, %v7111_v34  ;;  %v7163_v28 = vmul.f32 %v1790_v44, %v6958_v61  ;;  %v1505_v57 = vsel %vm7128_vm2, %v1504_v18, %v1500_v10  ;;  %v1508_v1 = vmul.f32 %v7126_v58, %v7078_v6 }
 0x150   : > { %v2500_v53 = vadd.f32 %v2461_v25, %v2379_v29  ;;  %v2501_v36 = vadd.f32 %v2463_v32, %v2380_v7  ;;  %v7170_v8 = vmul.f32 %v1505_v57, %v6968_v11  ;;  %v1800_v27 = vsel %vm7152_vm6, %v5581_v42, %v1796_v50  ;;  %v1157_v50 = vpop.f32.mrf.mxu0 }
 0x151   : > { %v2542_v31 = vmul.f32 %v7024_v63, %v7163_v28  ;;  %v2575_v61 = vmul.f32 %v6864_v49, %v7163_v28  ;;  %v2669_v17 = vmul.f32 %v6898_v15, %v7163_v28  ;;  %v1805_v12 = vsel %vm7132_vm4, %v1804_v4, %v1800_v27 }
 0x152   : > { %v2533_v13 = vmul.f32 %v7024_v63, %v7170_v8  ;;  %v2566_v11 = vmul.f32 %v6864_v49, %v7170_v8  ;;  %v2655_v42 = vmul.f32 %v6898_v15, %v7170_v8  ;;  %v7189_v16 = vmul.f32 %v1805_v12, %v6972_v51 }
 0x153   : > { %v2548_v9 = vadd.f32 %v2532_v0, %v7075_v24  ;;  %v2597_v35 = vrot.slane %v2565_v43, 1  ;;  %v2702_v45 = vrot.slane %v2654_v33, 2  ;;  %v1509_v21 = vsub.f32 1.0, %v1508_v1 }
 0x154   : > { %v2549_v38 = vadd.f32 %v2533_v13, %v7057_v56  ;;  %v2598_v62 = vrot.slane %v2566_v11, 1  ;;  %v2703_v7 = vrot.slane %v2655_v42, 2  ;;  %v2543_v26 = vmul.f32 %v7024_v63, %v7189_v16 }
 0x155   : > { %v2612_v18 = vrot.slane %v2575_v61, 1  ;;  %v2727_v48 = vrot.slane %v2669_v17, 2  ;;  %v2576_v29 = vmul.f32 %v6864_v49, %v7189_v16  ;;  %v2670_v51 = vmul.f32 %v6898_v15, %v7189_v16 }
 0x156   : > { %v2558_v2 = vadd.f32 %v2542_v31, %v2500_v53  ;;  %v2599_v24 = vsel %vm2059_vm3, %v2597_v35, %v2598_v62  ;;  %v2638_v3 = vadd.f32 %v2598_v62, %v2549_v38  ;;  %v2706_v56 = vsel %vm2165_vm7, %v2703_v7, %v7051_v5 }
 0x157   : > { %v2637_v23 = vadd.f32 %v2599_v24, %v2548_v9  ;;  %v2559_v25 = vadd.f32 %v2543_v26, %v2501_v36  ;;  %v2613_v32 = vrot.slane %v2576_v29, 1  ;;  %v2728_v0 = vrot.slane %v2670_v51, 2  ;;  %v1207_v24 = vpop.f32.mrf.mxu2 }
 0x158   : > { %v2704_v4 = vsel %vm2165_vm7, %v2702_v45, %v2703_v7  ;;  %v2759_v43 = vadd.f32 %v2706_v56, %v2638_v3  ;;  %v1247_v44 = vmul.f32 %v6702_v46, %v1202_v22  ;;  %v7206_v10 = vadd.f32 %v6704_v47, %v7038_v19 }
 0x159   : > { %v2758_v33 = vadd.f32 %v2704_v4, %v2637_v23  ;;  %v2614_v57 = vsel %vm2059_vm3, %v2612_v18, %v2613_v32  ;;  %v2648_v1 = vadd.f32 %v2613_v32, %v2559_v25  ;;  %v2729_v53 = vsel %vm2165_vm7, %v2727_v48, %v2728_v0 }
 0x15a   : > { %2775 = vst [vmem:[#allocation3 + $0x8] sm:$0x7f] %v2759_v43  ;;  %v2647_v36 = vadd.f32 %v2614_v57, %v2558_v2  ;;  %v2731_v27 = vsel %vm2165_vm7, %v2728_v0, %v7051_v5  ;;  %v1510_v31 = vmul.f32 %v7126_v58, %v1509_v21  ;;  %v1516_v19 = vand.u32 2147483647, %v7078_v6 }
 0x15b   : > { %2774 = vst [vmem:[#allocation3] sm:$0xff] %v2758_v33  ;;  %v2769_v22 = vadd.f32 %v2731_v27, %v2648_v1  ;;  %v7215_v17 = vadd.f32 %v6704_v47, %v1247_v44  ;;  %vm1512_vm8 = vweird.f32 %v7078_v6  ;;  %v1518_v12 = vand.u32 2147483648, %v7078_v6  ;;  %v1159_v6 = vpop.f32.mrf.mxu0 }
 0x15c   : > { %v2768_v61 = vadd.f32 %v2729_v53, %v2647_v36  ;;  %v5147_v13 = vmul.f32 -1.442695, %v7206_v10  ;;  %v1511_v11 = vadd.f32 %v7126_v58, %v1510_v31  ;;  %vm1513_vm9 = vweird.f32 %v7126_v58 }
 0x15d   : > { %2785 = vst [vmem:[#allocation3 + $0x58] sm:$0x7f] %v2769_v22  ;;  %v7224_v42 = vmul.f32 %v6763_v40, %v7170_v8  ;;  %v5166_v9 = vmul.f32 -1.442695, %v7215_v17  ;;  %v2029_v35 = vmul.f32 %v6763_v40, %v7111_v34  ;;  %v2039_v45 = vmul.f32 %v6763_v40, %v7163_v28  ;;  %vm7249_vm11 = vmor %vm1512_vm8, %vm1513_vm9 }
 0x15e   : > { %2784 = vst [vmem:[#allocation3 + $0x50] sm:$0xff] %v2768_v61  ;;  %v7233_v21 = vmul.f32 %v6763_v40, %v7189_v16  ;;  %v2135_v38 = vmul.f32 %v6808_v14, %v7163_v28  ;;  %vm7237_vm10 = vcmp.eq.f32.partialorder %v1516_v19, 8.507059e+37  ;;  %v2022_v7 = vmul.f32 %v6836_v30, %v7163_v28 }
 0x15f   : > { %5584 = vpow2.f32 %v5166_v9  ;;  %v7245_v26 = vmul.f32 %v6808_v14, %v7189_v16  ;;  %v1519_v48 = vor.u32 1.1754944e-38, %v1518_v12  ;;  %v2078_v29 = vrot.slane %v2039_v45, 1 }
 0x160   : > { %v2079_v51 = vrot.slane %v7233_v21, 1  ;;  %v2196_v2 = vrot.slane %v2135_v38, 2  ;;  %v1515_v28 = vsel %vm7249_vm11, %v7126_v58, %v1511_v11  ;;  %v2064_v3 = vrot.slane %v7224_v42, 1 }
 0x161   : > { %v2197_v56 = vrot.slane %v7245_v26, 2  ;;  %5586 = vpow2.f32 %v5147_v13  ;;  %v2063_v23 = vrot.slane %v2029_v35, 1  ;;  %v1248_v32 = vmul.f32 %v6702_v46, %v1204_v60 }
 0x162   : > { %v2080_v25 = vsel %vm2059_vm3, %v2078_v29, %v2079_v51  ;;  %v1229_v0 = vmul.f32 %v6702_v46, %v1157_v50  ;;  %v2121_v4 = vmul.f32 %v6808_v14, %v7170_v8  ;;  %v1249_v44 = vmul.f32 %v6702_v46, %v1207_v24 }
 0x163   : > { %v2112_v43 = vadd.f32 %v2080_v25, %v2022_v7  ;;  %v2198_v58 = vsel %vm2165_vm7, %v2196_v2, %v2197_v56  ;;  %v1520_v33 = vsel %vm7237_vm10, %v1519_v48, %v1515_v28  ;;  %v7273_v57 = vadd.f32 %v6704_v47, %v1248_v32  ;;  %v1209_v7 = vpop.f32.mrf.mxu2  ;;  %v1162_v48 = vpop.f32.mrf.mxu0  ;;  %v7318_v25 = vld [vmem:[#allocation8] ss:$0 sm:$0xff] }
 0x164   : > { %v7276_v60 = vadd.f32 %v6704_v47, %v1229_v0  ;;  %v1230_v50 = vmul.f32 %v6702_v46, %v1159_v6  ;;  %v2012_v53 = vmul.f32 %v6836_v30, %v7111_v34  ;;  %v2065_v36 = vsel %vm2059_vm3, %v2063_v23, %v2064_v3 }
 0x165   : > { %v5585_v1 = vpop.eup %5584  ;;  %v2120_v27 = vmul.f32 %v6808_v14, %v7111_v34  ;;  %v7284_v31 = vadd.f32 %v2198_v58, %v2112_v43  ;;  %v5167_v61 = vmul.f32 -1.442695, %v7273_v57  ;;  %v7291_v12 = vadd.f32 %v6704_v47, %v1249_v44 }
 0x166   : > { %v7286_v22 = vadd.f32 1.0, %v5585_v1  ;;  %v5148_v19 = vmul.f32 -1.442695, %v7276_v60  ;;  %v1903_v11 = vmul.f32 %v1520_v33, %v6982_v59  ;;  %v2172_v42 = vrot.slane %v2121_v4, 2 }
 0x167   : > { %v5587_v13 = vpop.eup %5586  ;;  %v7295_v9 = vadd.f32 %v6704_v47, %v1230_v50  ;;  %v2102_v35 = vadd.f32 %v2065_v36, %v2012_v53  ;;  %v2171_v34 = vrot.slane %v2120_v27, 2  ;;  %v5168_v38 = vmul.f32 -1.442695, %v7291_v12  ;;  %v7336_v27 = vld [vmem:[#allocation10] ss:$0 sm:$0xff] }
 0x168   : > { %5588 = vrcp.f32 %v7286_v22  ;;  %v7298_v45 = vadd.f32 1.0, %v5587_v13  ;;  %v7304_v59 = vmul.f32 %v6869_v55, %v1903_v11  ;;  %v7307_v47 = vmul.f32 %v6903_v20, %v1903_v11 }
 0x169   : > { %5590 = vpow2.f32 %v5167_v61  ;;  %v5149_v62 = vmul.f32 -1.442695, %v7295_v9  ;;  %v2173_v18 = vsel %vm2165_vm7, %v2171_v34, %v2172_v42  ;;  %v2266_v2 = vmul.f32 %v6867_v54, %v1903_v11 }
 0x16a   : > { %5592 = vpow2.f32 %v5148_v19  ;;  %v2224_v29 = vadd.f32 %v2173_v18, %v2102_v35  ;;  %v2023_v24 = vmul.f32 %v6836_v30, %v7189_v16  ;;  %v1250_v28 = vmul.f32 %v6702_v46, %v1209_v7 }
 0x16b   : > { %5594 = vrcp.f32 %v7298_v45  ;;  %v2013_v23 = vmul.f32 %v6836_v30, %v7170_v8  ;;  %v1231_v32 = vmul.f32 %v7318_v25, %v1162_v48  ;;  %v2332_v4 = vrot.slane %v7304_v59, 1 }
 0x16c   : > { %5596 = vpow2.f32 %v5168_v38  ;;  %v2439_v43 = vrot.slane %v7307_v47, 2  ;;  %v2175_v46 = vsel %vm2165_vm7, %v2172_v42, %v6933_v37  ;;  %v7327_v44 = vadd.f32 %v2266_v2, %v2224_v29 }
 0x16d   : > { %5598 = vpow2.f32 %v5149_v62  ;;  %v2103_v33 = vadd.f32 %v2064_v3, %v2013_v23  ;;  %v2113_v50 = vadd.f32 %v2079_v51, %v2023_v24  ;;  %vm1812_vm12 = vweird.f32 %v7286_v22 }
 0x16e   : > { %v7314_v6 = vpop.eup %5588  ;;  %v7339_v61 = vadd.f32 %v7336_v27, %v1250_v28  ;;  %v7345_v21 = vadd.f32 %v7336_v27, %v1231_v32  ;;  %v1816_v11 = vand.u32 2147483647, %v7286_v22  ;;  %v1818_v42 = vand.u32 2147483648, %v7286_v22 }
 0x16f   : > { %v5591_v0 = vpop.eup %5590  ;;  %v1808_v16 = vmul.f32 %v7314_v6, %v7286_v22  ;;  %vm1813_vm13 = vweird.f32 %v7314_v6  ;;  %v1531_v34 = vand.u32 2147483647, %v7298_v45  ;;  %v7352_v38 = vadd.f32 %v2175_v46, %v2103_v33 }
 0x170   : > { %v5593_v58 = vpop.eup %5592  ;;  %v7329_v8 = vadd.f32 1.0, %v5591_v0  ;;  %v2200_v62 = vsel %vm2165_vm7, %v2197_v56, %v6933_v37  ;;  %vm7361_vm14 = vmor %vm1812_vm12, %vm1813_vm13  ;;  %v1533_v48 = vand.u32 2147483648, %v7298_v45  ;;  %v5169_v2 = vmul.f32 -1.442695, %v7339_v61 }
 0x171   : > { %v5595_v1 = vpop.eup %5594  ;;  %v1809_v53 = vsub.f32 1.0, %v1808_v16  ;;  %v7334_v36 = vadd.f32 1.0, %v5593_v58  ;;  %v5150_v26 = vmul.f32 -1.442695, %v7345_v21  ;;  %vm7372_vm0 = vcmp.eq.f32.partialorder %v1816_v11, 8.507059e+37 }
 0x172   : > { %v5597_v19 = vpop.eup %5596  ;;  %v1523_v3 = vmul.f32 %v5595_v1, %v7298_v45  ;;  %5600 = vrcp.f32 %v7329_v8  ;;  %vm1528_vm15 = vweird.f32 %v5595_v1  ;;  %v1819_v22 = vor.u32 1.1754944e-38, %v1818_v42 }
 0x173   : > { %v5599_v51 = vpop.eup %5598  ;;  %v1810_v13 = vmul.f32 %v7314_v6, %v1809_v53  ;;  %5602 = vrcp.f32 %v7334_v36  ;;  %v7366_v29 = vadd.f32 1.0, %v5597_v19  ;;  %v7376_v23 = vadd.f32 %v2200_v62, %v2113_v50 }
 0x174   : > { %v1524_v35 = vsub.f32 1.0, %v1523_v3  ;;  %v7369_v28 = vadd.f32 1.0, %v5599_v51  ;;  %vm1527_vm1 = vweird.f32 %v7298_v45  ;;  %v1534_v58 = vor.u32 1.1754944e-38, %v1533_v48 }
 0x175   : > { %v1811_v7 = vadd.f32 %v7314_v6, %v1810_v13  ;;  %5604 = vrcp.f32 %v7366_v29  ;;  %vm1529_vm2 = vmor %vm1527_vm1, %vm1528_vm15  ;;  %v1831_v50 = vand.u32 2147483647, %v7329_v8  ;;  %vm1532_vm4 = vcmp.eq.f32.partialorder %v1531_v34, 8.507059e+37 }
 0x176   : > { %v1525_v24 = vmul.f32 %v5595_v1, %v1524_v35  ;;  %5606 = vrcp.f32 %v7369_v28  ;;  %vm1827_vm5 = vweird.f32 %v7329_v8  ;;  %v1833_v45 = vand.u32 2147483648, %v7329_v8 }
 0x177   : > { %v1815_v0 = vsel %vm7361_vm14, %v7314_v6, %v1811_v7  ;;  %5608 = vpow2.f32 %v5169_v2  ;;  %vm1542_vm6 = vweird.f32 %v7334_v36  ;;  %vm7395_vm9 = vcmp.eq.f32.partialorder %v1831_v50, 8.507059e+37 }
 0x178   : > { %v5601_v32 = vpop.eup %5600  ;;  %v1526_v16 = vadd.f32 %v5595_v1, %v1525_v24  ;;  %5610 = vpow2.f32 %v5150_v26  ;;  %v1820_v6 = vsel %vm7372_vm0, %v1819_v22, %v1815_v0  ;;  %v1546_v35 = vand.u32 2147483647, %v7334_v36 }
 0x179   : > { %v5603_v46 = vpop.eup %5602  ;;  %v1823_v33 = vmul.f32 %v5601_v32, %v7329_v8  ;;  %vm1828_vm8 = vweird.f32 %v5601_v32  ;;  %v1548_v34 = vand.u32 2147483648, %v7334_v36  ;;  %v1923_v7 = vmul.f32 %v1820_v6, %v7215_v17 }
 0x17a   : > { %v1530_v53 = vsel %vm1529_vm2, %v5595_v1, %v1526_v16  ;;  %v1538_v19 = vmul.f32 %v5603_v46, %v7334_v36  ;;  %v1848_v48 = vand.u32 2147483648, %v7366_v29  ;;  %vm1543_vm10 = vweird.f32 %v5603_v46  ;;  %vm7416_vm11 = vmor %vm1827_vm5, %vm1828_vm8 }
 0x17b   : > { %v1535_v3 = vsel %vm1532_vm4, %v1534_v58, %v1530_v53  ;;  %v1824_v13 = vsub.f32 1.0, %v1823_v33  ;;  %v7393_v42 = vpop.eup %5604  ;;  %v1834_v33 = vor.u32 1.1754944e-38, %v1833_v45  ;;  %vm1544_vm12 = vmor %vm1542_vm6, %vm1543_vm10  ;;  %vm1547_vm13 = vcmp.eq.f32.partialorder %v1546_v35, 8.507059e+37 }
 0x17c   : > { %v1904_v51 = vmul.f32 %v1535_v3, %v7206_v10  ;;  %v1539_v11 = vsub.f32 1.0, %v1538_v19  ;;  %v7401_v62 = vpop.eup %5606  ;;  %v1838_v26 = vmul.f32 %v7393_v42, %v7366_v29  ;;  %v1846_v19 = vand.u32 2147483647, %v7366_v29 }
 0x17d   : > { %v1825_v18 = vmul.f32 %v5601_v32, %v1824_v13  ;;  %v5609_v2 = vpop.eup %5608  ;;  %v1553_v56 = vmul.f32 %v7401_v62, %v7369_v28  ;;  %v1549_v13 = vor.u32 1.1754944e-38, %v1548_v34  ;;  %vm1842_vm14 = vweird.f32 %v7366_v29 }
 0x17e   : > { %v2300_v10 = vmul.f32 %v6869_v55, %v1904_v51  ;;  %v1540_v24 = vmul.f32 %v5603_v46, %v1539_v11  ;;  %v7410_v22 = vpop.eup %5610  ;;  %v2267_v0 = vmul.f32 %v6867_v54, %v1904_v51  ;;  %v1839_v53 = vsub.f32 1.0, %v1838_v26 }
 0x17f   : > { %v1826_v17 = vadd.f32 %v5601_v32, %v1825_v18  ;;  %v1554_v6 = vsub.f32 1.0, %v1553_v56  ;;  %v2390_v3 = vmul.f32 %v6903_v20, %v1904_v51  ;;  %v2309_v8 = vmul.f32 %v6869_v55, %v1923_v7 }
 0x180   : > { %v2333_v16 = vrot.slane %v2300_v10, 1  ;;  %v1541_v50 = vadd.f32 %v5603_v46, %v1540_v24  ;;  %v1849_v10 = vor.u32 1.1754944e-38, %v1848_v48  ;;  %v2283_v18 = vadd.f32 %v2267_v0, %v7352_v38  ;;  %v7442_v38 = vpop.f32.mrf.mxu0 }
 0x181   : > { %v1830_v11 = vsel %vm7416_vm11, %v5601_v32, %v1826_v17  ;;  %v1555_v35 = vmul.f32 %v7401_v62, %v1554_v6  ;;  %v1840_v26 = vmul.f32 %v7393_v42, %v1839_v53  ;;  %vm7437_vm15 = vcmp.eq.f32.partialorder %v1846_v19, 8.507059e+37 }
 0x182   : > { %v1545_v45 = vsel %vm1544_vm12, %v5603_v46, %v1541_v50  ;;  %v2334_v51 = vsel %vm2059_vm3, %v2332_v4, %v2333_v16  ;;  %v1835_v36 = vsel %vm7395_vm9, %v1834_v33, %v1830_v11  ;;  %vm1558_vm0 = vweird.f32 %v7401_v62 }
 0x183   : > { %v1924_v34 = vmul.f32 %v1835_v36, %v7273_v57  ;;  %v1550_v24 = vsel %vm1547_vm13, %v1549_v13, %v1545_v45  ;;  %v2440_v59 = vrot.slane %v2390_v3, 2  ;;  %v1556_v4 = vadd.f32 %v7401_v62, %v1555_v35 }
 0x184   : > { %vm1557_vm1 = vweird.f32 %v7369_v28  ;;  %v1563_v46 = vand.u32 2147483648, %v7369_v28  ;;  %v2371_v57 = vadd.f32 %v2334_v51, %v7327_v44  ;;  %vm1843_vm2 = vweird.f32 %v7393_v42 }
 0x185   : > { %v2310_v1 = vmul.f32 %v6869_v55, %v1924_v34  ;;  %v1561_v48 = vand.u32 2147483647, %v7369_v28  ;;  %v2276_v56 = vmul.f32 %v6867_v54, %v1923_v7  ;;  %v2404_v0 = vmul.f32 %v6903_v20, %v1923_v7  ;;  %vm7456_vm4 = vmor %vm1557_vm1, %vm1558_vm0 }
 0x186   : > { %v7454_v17 = vmul.f32 %v1550_v24, %v7276_v60  ;;  %v7460_v33 = vadd.f32 1.0, %v5609_v2  ;;  %v2347_v44 = vrot.slane %v2309_v8, 1  ;;  %v2372_v50 = vadd.f32 %v2333_v16, %v2283_v18  ;;  %vm7473_vm5 = vmor %vm1842_vm14, %vm1843_vm2 }
 0x187   : > { %v1841_v53 = vadd.f32 %v7393_v42, %v1840_v26  ;;  %v1560_v28 = vsel %vm7456_vm4, %v7401_v62, %v1556_v4  ;;  %v2441_v7 = vsel %vm2165_vm7, %v2439_v43, %v2440_v59  ;;  %v2277_v60 = vmul.f32 %v6867_v54, %v1924_v34 }
 0x188   : > { %v2405_v19 = vmul.f32 %v6903_v20, %v1924_v34  ;;  %v1564_v16 = vor.u32 1.1754944e-38, %v1563_v46  ;;  %v2443_v6 = vsel %vm2165_vm7, %v2440_v59, %v7002_v52  ;;  %v2492_v3 = vadd.f32 %v2441_v7, %v2371_v57 }
 0x189   : > { %v2348_v62 = vrot.slane %v2310_v1, 1  ;;  %vm1562_vm6 = vcmp.eq.f32.partialorder %v1561_v48, 8.507059e+37  ;;  %v2534_v47 = vmul.f32 %v7024_v63, %v7454_v17  ;;  %v2567_v43 = vmul.f32 %v6864_v49, %v7454_v17 }
 0x18a   : > { %v1565_v13 = vsel %vm1562_vm6, %v1564_v16, %v1560_v28  ;;  %5612 = vrcp.f32 %v7460_v33  ;;  %v2292_v29 = vadd.f32 %v2276_v56, %v7284_v31  ;;  %v2464_v8 = vrot.slane %v2404_v0, 2 }
 0x18b   : > { %v1845_v11 = vsel %vm7473_vm5, %v7393_v42, %v1841_v53  ;;  %v7489_v45 = vmul.f32 %v1565_v13, %v7295_v9  ;;  %v2493_v18 = vadd.f32 %v2443_v6, %v2372_v50  ;;  %v2293_v51 = vadd.f32 %v2277_v60, %v7376_v23  ;;  %v7501_v9 = vpop.f32.mrf.mxu0  ;;  %v1212_v60 = vpop.f32.mrf.mxu2 }
 0x18c   : > { %v2465_v36 = vrot.slane %v2405_v19, 2  ;;  %v2657_v35 = vmul.f32 %v6898_v15, %v7454_v17  ;;  %v2349_v34 = vsel %vm2059_vm3, %v2347_v44, %v2348_v62  ;;  %v2550_v26 = vadd.f32 %v2534_v47, %v2492_v3 }
 0x18d   : > { %v2535_v31 = vmul.f32 %v7024_v63, %v7489_v45  ;;  %v2568_v24 = vmul.f32 %v6864_v49, %v7489_v45  ;;  %v2658_v42 = vmul.f32 %v6898_v15, %v7489_v45  ;;  %v2600_v59 = vrot.slane %v2567_v43, 1 }
 0x18e   : > { %v1850_v23 = vsel %vm7437_vm15, %v1849_v10, %v1845_v11  ;;  %v7506_v1 = vadd.f32 1.0, %v7410_v22  ;;  %v2381_v56 = vadd.f32 %v2349_v34, %v2292_v29  ;;  %v2382_v0 = vadd.f32 %v2348_v62, %v2293_v51 }
 0x18f   : > { %v2551_v4 = vadd.f32 %v2535_v31, %v2493_v18  ;;  %v2601_v46 = vrot.slane %v2568_v24, 1  ;;  %v2708_v57 = vrot.slane %v2658_v42, 2  ;;  %v2466_v58 = vsel %vm2165_vm7, %v2464_v8, %v2465_v36 }
 0x190   : > { %v5613_v48 = vpop.eup %5612  ;;  %v2707_v44 = vrot.slane %v2657_v35, 2  ;;  %v7510_v50 = vmul.f32 %v1850_v23, %v7291_v12  ;;  %v2468_v32 = vsel %vm2165_vm7, %v2465_v36, %v7002_v52  ;;  %5614 = vrcp.f32 %v7506_v1 }
 0x191   : > { %v2602_v53 = vsel %vm2059_vm3, %v2600_v59, %v2601_v46  ;;  %v2640_v28 = vadd.f32 %v2601_v46, %v2551_v4  ;;  %v2711_v10 = vsel %vm2165_vm7, %v2708_v57, %v7051_v5  ;;  %v1853_v7 = vmul.f32 %v5613_v48, %v7460_v33 }
 0x192   : > { %v2639_v22 = vadd.f32 %v2602_v53, %v2550_v26  ;;  %v2709_v19 = vsel %vm2165_vm7, %v2707_v44, %v2708_v57  ;;  %vm1857_vm8 = vweird.f32 %v7460_v33  ;;  %v1863_v12 = vand.u32 2147483648, %v7460_v33 }
 0x193   : > { %v2761_v2 = vadd.f32 %v2711_v10, %v2640_v28  ;;  %v1854_v6 = vsub.f32 1.0, %v1853_v7  ;;  %vm1858_vm9 = vweird.f32 %v5613_v48  ;;  %v1861_v3 = vand.u32 2147483647, %v7460_v33  ;;  %v7536_v36 = vpop.f32.mrf.mxu0  ;;  %v1214_v53 = vpop.f32.mrf.mxu2 }
 0x194   : > { %v2760_v16 = vadd.f32 %v2709_v19, %v2639_v22  ;;  %v2502_v62 = vadd.f32 %v2466_v58, %v2381_v56  ;;  %v2544_v47 = vmul.f32 %v7024_v63, %v7510_v50  ;;  %v2577_v43 = vmul.f32 %v6864_v49, %v7510_v50  ;;  %vm7532_vm10 = vmor %vm1857_vm8, %vm1858_vm9 }
 0x195   : > { %2777 = vst [vmem:[#allocation3 + $0x18] sm:$0x7f] %v2761_v2  ;;  %v2672_v13 = vmul.f32 %v6898_v15, %v7510_v50  ;;  %v1855_v29 = vmul.f32 %v5613_v48, %v1854_v6  ;;  %v1251_v8 = vmul.f32 %v7318_v25, %v1212_v60  ;;  %v2503_v11 = vadd.f32 %v2468_v32, %v2382_v0 }
 0x196   : > { %2776 = vst [vmem:[#allocation3 + $0x10] sm:$0xff] %v2760_v16  ;;  %v1864_v51 = vor.u32 1.1754944e-38, %v1863_v12  ;;  %v7538_v35 = vpop.eup %5614  ;;  %vm1862_vm11 = vcmp.eq.f32.partialorder %v1861_v3, 8.507059e+37  ;;  %v1232_v24 = vmul.f32 %v7318_v25, %v7442_v38  ;;  %v2560_v42 = vadd.f32 %v2544_v47, %v2502_v62 }
 0x197   : > { %v1856_v34 = vadd.f32 %v5613_v48, %v1855_v29  ;;  %v7541_v31 = vadd.f32 %v7336_v27, %v1251_v8  ;;  %v2615_v26 = vrot.slane %v2577_v43, 1  ;;  %v1568_v33 = vmul.f32 %v7538_v35, %v7506_v1 }
 0x198   : > { %v2031_v59 = vmul.f32 %v6763_v40, %v7454_v17  ;;  %v2732_v23 = vrot.slane %v2672_v13, 2  ;;  %v7553_v46 = vmul.f32 %v6763_v40, %v7489_v45  ;;  %v1578_v0 = vand.u32 2147483648, %v7506_v1 }
 0x199   : > { %v1860_v4 = vsel %vm7532_vm10, %v5613_v48, %v1856_v34  ;;  %v5170_v57 = vmul.f32 -1.442695, %v7541_v31  ;;  %v1569_v38 = vsub.f32 1.0, %v1568_v33  ;;  %v7558_v58 = vadd.f32 %v7336_v27, %v1232_v24 }
 0x19a   : > { %v1865_v56 = vsel %vm1862_vm11, %v1864_v51, %v1860_v4  ;;  %vm1572_vm12 = vweird.f32 %v7506_v1  ;;  %v2014_v48 = vmul.f32 %v6836_v30, %v7454_v17  ;;  %v1576_v10 = vand.u32 2147483647, %v7506_v1 }
 0x19b   : > { %v7561_v44 = vmul.f32 %v1865_v56, %v7339_v61  ;;  %5616 = vpow2.f32 %v5170_v57  ;;  %v1570_v28 = vmul.f32 %v7538_v35, %v1569_v38  ;;  %v2066_v32 = vrot.slane %v2031_v59, 1  ;;  %v1172_v8 = vpop.f32.mrf.mxu0 }
 0x19c   : > { %v5151_v22 = vmul.f32 -1.442695, %v7558_v58  ;;  %v2067_v19 = vrot.slane %v7553_v46, 1  ;;  %v1579_v2 = vor.u32 1.1754944e-38, %v1578_v0  ;;  %v2124_v12 = vmul.f32 %v6808_v14, %v7489_v45 }
 0x19d   : > { %v2545_v7 = vmul.f32 %v7024_v63, %v7561_v44  ;;  %v2578_v61 = vmul.f32 %v6864_v49, %v7561_v44  ;;  %v2673_v60 = vmul.f32 %v6898_v15, %v7561_v44  ;;  %v1252_v16 = vmul.f32 %v7318_v25, %v1214_v53 }
 0x19e   : > { %5618 = vpow2.f32 %v5151_v22  ;;  %v2041_v47 = vmul.f32 %v6763_v40, %v7510_v50  ;;  %v1571_v43 = vadd.f32 %v7538_v35, %v1570_v28  ;;  %vm1573_vm13 = vweird.f32 %v7538_v35 }
 0x19f   : > { %v2561_v6 = vadd.f32 %v2545_v7, %v2503_v11  ;;  %v2616_v3 = vrot.slane %v2578_v61, 1  ;;  %v2733_v62 = vrot.slane %v2673_v60, 2  ;;  %v7585_v13 = vmul.f32 %v6763_v40, %v7561_v44  ;;  %vm7602_vm14 = vmor %vm1572_vm12, %vm1573_vm13 }
 0x1a0   : > { %v1233_v29 = vmul.f32 %v7318_v25, %v7501_v9  ;;  %v2123_v59 = vmul.f32 %v6808_v14, %v7454_v17  ;;  %v7598_v46 = vadd.f32 %v7336_v27, %v1252_v16  ;;  %v2177_v57 = vrot.slane %v2124_v12, 2 }
 0x1a1   : > { %v5617_v18 = vpop.eup %5616  ;;  %v2617_v11 = vsel %vm2059_vm3, %v2615_v26, %v2616_v3  ;;  %v2650_v51 = vadd.f32 %v2616_v3, %v2561_v6  ;;  %v2734_v34 = vsel %vm2165_vm7, %v2732_v23, %v2733_v62  ;;  %v2736_v24 = vsel %vm2165_vm7, %v2733_v62, %v7051_v5 }
 0x1a2   : > { %v2649_v33 = vadd.f32 %v2617_v11, %v2560_v42  ;;  %v7595_v4 = vadd.f32 1.0, %v5617_v18  ;;  %v2068_v23 = vsel %vm2059_vm3, %v2066_v32, %v2067_v19  ;;  %v2138_v42 = vmul.f32 %v6808_v14, %v7510_v50 }
 0x1a3   : > { %v2771_v9 = vadd.f32 %v2736_v24, %v2650_v51  ;;  %v1575_v38 = vsel %vm7602_vm14, %v7538_v35, %v1571_v43  ;;  %v7615_v1 = vmul.f32 %v6808_v14, %v7561_v44  ;;  %v2081_v0 = vrot.slane %v2041_v47, 1 }
 0x1a4   : > { %v5619_v56 = vpop.eup %5618  ;;  %v2770_v17 = vadd.f32 %v2734_v34, %v2649_v33  ;;  %5620 = vrcp.f32 %v7595_v4  ;;  %v2082_v53 = vrot.slane %v7585_v13, 1  ;;  %v2015_v28 = vmul.f32 %v6836_v30, %v7489_v45 }
 0x1a5   : > { %2787 = vst [vmem:[#allocation3 + $0x68] sm:$0x7f] %v2771_v9  ;;  %v7621_v32 = vadd.f32 %v7336_v27, %v1233_v29  ;;  %vm1577_vm15 = vcmp.eq.f32.partialorder %v1576_v10, 8.507059e+37  ;;  %v2104_v22 = vadd.f32 %v2068_v23, %v2014_v48  ;;  %v7623_v35 = vadd.f32 1.0, %v5619_v56  ;;  %v1174_v29 = vpop.f32.mrf.mxu0 }
 0x1a6   : > { %2786 = vst [vmem:[#allocation3 + $0x60] sm:$0xff] %v2770_v17  ;;  %v5171_v7 = vmul.f32 -1.442695, %v7598_v46  ;;  %v1580_v61 = vsel %vm1577_vm15, %v1579_v2, %v1575_v38  ;;  %v2176_v60 = vrot.slane %v2123_v59, 2  ;;  %v2024_v12 = vmul.f32 %v6836_v30, %v7510_v50 }
 0x1a7   : > { %v2105_v16 = vadd.f32 %v2067_v19, %v2015_v28  ;;  %v2201_v6 = vrot.slane %v2138_v42, 2  ;;  %v2202_v3 = vrot.slane %v7615_v1, 2  ;;  %5622 = vrcp.f32 %v7623_v35 }
 0x1a8   : > { %v2180_v45 = vsel %vm2165_vm7, %v2177_v57, %v6933_v37  ;;  %v2178_v48 = vsel %vm2165_vm7, %v2176_v60, %v2177_v57  ;;  %v2083_v10 = vsel %vm2059_vm3, %v2081_v0, %v2082_v53  ;;  %5624 = vpow2.f32 %v5171_v7 }
 0x1a9   : > { %v5152_v2 = vmul.f32 -1.442695, %v7621_v32  ;;  %v1907_v50 = vmul.f32 %v1580_v61, %v7345_v21  ;;  %v2226_v19 = vadd.f32 %v2178_v48, %v2104_v22  ;;  %v1234_v47 = vmul.f32 %v7318_v25, %v7536_v36 }
 0x1aa   : > { %v5621_v62 = vpop.eup %5620  ;;  %v1235_v43 = vmul.f32 %v7318_v25, %v1172_v8  ;;  %v1876_v11 = vand.u32 2147483647, %v7595_v4  ;;  %v7643_v51 = vadd.f32 %v2180_v45, %v2105_v16  ;;  %v2114_v34 = vadd.f32 %v2083_v10, %v2024_v12 }
 0x1ab   : > { %v1868_v18 = vmul.f32 %v5621_v62, %v7595_v4  ;;  %5626 = vpow2.f32 %v5152_v2  ;;  %v2203_v24 = vsel %vm2165_vm7, %v2201_v6, %v2202_v3  ;;  %v7647_v33 = vadd.f32 %v7336_v27, %v1234_v47 }
 0x1ac   : > { %v7650_v21 = vadd.f32 %v7336_v27, %v1235_v43  ;;  %vm1872_vm0 = vweird.f32 %v7595_v4  ;;  %vm1873_vm1 = vweird.f32 %v5621_v62  ;;  %v1236_v8 = vmul.f32 %v7318_v25, %v1174_v29 }
 0x1ad   : > { %v1869_v36 = vsub.f32 1.0, %v1868_v18  ;;  %v5623_v59 = vpop.eup %5622  ;;  %v2268_v9 = vmul.f32 %v6867_v54, %v1907_v50  ;;  %v7656_v26 = vmul.f32 %v6869_v55, %v1907_v50  ;;  %v1878_v23 = vand.u32 2147483648, %v7595_v4  ;;  %vm7668_vm4 = vmor %vm1872_vm0, %vm1873_vm1  ;;  %v1177_v18 = vpop.f32.mrf.mxu0 }
 0x1ae   : > { %v5153_v57 = vmul.f32 -1.442695, %v7647_v33  ;;  %v5625_v42 = vpop.eup %5624  ;;  %v7661_v56 = vmul.f32 %v6903_v20, %v1907_v50  ;;  %vm7663_vm2 = vcmp.eq.f32.partialorder %v1876_v11, 8.507059e+37  ;;  %v1583_v1 = vmul.f32 %v5623_v59, %v7623_v35 }
 0x1af   : > { %v1870_v17 = vmul.f32 %v5621_v62, %v1869_v36  ;;  %v7672_v28 = vadd.f32 1.0, %v5625_v42  ;;  %v2025_v4 = vmul.f32 %v6836_v30, %v7561_v44  ;;  %v5154_v22 = vmul.f32 -1.442695, %v7650_v21 }
 0x1b0   : > { %5628 = vpow2.f32 %v5153_v57  ;;  %v7677_v60 = vadd.f32 %v2203_v24, %v2114_v34  ;;  %v1584_v12 = vsub.f32 1.0, %v1583_v1  ;;  %v7680_v16 = vadd.f32 %v7336_v27, %v1236_v8 }
 0x1b1   : > { %v5627_v7 = vpop.eup %5626  ;;  %v1871_v61 = vadd.f32 %v5621_v62, %v1870_v17  ;;  %v1879_v6 = vor.u32 1.1754944e-38, %v1878_v23  ;;  %v1591_v45 = vand.u32 2147483647, %v7623_v35  ;;  %v1593_v48 = vand.u32 2147483648, %v7623_v35 }
 0x1b2   : > { %5630 = vrcp.f32 %v7672_v28  ;;  %v1585_v10 = vmul.f32 %v5623_v59, %v1584_v12  ;;  %vm1588_vm5 = vweird.f32 %v5623_v59  ;;  %v7687_v2 = vadd.f32 1.0, %v5627_v7 }
 0x1b3   : > { %v1875_v44 = vsel %vm7668_vm4, %v5621_v62, %v1871_v61  ;;  %v7689_v50 = vadd.f32 %v2268_v9, %v2226_v19  ;;  %vm1587_vm6 = vweird.f32 %v7623_v35  ;;  %v2115_v47 = vadd.f32 %v2082_v53, %v2025_v4 }
 0x1b4   : > { %5632 = vpow2.f32 %v5154_v22  ;;  %v1586_v43 = vadd.f32 %v5623_v59, %v1585_v10  ;;  %v2205_v29 = vsel %vm2165_vm7, %v2202_v3, %v6933_v37  ;;  %v5155_v62 = vmul.f32 -1.442695, %v7680_v16  ;;  %vm1589_vm8 = vmor %vm1587_vm6, %vm1588_vm5 }
 0x1b5   : > { %5634 = vrcp.f32 %v7687_v2  ;;  %v2335_v34 = vrot.slane %v7656_v26, 1  ;;  %v2444_v19 = vrot.slane %v7661_v56, 2  ;;  %v1880_v35 = vsel %vm7663_vm2, %v1879_v6, %v1875_v44 }
 0x1b6   : > { %v5629_v11 = vpop.eup %5628  ;;  %v1594_v13 = vor.u32 1.1754944e-38, %v1593_v48  ;;  %v1590_v53 = vsel %vm1589_vm8, %v5623_v59, %v1586_v43  ;;  %vm1592_vm9 = vcmp.eq.f32.partialorder %v1591_v45, 8.507059e+37  ;;  %v1891_v3 = vand.u32 2147483647, %v7672_v28 }
 0x1b7   : > { %v1893_v24 = vand.u32 2147483648, %v7672_v28  ;;  %v7705_v9 = vadd.f32 %v2205_v29, %v2115_v47  ;;  %v7707_v23 = vadd.f32 1.0, %v5629_v11  ;;  %v1237_v57 = vmul.f32 %v7318_v25, %v1177_v18 }
 0x1b8   : > { %v5631_v36 = vpop.eup %5630  ;;  %v1595_v8 = vsel %vm1592_vm9, %v1594_v13, %v1590_v53  ;;  %v1927_v42 = vmul.f32 %v1880_v35, %v7541_v31  ;;  %v7712_v17 = vmul.f32 0.0, %v7024_v63  ;;  %v7715_v59 = vmul.f32 0.0, %v6864_v49 }
 0x1b9   : > { %5636 = vpow2.f32 %v5155_v62  ;;  %v1908_v1 = vmul.f32 %v1595_v8, %v7558_v58  ;;  %v1883_v0 = vmul.f32 %v5631_v36, %v7672_v28  ;;  %vm1887_vm10 = vweird.f32 %v7672_v28 }
 0x1ba   : > { %v5633_v38 = vpop.eup %5632  ;;  %5638 = vrcp.f32 %v7707_v23  ;;  %vm7721_vm11 = vcmp.eq.f32.partialorder %v1891_v3, 8.507059e+37  ;;  %v1894_v31 = vor.u32 1.1754944e-38, %v1893_v24  ;;  %v1606_v7 = vand.u32 2147483647, %v7687_v2 }
 0x1bb   : > { %v5635_v4 = vpop.eup %5634  ;;  %v1608_v61 = vand.u32 2147483648, %v7687_v2  ;;  %v1884_v12 = vsub.f32 1.0, %v1883_v0  ;;  %vm1888_vm12 = vweird.f32 %v5631_v36  ;;  %v7729_v6 = vadd.f32 %v7336_v27, %v1237_v57 }
 0x1bc   : > { %v1598_v58 = vmul.f32 %v5635_v4, %v7687_v2  ;;  %v2278_v45 = vmul.f32 %v6867_v54, %v1927_v42  ;;  %v2311_v48 = vmul.f32 %v6869_v55, %v1927_v42  ;;  %v2407_v44 = vmul.f32 %v6903_v20, %v1927_v42  ;;  %vm7742_vm14 = vmor %vm1887_vm10, %vm1888_vm12 }
 0x1bd   : > { %vm1602_vm13 = vweird.f32 %v7687_v2  ;;  %v2302_v10 = vmul.f32 %v6869_v55, %v1908_v1  ;;  %v1885_v47 = vmul.f32 %v5631_v36, %v1884_v12  ;;  %v7736_v29 = vadd.f32 1.0, %v5633_v38 }
 0x1be   : > { %v1599_v43 = vsub.f32 1.0, %v1598_v58  ;;  %v2269_v18 = vmul.f32 %v6867_v54, %v1908_v1  ;;  %v2393_v11 = vmul.f32 %v6903_v20, %v1908_v1  ;;  %vm7746_vm15 = vcmp.eq.f32.partialorder %v1606_v7, 8.507059e+37 }
 0x1bf   : > { %v5637_v62 = vpop.eup %5636  ;;  %v1609_v53 = vor.u32 1.1754944e-38, %v1608_v61  ;;  %v1886_v24 = vadd.f32 %v5631_v36, %v1885_v47  ;;  %vm1603_vm0 = vweird.f32 %v5635_v4  ;;  %5640 = vrcp.f32 %v7736_v29 }
 0x1c0   : > { %v5639_v3 = vpop.eup %5638  ;;  %v1600_v8 = vmul.f32 %v5635_v4, %v1599_v43  ;;  %v2294_v57 = vadd.f32 %v2278_v45, %v7677_v60  ;;  %v2350_v42 = vrot.slane %v2311_v48, 1  ;;  %v2469_v38 = vrot.slane %v2407_v44, 2  ;;  %vm1604_vm1 = vmor %vm1602_vm13, %vm1603_vm0  ;;  %v7764_v44 = vpop.f32.mrf.mxu0 }
 0x1c1   : > { %v1613_v28 = vmul.f32 %v5639_v3, %v7707_v23  ;;  %v2336_v1 = vrot.slane %v2302_v10, 1  ;;  %v1890_v0 = vsel %vm7742_vm14, %v5631_v36, %v1886_v24  ;;  %v1623_v12 = vand.u32 2147483648, %v7707_v23 }
 0x1c2   : > { %v1601_v7 = vadd.f32 %v5635_v4, %v1600_v8  ;;  %v2285_v61 = vadd.f32 %v2269_v18, %v7643_v51  ;;  %v2445_v58 = vrot.slane %v2393_v11, 2  ;;  %v1895_v47 = vsel %vm7721_vm11, %v1894_v31, %v1890_v0 }
 0x1c3   : > { %v1614_v60 = vsub.f32 1.0, %v1613_v28  ;;  %v1928_v45 = vmul.f32 %v1895_v47, %v7598_v46  ;;  %vm1617_vm2 = vweird.f32 %v7707_v23  ;;  %v1621_v36 = vand.u32 2147483647, %v7707_v23 }
 0x1c4   : > { %v1605_v48 = vsel %vm1604_vm1, %v5635_v4, %v1601_v7  ;;  %vm1618_vm4 = vweird.f32 %v5639_v3  ;;  %v7768_v22 = vadd.f32 1.0, %v5637_v62  ;;  %v2337_v46 = vsel %vm2059_vm3, %v2335_v34, %v2336_v1 }
 0x1c5   : > { %v1610_v51 = vsel %vm7746_vm15, %v1609_v53, %v1605_v48  ;;  %v1615_v10 = vmul.f32 %v5639_v3, %v1614_v60  ;;  %v7770_v31 = vpop.eup %5640  ;;  %v2279_v2 = vmul.f32 %v6867_v54, %v1928_v45  ;;  %v2312_v4 = vmul.f32 %v6869_v55, %v1928_v45  ;;  %vm7787_vm5 = vmor %vm1617_vm2, %vm1618_vm4 }
 0x1c6   : > { %v2408_v43 = vmul.f32 %v6903_v20, %v1928_v45  ;;  %v2374_v18 = vadd.f32 %v2336_v1, %v2285_v61  ;;  %v2448_v11 = vsel %vm2165_vm7, %v2445_v58, %v7002_v52  ;;  %v1624_v13 = vor.u32 1.1754944e-38, %v1623_v12 }
 0x1c7   : > { %v1616_v35 = vadd.f32 %v5639_v3, %v1615_v10  ;;  %v2295_v62 = vadd.f32 %v2279_v2, %v7705_v9  ;;  %v2351_v53 = vrot.slane %v2312_v4, 1  ;;  %v7782_v26 = vmul.f32 %v1610_v51, %v7621_v32 }
 0x1c8   : > { %v2470_v24 = vrot.slane %v2408_v43, 2  ;;  %v2373_v8 = vadd.f32 %v2337_v46, %v7689_v50  ;;  %v1628_v9 = vmul.f32 %v7770_v31, %v7736_v29  ;;  %5642 = vrcp.f32 %v7768_v22 }
 0x1c9   : > { %v1620_v28 = vsel %vm7787_vm5, %v5639_v3, %v1616_v35  ;;  %v2352_v32 = vsel %vm2059_vm3, %v2350_v42, %v2351_v53  ;;  %v2384_v1 = vadd.f32 %v2351_v53, %v2295_v62  ;;  %v2618_v12 = vrot.slane %v7715_v59, 1 }
 0x1ca   : > { %v2471_v0 = vsel %vm2165_vm7, %v2469_v38, %v2470_v24  ;;  %v2473_v23 = vsel %vm2165_vm7, %v2470_v24, %v7002_v52  ;;  %v2383_v7 = vadd.f32 %v2352_v32, %v2294_v57  ;;  %vm1622_vm6 = vcmp.eq.f32.partialorder %v1621_v36, 8.507059e+37 }
 0x1cb   : > { %v5156_v50 = vmul.f32 -1.442695, %v7729_v6  ;;  %v2446_v3 = vsel %vm2165_vm7, %v2444_v19, %v2445_v58  ;;  %v2505_v61 = vadd.f32 %v2473_v23, %v2384_v1  ;;  %v2569_v42 = vmul.f32 %v6864_v49, %v7782_v26  ;;  %v1182_v58 = vpop.f32.mrf.mxu0 }
 0x1cc   : > { %v1625_v47 = vsel %vm1622_vm6, %v1624_v13, %v1620_v28  ;;  %v2494_v60 = vadd.f32 %v2446_v3, %v2373_v8  ;;  %v2495_v38 = vadd.f32 %v2448_v11, %v2374_v18  ;;  %v2504_v45 = vadd.f32 %v2471_v0, %v2383_v7 }
 0x1cd   : > { %v7809_v48 = vmul.f32 %v1625_v47, %v7647_v33  ;;  %v2563_v59 = vadd.f32 %v7712_v17, %v2505_v61  ;;  %v2536_v57 = vmul.f32 %v7024_v63, %v7782_v26  ;;  %v2660_v56 = vmul.f32 %v6898_v15, %v7782_v26 }
 0x1ce   : > { %v1629_v19 = vsub.f32 1.0, %v1628_v9  ;;  %v7816_v36 = vpop.eup %5642  ;;  %v2562_v51 = vadd.f32 %v7712_v17, %v2504_v45  ;;  %v2603_v4 = vrot.slane %v2569_v42, 1  ;;  %5644 = vpow2.f32 %v5156_v50 }
 0x1cf   : > { %v2537_v10 = vmul.f32 %v7024_v63, %v7809_v48  ;;  %v2570_v33 = vmul.f32 %v6864_v49, %v7809_v48  ;;  %v2661_v46 = vmul.f32 %v6898_v15, %v7809_v48  ;;  %v2652_v2 = vadd.f32 %v2618_v12, %v2563_v59 }
 0x1d0   : > { %v2651_v43 = vadd.f32 %v2618_v12, %v2562_v51  ;;  %v2552_v62 = vadd.f32 %v2536_v57, %v2494_v60  ;;  %v2712_v17 = vrot.slane %v2660_v56, 2  ;;  %v1630_v53 = vmul.f32 %v7770_v31, %v1629_v19 }
 0x1d1   : > { %v2553_v18 = vadd.f32 %v2537_v10, %v2495_v38  ;;  %v2604_v11 = vrot.slane %v2570_v33, 1  ;;  %v2713_v35 = vrot.slane %v2661_v46, 2  ;;  %v2773_v13 = vadd.f32 %v7051_v5, %v2652_v2 }
 0x1d2   : > { %v2772_v24 = vadd.f32 %v7051_v5, %v2651_v43  ;;  %v1643_v28 = vmul.f32 %v7816_v36, %v7768_v22  ;;  %v1636_v1 = vand.u32 2147483647, %v7736_v29  ;;  %v1638_v7 = vand.u32 2147483648, %v7736_v29 }
 0x1d3   : > { %v2605_v34 = vsel %vm2059_vm3, %v2603_v4, %v2604_v11  ;;  %v2642_v8 = vadd.f32 %v2604_v11, %v2553_v18  ;;  %2789 = vst [vmem:[#allocation3 + $0x78] sm:$0x7f] %v2773_v13  ;;  %v2716_v32 = vsel %vm2165_vm7, %v2713_v35, %v7051_v5  ;;  %v2714_v0 = vsel %vm2165_vm7, %v2712_v17, %v2713_v35  ;;  %v1184_v38 = vpop.f32.mrf.mxu0 }
 0x1d4   : > { %v2641_v9 = vadd.f32 %v2605_v34, %v2552_v62  ;;  %2788 = vst [vmem:[#allocation3 + $0x70] sm:$0xff] %v2772_v24  ;;  %v5645_v12 = vpop.eup %5644  ;;  %v1631_v3 = vadd.f32 %v7770_v31, %v1630_v53  ;;  %vm1633_vm8 = vweird.f32 %v7770_v31  ;;  %v1644_v61 = vsub.f32 1.0, %v1643_v28  ;;  %v7893_v28 = vld [vmem:[#allocation13] ss:$0 sm:$0xff] }
 0x1d5   : > { %v2763_v23 = vadd.f32 %v2716_v32, %v2642_v8  ;;  %vm1632_vm9 = vweird.f32 %v7736_v29  ;;  %vm7839_vm10 = vcmp.eq.f32.partialorder %v1636_v1, 8.507059e+37  ;;  %v2034_v47 = vmul.f32 %v6763_v40, %v7809_v48  ;;  %v2790_v32 = vld [vmem:[#allocation3] ss:$2 sm:$0xff] }
 0x1d6   : > { %v2762_v50 = vadd.f32 %v2714_v0, %v2641_v9  ;;  %v1653_v60 = vand.u32 2147483648, %v7768_v22  ;;  %v1639_v45 = vor.u32 1.1754944e-38, %v1638_v7  ;;  %v1645_v59 = vmul.f32 %v7816_v36, %v1644_v61  ;;  %vm7849_vm12 = vmor %vm1632_vm9, %vm1633_vm8 }
 0x1d7   : > { %2779 = vst [vmem:[#allocation3 + $0x28] sm:$0x7f] %v2763_v23  ;;  %vm1648_vm11 = vweird.f32 %v7816_v36  ;;  %v1651_v57 = vand.u32 2147483647, %v7768_v22  ;;  %v2033_v29 = vmul.f32 %v6763_v40, %v7782_v26  ;;  %vm1647_vm13 = vweird.f32 %v7768_v22 }
 0x1d8   : > { %2778 = vst [vmem:[#allocation3 + $0x20] sm:$0xff] %v2762_v50  ;;  %v7856_v19 = vadd.f32 1.0, %v5645_v12  ;;  %v1238_v51 = vmul.f32 %v7318_v25, %v7764_v44  ;;  %v1635_v10 = vsel %vm7849_vm12, %v7770_v31, %v1631_v3  ;;  %v1646_v33 = vadd.f32 %v7816_v36, %v1645_v59  ;;  %vm1649_vm14 = vmor %vm1647_vm13, %vm1648_vm11  ;;  %v7901_v50 = vld [vmem:[#allocation14] ss:$0 sm:$0xff] }
 0x1d9   : > { %v1239_v46 = vmul.f32 %v7318_v25, %v1182_v58  ;;  %v1240_v2 = vmul.f32 %v7318_v25, %v1184_v38  ;;  %v2070_v4 = vrot.slane %v2034_v47, 1  ;;  %v2127_v43 = vmul.f32 %v6808_v14, %v7809_v48 }
 0x1da   : > { %v1654_v22 = vor.u32 1.1754944e-38, %v1653_v60  ;;  %5646 = vrcp.f32 %v7856_v19  ;;  %v1650_v44 = vsel %vm1649_vm14, %v7816_v36, %v1646_v33  ;;  %vm1652_vm15 = vcmp.eq.f32.partialorder %v1651_v57, 8.507059e+37 }
 0x1db   : > { %v7871_v18 = vadd.f32 %v7336_v27, %v1238_v51  ;;  %v7874_v31 = vadd.f32 %v7336_v27, %v1239_v46  ;;  %v1640_v25 = vsel %vm7839_vm10, %v1639_v45, %v1635_v10  ;;  %v2069_v58 = vrot.slane %v2033_v29, 1 }
 0x1dc   : > { %v1655_v11 = vsel %vm1652_vm15, %v1654_v22, %v1650_v44  ;;  %v7879_v35 = vadd.f32 %v7336_v27, %v1240_v2  ;;  %v2126_v53 = vmul.f32 %v6808_v14, %v7782_v26  ;;  %v2182_v24 = vrot.slane %v2127_v43, 2 }
 0x1dd   : > { %v1912_v13 = vmul.f32 %v1655_v11, %v7680_v16  ;;  %v5157_v62 = vmul.f32 -1.442695, %v7871_v18  ;;  %v5158_v36 = vmul.f32 -1.442695, %v7874_v31  ;;  %v2071_v17 = vsel %vm2059_vm3, %v2069_v58, %v2070_v4 }
 0x1de   : > { %v5159_v34 = vmul.f32 -1.442695, %v7879_v35  ;;  %v1911_v8 = vmul.f32 %v1640_v25, %v7650_v21  ;;  %v2016_v27 = vmul.f32 %v6836_v30, %v7782_v26  ;;  %v2017_v16 = vmul.f32 %v6836_v30, %v7809_v48 }
 0x1df   : > { %5648 = vpow2.f32 %v5157_v62  ;;  %v2304_v23 = vmul.f32 %v6869_v55, %v1912_v13  ;;  %v2181_v12 = vrot.slane %v2126_v53, 2  ;;  %v2185_v21 = vsel %vm2165_vm7, %v2182_v24, %v6933_v37 }
 0x1e0   : > { %v5647_v9 = vpop.eup %5646  ;;  %5650 = vpow2.f32 %v5158_v36  ;;  %v2106_v1 = vadd.f32 %v2071_v17, %v2016_v27  ;;  %v2107_v0 = vadd.f32 %v2070_v4, %v2017_v16  ;;  %v2303_v26 = vmul.f32 %v6869_v55, %v1911_v8 }
 0x1e1   : > { %v1658_v7 = vmul.f32 %v5647_v9, %v7856_v19  ;;  %5652 = vpow2.f32 %v5159_v34  ;;  %v2809_v48 = vmul.f32 %v7893_v28, %v2790_v32  ;;  %v2183_v3 = vsel %vm2165_vm7, %v2181_v12, %v2182_v24  ;;  %v2800_v24 = vld [vmem:[#allocation3 + $0x50] ss:$2 sm:$0xff] }
 0x1e2   : > { %v2270_v61 = vmul.f32 %v6867_v54, %v1911_v8  ;;  %v2271_v42 = vmul.f32 %v6867_v54, %v1912_v13  ;;  %v2228_v38 = vadd.f32 %v2183_v3, %v2106_v1  ;;  %v2229_v45 = vadd.f32 %v2185_v21, %v2107_v0 }
 0x1e3   : > { %v1659_v47 = vsub.f32 1.0, %v1658_v7  ;;  %v2339_v59 = vrot.slane %v2304_v23, 1  ;;  %v2396_v57 = vmul.f32 %v6903_v20, %v1912_v13  ;;  %vm1663_vm0 = vweird.f32 %v5647_v9 }
 0x1e4   : > { %v1668_v51 = vand.u32 2147483648, %v7856_v19  ;;  %v2338_v33 = vrot.slane %v2303_v26, 1  ;;  %v1666_v46 = vand.u32 2147483647, %v7856_v19  ;;  %v7914_v4 = vadd.f32 %v7901_v50, %v2809_v48 }
 0x1e5   : > { %v5649_v60 = vpop.eup %5648  ;;  %v1660_v29 = vmul.f32 %v5647_v9, %v1659_v47  ;;  %v2287_v22 = vadd.f32 %v2271_v42, %v2229_v45  ;;  %vm1662_vm1 = vweird.f32 %v7856_v19  ;;  %v2395_v25 = vmul.f32 %v6903_v20, %v1911_v8  ;;  %v2792_v47 = vld [vmem:[#allocation3 + $0x10] ss:$2 sm:$0xff] }
 0x1e6   : > { %v5651_v56 = vpop.eup %5650  ;;  %v7908_v10 = vadd.f32 1.0, %v5649_v60  ;;  %v2340_v58 = vsel %vm2059_vm3, %v2338_v33, %v2339_v59  ;;  %v2450_v11 = vrot.slane %v2396_v57, 2  ;;  %vm1664_vm2 = vmor %vm1662_vm1, %vm1663_vm0  ;;  %v2286_v13 = vadd.f32 %v2270_v61, %v2228_v38 }
 0x1e7   : > { %v7911_v2 = vadd.f32 1.0, %v5651_v56  ;;  %v5653_v43 = vpop.eup %5652  ;;  %v1661_v44 = vadd.f32 %v5647_v9, %v1660_v29  ;;  %v1669_v36 = vor.u32 1.1754944e-38, %v1668_v51  ;;  %v7926_v53 = vmul.f32 %v6864_v49, %v6851_v39 }
 0x1e8   : > { %5654 = vrcp.f32 %v7908_v10  ;;  %v7922_v17 = vadd.f32 1.0, %v5653_v43  ;;  %v7930_v19 = vmul.f32 %v6898_v15, %v6851_v39  ;;  %vm1667_vm4 = vcmp.eq.f32.partialorder %v1666_v46, 8.507059e+37 }
 0x1e9   : > { %5656 = vrcp.f32 %v7911_v2  ;;  %v1665_v62 = vsel %vm1664_vm2, %v5647_v9, %v1661_v44  ;;  %v5172_v34 = vmul.f32 -1.442695, %v7914_v4  ;;  %v2375_v8 = vadd.f32 %v2340_v58, %v2286_v13  ;;  %v3017_v58 = vld [vmem:[%s10013_s6 + $0x70] sm:$0xff] }
 0x1ea   : > { %v2376_v27 = vadd.f32 %v2339_v59, %v2287_v22  ;;  %v1670_v16 = vsel %vm1667_vm4, %v1669_v36, %v1665_v62  ;;  %5658 = vrcp.f32 %v7922_v17  ;;  %v2449_v9 = vrot.slane %v2395_v25, 2  ;;  %v3018_v25 = vld [vmem:[%s10013_s6 + $0x78] sm:$0xff] }
 0x1eb   : > { %v2453_v32 = vsel %vm2165_vm7, %v2450_v11, %v7002_v52  ;;  %v1681_v1 = vand.u32 2147483647, %v7908_v10  ;;  %v1683_v0 = vand.u32 2147483648, %v7908_v10  ;;  %v1696_v7 = vand.u32 2147483647, %v7911_v2  ;;  %3020 = vmatpush.msra.mxu1 %v3018_v25 }
 0x1ec   : > { %v1698_v12 = vand.u32 2147483648, %v7911_v2  ;;  %v7942_v21 = vmul.f32 %v6864_v49, %v6854_v41  ;;  %v7945_v26 = vmul.f32 %v7893_v28, %v2800_v24  ;;  %v2451_v3 = vsel %vm2165_vm7, %v2449_v9, %v2450_v11 }
 0x1ed   : > { %v1913_v61 = vmul.f32 %v1670_v16, %v7729_v6  ;;  %5660 = vpow2.f32 %v5172_v34  ;;  %v2496_v60 = vadd.f32 %v2451_v3, %v2375_v8  ;;  %v7950_v38 = vadd.f32 %v2453_v32, %v2376_v27  ;;  %v3016_v16 = vld [vmem:[%s10013_s6 + $0x68] sm:$0xff]  ;;  %3021 = vmatpush.msra.mxu1 %v3017_v58 }
 0x1ee   : > { %v5655_v23 = vpop.eup %5654  ;;  %vm1677_vm5 = vweird.f32 %v7908_v10  ;;  %vm7954_vm6 = vcmp.eq.f32.partialorder %v1681_v1, 8.507059e+37  ;;  %v1684_v56 = vor.u32 1.1754944e-38, %v1683_v0  ;;  %vm1692_vm8 = vweird.f32 %v7911_v2 }
 0x1ef   : > { %v5657_v48 = vpop.eup %5656  ;;  %v1673_v42 = vmul.f32 %v5655_v23, %v7908_v10  ;;  %vm7961_vm9 = vcmp.eq.f32.partialorder %v1696_v7, 8.507059e+37  ;;  %v1699_v33 = vor.u32 1.1754944e-38, %v1698_v12  ;;  %v2810_v46 = vmul.f32 %v7893_v28, %v2792_v47  ;;  %3022 = vmatpush.msra.mxu1 %v3016_v16 }
 0x1f0   : > { %v1688_v45 = vmul.f32 %v5657_v48, %v7911_v2  ;;  %v7959_v6 = vpop.eup %5658  ;;  %v2538_v43 = vmul.f32 %v7024_v63, %v1913_v61  ;;  %vm1678_vm10 = vweird.f32 %v5655_v23  ;;  %v7976_v11 = vmul.f32 %v6864_v49, %v1913_v61 }
 0x1f1   : > { %v1674_v59 = vsub.f32 1.0, %v1673_v42  ;;  %v1703_v44 = vmul.f32 %v7959_v6, %v7922_v17  ;;  %v7979_v13 = vmul.f32 %v6898_v15, %v1913_v61  ;;  %vm1693_vm11 = vweird.f32 %v5657_v48  ;;  %vm1679_vm13 = vmor %vm1677_vm5, %vm1678_vm10  ;;  %v3015_v42 = vld [vmem:[%s10013_s6 + $0x60] sm:$0xff] }
 0x1f2   : > { %v1689_v29 = vsub.f32 1.0, %v1688_v45  ;;  %vm1707_vm12 = vweird.f32 %v7922_v17  ;;  %v2035_v34 = vmul.f32 %v6763_v40, %v1913_v61  ;;  %v7986_v8 = vmul.f32 %v6808_v14, %v1913_v61  ;;  %vm1694_vm14 = vmor %vm1692_vm8, %vm1693_vm11  ;;  %3023 = vmatpush.msra.mxu1 %v3015_v42 }
 0x1f3   : > { %v1675_v22 = vmul.f32 %v5655_v23, %v1674_v59  ;;  %v7982_v36 = vpop.eup %5660  ;;  %v1704_v27 = vsub.f32 1.0, %v1703_v44  ;;  %v1711_v32 = vand.u32 2147483647, %v7922_v17  ;;  %v1713_v1 = vand.u32 2147483648, %v7922_v17 }
 0x1f4   : > { %v1690_v62 = vmul.f32 %v5657_v48, %v1689_v29  ;;  %v7997_v0 = vadd.f32 %v7901_v50, %v2810_v46  ;;  %v2554_v7 = vadd.f32 %v2538_v43, %v2496_v60  ;;  %v2018_v3 = vmul.f32 %v6836_v30, %v1913_v61  ;;  %v3014_v46 = vld [vmem:[%s10013_s6 + $0x58] sm:$0xff]  ;;  %v2794_v43 = vld [vmem:[#allocation3 + $0x20] ss:$2 sm:$0xff] }
 0x1f5   : > { %v1676_v24 = vadd.f32 %v5655_v23, %v1675_v22  ;;  %v1705_v10 = vmul.f32 %v7959_v6, %v1704_v27  ;;  %v2606_v47 = vrot.slane %v7976_v11, 1  ;;  %v2717_v45 = vrot.slane %v7979_v13, 2  ;;  %3024 = vmatpush.msra.mxu1 %v3014_v46  ;;  %v3010_v46 = vld [vmem:[%s10013_s6 + $0x38] sm:$0xff] }
 0x1f6   : > { %v1691_v9 = vadd.f32 %v5657_v48, %v1690_v62  ;;  %v2072_v59 = vrot.slane %v2035_v34, 1  ;;  %v2186_v29 = vrot.slane %v7986_v8, 2  ;;  %vm1708_vm15 = vweird.f32 %v7959_v6 }
 0x1f7   : > { %v1680_v12 = vsel %vm1679_vm13, %v5655_v23, %v1676_v24  ;;  %v1706_v57 = vadd.f32 %v7959_v6, %v1705_v10  ;;  %vm8021_vm0 = vcmp.eq.f32.partialorder %v1711_v32, 8.507059e+37  ;;  %v1714_v25 = vor.u32 1.1754944e-38, %v1713_v1  ;;  %vm8040_vm1 = vmor %vm1707_vm12, %vm1708_vm15  ;;  %v3011_v1 = vld [vmem:[%s10013_s6 + $0x40] sm:$0xff] }
 0x1f8   : > { %v1685_v60 = vsel %vm7954_vm6, %v1684_v56, %v1680_v12  ;;  %v1695_v23 = vsel %vm1694_vm14, %v5657_v48, %v1691_v9  ;;  %v2811_v58 = vmul.f32 %v7893_v28, %v2794_v43  ;;  %v5173_v11 = vmul.f32 -1.442695, %v7997_v0  ;;  %v2802_v43 = vld [vmem:[#allocation3 + $0x60] ss:$2 sm:$0xff] }
 0x1f9   : > { %v1914_v2 = vmul.f32 %v1685_v60, %v7871_v18  ;;  %v1700_v61 = vsel %vm7961_vm9, %v1699_v33, %v1695_v23  ;;  %v1710_v27 = vsel %vm8040_vm1, %v7959_v6, %v1706_v57  ;;  %v3009_v57 = vld [vmem:[%s10013_s6 + $0x30] sm:$0xff]  ;;  %v8083_v48 = vadd.f32 %v7901_v50, %v7945_v26 }
 0x1fa   : > { %v1915_v22 = vmul.f32 %v1700_v61, %v7874_v31  ;;  %v3013_v31 = vld [vmem:[%s10013_s6 + $0x50] sm:$0xff]  ;;  %v1715_v6 = vsel %vm8021_vm0, %v1714_v25, %v1710_v27  ;;  %5662 = vpow2.f32 %v5173_v11  ;;  %v2540_v27 = vmul.f32 %v7024_v63, %v6851_v39 }
 0x1fb   : > { %v2539_v18 = vmul.f32 %v7024_v63, %v1914_v2  ;;  %v2572_v56 = vmul.f32 %v6864_v49, %v1914_v2  ;;  %v2664_v51 = vmul.f32 %v6898_v15, %v1914_v2  ;;  %v2036_v33 = vmul.f32 %v6763_v40, %v1914_v2  ;;  %3025 = vmatpush.msra.mxu1 %v3013_v31  ;;  %v2804_v26 = vld [vmem:[#allocation3 + $0x70] ss:$2 sm:$0xff] }
 0x1fc   : > { %v2130_v44 = vmul.f32 %v6808_v14, %v1914_v2  ;;  %v3012_v14 = vld [vmem:[%s10013_s6 + $0x48] sm:$0xff]  ;;  %v2272_v8 = vmul.f32 %v6867_v54, %v1915_v22  ;;  %v2398_v32 = vmul.f32 %v6903_v20, %v1915_v22  ;;  %v1916_v23 = vmul.f32 %v1715_v6, %v7879_v35 }
 0x1fd   : > { %v2555_v13 = vadd.f32 %v2539_v18, %v7950_v38  ;;  %v2607_v62 = vrot.slane %v2572_v56, 1  ;;  %v2718_v49 = vrot.slane %v2664_v51, 2  ;;  %v2073_v24 = vrot.slane %v2036_v33, 1  ;;  %3026 = vmatpush.msra.mxu1 %v3012_v14 }
 0x1fe   : > { %v2187_v34 = vrot.slane %v2130_v44, 2  ;;  %v2305_v38 = vmul.f32 %v6869_v55, %v1915_v22  ;;  %v2019_v61 = vmul.f32 %v6836_v30, %v1914_v2  ;;  %v8072_v22 = vadd.f32 %v7901_v50, %v2811_v58 }
 0x1ff   : > { %v2608_v17 = vsel %vm2059_vm3, %v2606_v47, %v2607_v62  ;;  %v2644_v16 = vadd.f32 %v2607_v62, %v2555_v13  ;;  %v2721_v9 = vsel %vm2165_vm7, %v2718_v49, %v7051_v5  ;;  %v2719_v10 = vsel %vm2165_vm7, %v2717_v45, %v2718_v49  ;;  %3027 = vmatpush.msra.mxu1 %v3011_v1  ;;  %v3007_v62 = vld [vmem:[%s10013_s6 + $0x20] sm:$0xff] }
 0x200   : > { %v2643_v12 = vadd.f32 %v2608_v17, %v2554_v7  ;;  %v2074_v42 = vsel %vm2059_vm3, %v2072_v59, %v2073_v24  ;;  %v2188_v45 = vsel %vm2165_vm7, %v2186_v29, %v2187_v34  ;;  %v2190_v59 = vsel %vm2165_vm7, %v2187_v34, %v6933_v37 }
 0x201   : > { %v2765_v47 = vadd.f32 %v2721_v9, %v2644_v16  ;;  %v2108_v60 = vadd.f32 %v2074_v42, %v2018_v3  ;;  %v2109_v35 = vadd.f32 %v2073_v24, %v2019_v61  ;;  %v2273_v30 = vmul.f32 %v6867_v54, %v1916_v23  ;;  %3028 = vmatpush.msra.mxu1 %v3010_v46 }
 0x202   : > { %v2764_v7 = vadd.f32 %v2719_v10, %v2643_v12  ;;  %v2306_v2 = vmul.f32 %v6869_v55, %v1916_v23  ;;  %v2399_v29 = vmul.f32 %v6903_v20, %v1916_v23  ;;  %v2815_v37 = vmul.f32 %v7893_v28, %v2802_v43  ;;  %v3008_v55 = vld [vmem:[%s10013_s6 + $0x28] sm:$0xff]  ;;  %v3003_v43 = vld [vmem:[%s10013_s6] sm:$0xff] }
 0x203   : > { %2781 = vst [vmem:[#allocation3 + $0x38] sm:$0x7f] %v2765_v47  ;;  %v2230_v3 = vadd.f32 %v2188_v45, %v2108_v60  ;;  %v2341_v18 = vrot.slane %v2305_v38, 1  ;;  %v2231_v56 = vadd.f32 %v2190_v59, %v2109_v35  ;;  %v5174_v51 = vmul.f32 -1.442695, %v8072_v22  ;;  %3029 = vmatpush.msra.mxu1 %v3009_v57 }
 0x204   : > { %2780 = vst [vmem:[#allocation3 + $0x30] sm:$0xff] %v2764_v7  ;;  %v2342_v54 = vrot.slane %v2306_v2, 1  ;;  %v2609_v33 = vrot.slane %v7926_v53, 1  ;;  %v2667_v20 = vmul.f32 %v6898_v15, %v6854_v41  ;;  %v2455_v44 = vrot.slane %v2399_v29, 2 }
 0x205   : > { %v2288_v31 = vadd.f32 %v2272_v8, %v2230_v3  ;;  %v2454_v25 = vrot.slane %v2398_v32, 2  ;;  %v2289_v58 = vadd.f32 %v2273_v30, %v2231_v56  ;;  %v2610_v13 = vrot.slane %v7942_v21, 1  ;;  %3030 = vmatpush.msra.mxu1 %v3008_v55  ;;  %v3006_v21 = vld [vmem:[%s10013_s6 + $0x18] sm:$0xff]  ;;  %v5663_v8 = vpop.eup %5662  ;;  %v3005_v32 = vld [vmem:[%s10013_s6 + $0x10] sm:$0xff] }
 0x206   : > { %v2343_v11 = vsel %vm2059_vm3, %v2341_v18, %v2342_v54  ;;  %v2458_v53 = vsel %vm2165_vm7, %v2455_v44, %v7002_v52  ;;  %v8100_v15 = vadd.f32 %v7901_v50, %v2815_v37  ;;  %v5177_v24 = vmul.f32 -1.442695, %v8083_v48 }
 0x207   : > { %v2377_v49 = vadd.f32 %v2343_v11, %v2288_v31  ;;  %v2378_v40 = vadd.f32 %v2342_v54, %v2289_v58  ;;  %v2456_v14 = vsel %vm2165_vm7, %v2454_v25, %v2455_v44  ;;  %v2816_v34 = vmul.f32 %v7893_v28, %v2804_v26  ;;  %3031 = vmatpush.msra.mxu1 %v3007_v62 }
 0x208   : > { %5664 = vpow2.f32 %v5174_v51  ;;  %v2722_v38 = vrot.slane %v7930_v19, 2  ;;  %v2723_v17 = vrot.slane %v2667_v20, 2  ;;  %v2541_v9 = vmul.f32 %v7024_v63, %v6854_v41  ;;  %v3004_v41 = vld [vmem:[%s10013_s6 + $0x8] sm:$0xff] }
 0x209   : > { %v2498_v52 = vadd.f32 %v2456_v14, %v2377_v49  ;;  %v2499_v16 = vadd.f32 %v2458_v53, %v2378_v40  ;;  %v8117_v12 = vadd.f32 1.0, %v7982_v36  ;;  %v2611_v19 = vsel %vm2059_vm3, %v2609_v33, %v2610_v13  ;;  %3032 = vmatpush.msra.mxu1 %v3006_v21 }
 0x20a   : > { %v5178_v42 = vmul.f32 -1.442695, %v8100_v15  ;;  %v8126_v63 = vadd.f32 %v7901_v50, %v2816_v34  ;;  %5666 = vpow2.f32 %v5177_v24  ;;  %v8128_v47 = vadd.f32 1.0, %v5663_v8 }
 0x20b   : > { %v2796_v1 = vld [vmem:[#allocation3 + $0x30] ss:$2 sm:$0xff]  ;;  %v2556_v10 = vadd.f32 %v2540_v27, %v2498_v52  ;;  %v2557_v6 = vadd.f32 %v2541_v9, %v2499_v16  ;;  %3033 = vmatpush.msra.mxu1 %v3005_v32  ;;  %v2724_v46 = vsel %vm2165_vm7, %v2722_v38, %v2723_v17  ;;  %5668 = vrcp.f32 %v8117_v12 }
 0x20c   : > { %v2812_v39 = vmul.f32 %v7893_v28, %v2796_v1  ;;  %v2726_v7 = vsel %vm2165_vm7, %v2723_v17, %v7051_v5  ;;  %5670 = vpow2.f32 %v5178_v42  ;;  %v5179_v35 = vmul.f32 -1.442695, %v8126_v63 }
 0x20d   : > { %v2645_v36 = vadd.f32 %v2611_v19, %v2556_v10  ;;  %v2646_v61 = vadd.f32 %v2610_v13, %v2557_v6  ;;  %3034 = vmatpush.msra.mxu1 %v3004_v41  ;;  %5672 = vrcp.f32 %v8128_v47  ;;  %v2870_v40 = vand.u32 2147483647, %v8117_v12 }
 0x20e   : > { %v8131_v60 = vadd.f32 %v7901_v50, %v2812_v39  ;;  %v5665_v23 = vpop.eup %5664  ;;  %vm2866_vm3 = vweird.f32 %v8117_v12  ;;  %v2885_v17 = vand.u32 2147483647, %v8128_v47  ;;  %v2887_v39 = vand.u32 2147483648, %v8128_v47 }
 0x20f   : > { %v2766_v45 = vadd.f32 %v2724_v46, %v2645_v36  ;;  %v2767_v3 = vadd.f32 %v2726_v7, %v2646_v61  ;;  %3035 = vmatpush.msra.mxu1 %v3003_v43  ;;  %v8143_v30 = vadd.f32 1.0, %v5665_v23  ;;  %vm8193_vm4 = vcmp.eq.f32.partialorder %v2870_v40, 8.507059e+37 }
 0x210   : > { %v5175_v59 = vmul.f32 -1.442695, %v8131_v60  ;;  %v5667_v2 = vpop.eup %5666  ;;  %vm2881_vm8 = vweird.f32 %v8128_v47  ;;  %vm8224_vm10 = vcmp.eq.f32.partialorder %v2885_v17, 8.507059e+37 }
 0x211   : > { %2782 = vst [vmem:[#allocation3 + $0x40] sm:$0xff] %v2766_v45  ;;  %v8145_v57 = vpop.eup %5668  ;;  %v8147_v29 = vadd.f32 1.0, %v5667_v2  ;;  %vm2896_vm14 = vweird.f32 %v8143_v30 }
 0x212   : > { %5674 = vpow2.f32 %v5175_v59  ;;  %2783 = vst [vmem:[#allocation3 + $0x48] sm:$0x7f] %v2767_v3  ;;  %v5671_v5 = vpop.eup %5670  ;;  %v2862_v55 = vmul.f32 %v8145_v57, %v8117_v12  ;;  %vm2867_vm2 = vweird.f32 %v8145_v57  ;;  %v2888_v3 = vor.u32 1.1754944e-38, %v2887_v39  ;;  %v3073_v39 = vld [vmem:[%s10033_s27 + $0x68] sm:$0xff] }
 0x213   : > { %5676 = vpow2.f32 %v5179_v35  ;;  %v8150_v37 = vpop.eup %5672  ;;  %v8158_v20 = vadd.f32 1.0, %v5671_v5  ;;  %vm8209_vm6 = vmor %vm2866_vm3, %vm2867_vm2  ;;  %v2945_v23 = vand.u32 2147483647, %v8147_v29  ;;  %v2947_v61 = vand.u32 2147483648, %v8147_v29 }
 0x214   : > { %5678 = vrcp.f32 %v8143_v30  ;;  %v2877_v31 = vmul.f32 %v8150_v37, %v8128_v47  ;;  %v2863_v58 = vsub.f32 1.0, %v2862_v55  ;;  %vm2882_vm5 = vweird.f32 %v8150_v37 }
 0x215   : > { %5680 = vrcp.f32 %v8147_v29  ;;  %vm8220_vm9 = vmor %vm2881_vm8, %vm2882_vm5  ;;  %v2900_v47 = vand.u32 2147483647, %v8143_v30  ;;  %v2902_v35 = vand.u32 2147483648, %v8143_v30  ;;  %vm2941_vm13 = vweird.f32 %v8147_v29 }
 0x216   : > { %v2878_v13 = vsub.f32 1.0, %v2877_v31  ;;  %v2864_v53 = vmul.f32 %v8145_v57, %v2863_v58  ;;  %vm2956_vm3 = vweird.f32 %v8158_v20 }
 0x217   : > { %vm8252_vm1 = vcmp.eq.f32.partialorder %v2900_v47, 8.507059e+37  ;;  %v5316_v47 = vld [vmem:[%s10043_s3 + $0x30] sm:$0xff] }
 0x218   : > { %v5675_v18 = vpop.eup %5674  ;;  %v2879_v14 = vmul.f32 %v8150_v37, %v2878_v13  ;;  %v2865_v52 = vadd.f32 %v8145_v57, %v2864_v53 }
 0x219   : > { %v8152_v56 = vadd.f32 1.0, %v5675_v18  ;;  %v2798_v54 = vld [vmem:[#allocation3 + $0x40] ss:$2 sm:$0xff]  ;;  %v5677_v51 = vpop.eup %5676 }
 0x21a   : > { %v2813_v33 = vmul.f32 %v7893_v28, %v2798_v54  ;;  %v8163_v44 = vpop.eup %5678  ;;  %v8168_v25 = vadd.f32 1.0, %v5677_v51  ;;  %v2880_v32 = vadd.f32 %v8150_v37, %v2879_v14  ;;  %v2869_v46 = vsel %vm8209_vm6, %v8145_v57, %v2865_v52  ;;  %v3074_v52 = vld [vmem:[%s10033_s27 + $0x70] sm:$0xff] }
 0x21b   : > { %5682 = vrcp.f32 %v8152_v56  ;;  %v2892_v28 = vmul.f32 %v8163_v44, %v8143_v30  ;;  %v8174_v62 = vpop.eup %5680  ;;  %vm2897_vm12 = vweird.f32 %v8163_v44  ;;  %v2917_v51 = vand.u32 2147483648, %v8152_v56 }
 0x21c   : > { %v8166_v26 = vadd.f32 %v7901_v50, %v2813_v33  ;;  %5684 = vrcp.f32 %v8158_v20  ;;  %v2872_v50 = vand.u32 2147483648, %v8117_v12  ;;  %v2937_v34 = vmul.f32 %v8174_v62, %v8147_v29  ;;  %vm8248_vm0 = vmor %vm2896_vm14, %vm2897_vm12  ;;  %v3072_v12 = vld [vmem:[%s10033_s27 + $0x60] sm:$0xff] }
 0x21d   : > { %v2893_v21 = vsub.f32 1.0, %v2892_v28  ;;  %vm2942_vm11 = vweird.f32 %v8174_v62  ;;  %v2884_v7 = vsel %vm8220_vm9, %v8150_v37, %v2880_v32  ;;  %vm2911_vm2 = vweird.f32 %v8152_v56 }
 0x21e   : > { %v5176_v11 = vmul.f32 -1.442695, %v8166_v26  ;;  %v2873_v27 = vor.u32 1.1754944e-38, %v2872_v50  ;;  %v2938_v42 = vsub.f32 1.0, %v2937_v34  ;;  %v2889_v18 = vsel %vm8224_vm10, %v2888_v3, %v2884_v7  ;;  %vm8300_vm12 = vmor %vm2941_vm13, %vm2942_vm11 }
 0x21f   : > { %v2894_v1 = vmul.f32 %v8163_v44, %v2893_v21  ;;  %v2915_v33 = vand.u32 2147483647, %v8152_v56  ;;  %v2960_v50 = vand.u32 2147483647, %v8158_v20  ;;  %v2918_v21 = vor.u32 1.1754944e-38, %v2917_v51  ;;  %v3068_v51 = vld [vmem:[%s10033_s27 + $0x40] sm:$0xff] }
 0x220   : > { %5686 = vpow2.f32 %v5176_v11  ;;  %v2939_v2 = vmul.f32 %v8174_v62, %v2938_v42  ;;  %v2874_v5 = vsel %vm8193_vm4, %v2873_v27, %v2869_v46  ;;  %v2903_v11 = vor.u32 1.1754944e-38, %v2902_v35 }
 0x221   : > { %v8176_v49 = vpop.eup %5682  ;;  %5688 = vrcp.f32 %v8168_v25  ;;  %v2895_v45 = vadd.f32 %v8163_v44, %v2894_v1  ;;  %v8276_v40 = vmul.f32 %v2874_v5, %v7914_v4  ;;  %v8282_v34 = vmul.f32 %v2889_v18, %v7997_v0  ;;  %v3075_v4 = vld [vmem:[%s10032_s4 + $0x78] sm:$0xff] }
 0x222   : > { %v2907_v24 = vmul.f32 %v8176_v49, %v8152_v56  ;;  %v8187_v8 = vpop.eup %5684  ;;  %vm2912_vm15 = vweird.f32 %v8176_v49  ;;  %v2940_v28 = vadd.f32 %v8174_v62, %v2939_v2  ;;  %v2962_v56 = vand.u32 2147483648, %v8158_v20  ;;  %3077 = vmatpush.msrb.mxu2 %v3075_v4 }
 0x223   : > { %v2952_v6 = vmul.f32 %v8187_v8, %v8158_v20  ;;  %v2899_v30 = vsel %vm8248_vm0, %v8163_v44, %v2895_v45  ;;  %vm8263_vm4 = vmor %vm2911_vm2, %vm2912_vm15  ;;  %vm2957_vm5 = vweird.f32 %v8187_v8  ;;  %vm2916_vm6 = vcmp.eq.f32.partialorder %v2915_v33, 8.507059e+37  ;;  %v3067_v33 = vld [vmem:[%s10033_s27 + $0x38] sm:$0xff]  ;;  %v3076_v20 = vld [vmem:[#allocation16] sm:$0x1] }
 0x224   : > { %v2908_v38 = vsub.f32 1.0, %v2907_v24  ;;  %v2904_v14 = vsel %vm8252_vm1, %v2903_v11, %v2899_v30  ;;  %vm2971_vm8 = vweird.f32 %v8168_v25  ;;  %v2944_v42 = vsel %vm8300_vm12, %v8174_v62, %v2940_v28  ;;  %vm8317_vm14 = vmor %vm2956_vm3, %vm2957_vm5  ;;  %3078 = vmatpush.msrb.mxu2 %v3074_v52  ;;  %v3061_v52 = vld [vmem:[%s10033_s27 + $0x8] sm:$0xff] }
 0x225   : > { %v2953_v57 = vsub.f32 1.0, %v2952_v6  ;;  %v8305_v1 = vmul.f32 %v2904_v14, %v8072_v22  ;;  %v2975_v41 = vand.u32 2147483647, %v8168_v25  ;;  %v2977_v22 = vand.u32 2147483648, %v8168_v25  ;;  %v3063_v14 = vld [vmem:[%s10033_s27 + $0x18] sm:$0xff] }
 0x226   : > { %v5687_v16 = vpop.eup %5686  ;;  %v2909_v36 = vmul.f32 %v8176_v49, %v2908_v38  ;;  %vm2946_vm0 = vcmp.eq.f32.partialorder %v2945_v23, 8.507059e+37  ;;  %vm8346_vm1 = vcmp.eq.f32.partialorder %v2960_v50, 8.507059e+37  ;;  %3079 = vmatpush.msrb.mxu2 %v3073_v39  ;;  %v3071_v23 = vld [vmem:[%s10033_s27 + $0x58] sm:$0xff] }
 0x227   : > { %v8200_v10 = vpop.eup %5688  ;;  %v8202_v19 = vadd.f32 1.0, %v5687_v16  ;;  %v2954_v53 = vmul.f32 %v8187_v8, %v2953_v57  ;;  %v2978_v3 = vor.u32 1.1754944e-38, %v2977_v22  ;;  %vm2976_vm2 = vcmp.eq.f32.partialorder %v2975_v41, 8.507059e+37  ;;  %v3070_v57 = vld [vmem:[%s10033_s27 + $0x50] sm:$0xff] }
 0x228   : > { %v2967_v59 = vmul.f32 %v8200_v10, %v8168_v25  ;;  %v2910_v37 = vadd.f32 %v8176_v49, %v2909_v36  ;;  %vm2972_vm9 = vweird.f32 %v8200_v10  ;;  %v2989_v36 = vadd.f32 %v8282_v34, %v8276_v40  ;;  %3080 = vmatpush.msrb.mxu2 %v3072_v12  ;;  %v5317_v12 = vld [vmem:[%s10043_s3 + $0x38] sm:$0xff] }
 0x229   : > { %5690 = vrcp.f32 %v8202_v19  ;;  %v2932_v17 = vand.u32 2147483648, %v8202_v19  ;;  %v2955_v0 = vadd.f32 %v8187_v8, %v2954_v53  ;;  %v2930_v9 = vand.u32 2147483647, %v8202_v19  ;;  %vm8331_vm13 = vmor %vm2971_vm8, %vm2972_vm9  ;;  %3193 = vmatpush.bf16.msra.mxu3 %v5317_v12 }
 0x22a   : > { %v2968_v31 = vsub.f32 1.0, %v2967_v59  ;;  %v2914_v44 = vsel %vm8263_vm4, %v8176_v49, %v2910_v37  ;;  %vm2926_vm11 = vweird.f32 %v8202_v19  ;;  %v2948_v25 = vor.u32 1.1754944e-38, %v2947_v61  ;;  %3081 = vmatpush.msrb.mxu2 %v3071_v23 }
 0x22b   : > { %v2919_v27 = vsel %vm2916_vm6, %v2918_v21, %v2914_v44  ;;  %vm2931_vm3 = vcmp.eq.f32.partialorder %v2930_v9, 8.507059e+37  ;;  %v2959_v7 = vsel %vm8317_vm14, %v8187_v8, %v2955_v0  ;;  %v2990_v45 = vadd.f32 %v2989_v36, %v8305_v1 }
 0x22c   : > { %v2969_v49 = vmul.f32 %v8200_v10, %v2968_v31  ;;  %v8336_v43 = vmul.f32 %v2919_v27, %v8131_v60  ;;  %v2949_v29 = vsel %vm2946_vm0, %v2948_v25, %v2944_v42  ;;  %v2963_v61 = vor.u32 1.1754944e-38, %v2962_v56  ;;  %3082 = vmatpush.msrb.mxu2 %v3070_v57  ;;  %v3066_v31 = vld [vmem:[%s10033_s27 + $0x30] sm:$0xff]  ;;  %v3064_v56 = vld [vmem:[%s10033_s27 + $0x20] sm:$0xff] }
 0x22d   : > { %v8370_v37 = vmul.f32 %v2949_v29, %v8083_v48  ;;  %v3060_v27 = vld [vmem:[%s10033_s27] sm:$0xff]  ;;  %3194 = vmatpush.bf16.msra.mxu3 %v5316_v47  ;;  %v5313_v29 = vld [vmem:[%s10043_s3 + $0x18] sm:$0xff] }
 0x22e   : > { %v2970_v62 = vadd.f32 %v8200_v10, %v2969_v49  ;;  %v2991_v8 = vadd.f32 %v2990_v45, %v8336_v43  ;;  %v2964_v5 = vsel %vm8346_vm1, %v2963_v61, %v2959_v7  ;;  %v3062_v49 = vld [vmem:[%s10033_s27 + $0x10] sm:$0xff]  ;;  %v5315_v7 = vld [vmem:[%s10043_s3 + $0x28] sm:$0xff]  ;;  %v5314_v45 = vld [vmem:[%s10043_s3 + $0x20] sm:$0xff] }
 0x22f   : > { %v5691_v58 = vpop.eup %5690  ;;  %v8377_v54 = vmul.f32 %v2964_v5, %v8100_v15  ;;  %v5312_v61 = vld [vmem:[%s10043_s3 + $0x10] sm:$0xff] }
 0x230   : > { %v2922_v24 = vmul.f32 %v5691_v58, %v8202_v19  ;;  %vm2927_vm10 = vweird.f32 %v5691_v58  ;;  %v2933_v19 = vor.u32 1.1754944e-38, %v2932_v17  ;;  %v2974_v35 = vsel %vm8331_vm13, %v8200_v10, %v2970_v62 }
 0x231   : > { %vm2928_vm15 = vmor %vm2926_vm11, %vm2927_vm10  ;;  %v2979_v10 = vsel %vm2976_vm2, %v2978_v3, %v2974_v35  ;;  %3195 = vmatpush.bf16.msra.mxu3 %v5315_v7 }
 0x232   : > { %v2923_v38 = vsub.f32 1.0, %v2922_v24  ;;  %v8384_v48 = vmul.f32 %v2979_v10, %v8126_v63  ;;  %v3065_v63 = vld [vmem:[%s10033_s27 + $0x28] sm:$0xff]  ;;  %v3019_v24 = vld [vmem:[%s10042_s23] sm:$0x1]  ;;  %s4888_s23 = sshll.u32 %s9781_s26, 4  ;;  %s4889_s23 = int_to_ptr.vmem [resolvable:$true] %s4888_s23 }
 0x233   : > { %v5310_v10 = vld [vmem:[%s10043_s3] sm:$0xff] }
 0x234   : > { %v2924_v16 = vmul.f32 %v5691_v58, %v2923_v38 }
 0x235   : > { %3196 = vmatpush.bf16.msra.mxu3 %v5314_v45 }
 0x236   : > { %v2925_v46 = vadd.f32 %v5691_v58, %v2924_v16 }
 0x238   : > { %v2929_v60 = vsel %vm2928_vm15, %v5691_v58, %v2925_v46 }
 0x239   : > { %v2934_v59 = vsel %vm2931_vm3, %v2933_v19, %v2929_v60  ;;  %3197 = vmatpush.bf16.msra.mxu3 %v5313_v29 }
 0x23a   : > { %v8361_v2 = vmul.f32 %v2934_v59, %v8166_v26  ;;  %v3069_v26 = vld [vmem:[%s10033_s27 + $0x48] sm:$0xff] }
 0x23b   : > { %3083 = vmatpush.msrb.mxu2 %v3069_v26 }
 0x23c   : > { %v2992_v18 = vadd.f32 %v2991_v8, %v8361_v2  ;;  %v5311_v8 = vld [vmem:[%s10043_s3 + $0x8] sm:$0xff] }
 0x23d   : > { %3084 = vmatpush.msrb.mxu2 %v3068_v51  ;;  %3198 = vmatpush.bf16.msra.mxu3 %v5312_v61  ;;  %v8495_v61 = vld [vmem:[#allocation20] ss:$0 sm:$0xff] }
 0x23e   : > { %v2993_v55 = vadd.f32 %v2992_v18, %v8370_v37 }
 0x23f   : > { %3085 = vmatpush.msrb.mxu2 %v3067_v33 }
 0x240   : > { %v2994_v30 = vadd.f32 %v2993_v55, %v8377_v54 }
 0x241   : > { %3086 = vmatpush.msrb.mxu2 %v3066_v31  ;;  %3199 = vmatpush.bf16.msra.mxu3 %v5311_v8 }
 0x242   : > { %v2995_v15 = vadd.f32 %v2994_v30, %v8384_v48 }
 0x243   : > { %3087 = vmatpush.msrb.mxu2 %v3065_v63 }
 0x244   : > { %v2996_v58 = vrot.slane %v2995_v15, 4 }
 0x245   : > { %3088 = vmatpush.msrb.mxu2 %v3064_v56  ;;  %3200 = vmatpush.bf16.msra.mxu3 %v5310_v10 }
 0x246   : > { %v2997_v11 = vadd.f32 %v2996_v58, %v2995_v15 }
 0x247   : > { %3089 = vmatpush.msrb.mxu2 %v3063_v14 }
 0x248   : > { %v2998_v13 = vrot.slane %v2997_v11, 2 }
 0x249   : > { %3090 = vmatpush.msrb.mxu2 %v3062_v49 }
 0x24a   : > { %v2999_v28 = vadd.f32 %v2998_v13, %v2997_v11 }
 0x24b   : > { %3091 = vmatpush.msrb.mxu2 %v3061_v52 }
 0x24c   : > { %v3000_v53 = vrot.slane %v2999_v28, 1 }
 0x24d   : > { %3092 = vmatpush.msrb.mxu2 %v3060_v27 }
 0x24e   : > { %v3001_v50 = vadd.f32 %v3000_v53, %v2999_v28  ;;  %v5325_v53 = vld [vmem:[%s9854_s14 + $0x38] sm:$0xff] }
 0x24f   : > { %3314 = vmatpush.bf16.msrb.mxu1 %v5325_v53 }
 0x250   : > { %v3002_v44 = vmul.f32 0.015625, %v3001_v50  ;;  %v5324_v50 = vld [vmem:[%s9854_s14 + $0x30] sm:$0xff] }
 0x252   : > { %3036 = vmatmul.f32.vlgmr.msra.gmra.mxu1 %v3002_v44 }
 0x253   : > { %3315 = vmatpush.bf16.msrb.mxu1 %v5324_v50 }
 0x2cf   : > { %v3037_v21 = vpop.f32.mrf.mxu1 }
 0x2d0   : > { %v3038_v38 = vadd.f32 %v3037_v21, %v3019_v24  ;;  %v5319_v21 = vld [vmem:[%s9854_s14 + $0x8] sm:$0xff] }
 0x2d2   : > { %v5180_v4 = vmul.f32 -1.442695, %v3038_v38 }
 0x2d4   : > { %5692 = vpow2.f32 %v5180_v4  ;;  %v5525_v4 = vld [vmem:[#allocation19] ss:$0 sm:$0xff] }
 0x2da   : > { %v5693_v17 = vpop.eup %5692 }
 0x2db   : > { %v3043_v0 = vadd.f32 1.0, %v5693_v17 }
 0x2dd   : > { %5694 = vrcp.f32 %v3043_v0  ;;  %v3055_v39 = vand.u32 2147483648, %v3043_v0  ;;  %v3053_v6 = vand.u32 2147483647, %v3043_v0  ;;  %vm3049_vm5 = vweird.f32 %v3043_v0 }
 0x2df   : > { %v3056_v22 = vor.u32 1.1754944e-38, %v3055_v39  ;;  %vm3054_vm8 = vcmp.eq.f32.partialorder %v3053_v6, 8.507059e+37 }
 0x2e3   : > { %v5695_v16 = vpop.eup %5694 }
 0x2e4   : > { %v3045_v9 = vmul.f32 %v5695_v16, %v3043_v0  ;;  %vm3050_vm4 = vweird.f32 %v5695_v16 }
 0x2e5   : > { %vm3051_vm6 = vmor %vm3049_vm5, %vm3050_vm4 }
 0x2e6   : > { %v3046_v32 = vsub.f32 1.0, %v3045_v9 }
 0x2e8   : > { %v3047_v42 = vmul.f32 %v5695_v16, %v3046_v32 }
 0x2ea   : > { %v3048_v41 = vadd.f32 %v5695_v16, %v3047_v42 }
 0x2ec   : > { %v3052_v36 = vsel %vm3051_vm6, %v5695_v16, %v3048_v41 }
 0x2ed   : > { %v3057_v46 = vsel %vm3054_vm8, %v3056_v22, %v3052_v36 }
 0x2ee   : > { %v3059_v62 = vmul.f32 %v3057_v46, %v3038_v38  ;;  %v5524_v38 = vld [vmem:[#allocation17] ss:$0 sm:$0xff] }
 0x2f0   : > { %3093 = vmatmul.f32.vlgmr.msrb.gmra.mxu2 %v3059_v62 }
 0x373   : > { %v3094_v19 = vpop.f32.mrf.mxu2 }
 0x374   : > { %v3095_v25 = vadd.f32 %v3094_v19, %v3076_v20 }
 0x376   : > { %v5181_v60 = vmul.f32 -1.442695, %v3095_v25 }
 0x378   : > { %5696 = vpow2.f32 %v5181_v60 }
 0x37e   : > { %v5697_v23 = vpop.eup %5696 }
 0x37f   : > { %v3100_v59 = vadd.f32 1.0, %v5697_v23 }
 0x381   : > { %5698 = vrcp.f32 %v3100_v59  ;;  %v3112_v5 = vand.u32 2147483648, %v3100_v59  ;;  %v3110_v26 = vand.u32 2147483647, %v3100_v59  ;;  %vm3106_vm10 = vweird.f32 %v3100_v59 }
 0x383   : > { %v3113_v51 = vor.u32 1.1754944e-38, %v3112_v5  ;;  %vm3111_vm14 = vcmp.eq.f32.partialorder %v3110_v26, 8.507059e+37 }
 0x387   : > { %v5699_v3 = vpop.eup %5698 }
 0x388   : > { %v3102_v35 = vmul.f32 %v5699_v3, %v3100_v59  ;;  %vm3107_vm9 = vweird.f32 %v5699_v3 }
 0x389   : > { %vm3108_vm12 = vmor %vm3106_vm10, %vm3107_vm9 }
 0x38a   : > { %v3103_v57 = vsub.f32 1.0, %v3102_v35 }
 0x38c   : > { %v3104_v18 = vmul.f32 %v5699_v3, %v3103_v57 }
 0x38e   : > { %v3105_v55 = vadd.f32 %v5699_v3, %v3104_v18 }
 0x390   : > { %v3109_v30 = vsel %vm3108_vm12, %v5699_v3, %v3105_v55  ;;  %v8497_v3 = vld [vmem:[#allocation22] ss:$0 sm:$0xff] }
 0x391   : > { %v3114_v33 = vsel %vm3111_vm14, %v3113_v51, %v3109_v30 }
 0x392   : > { %v3116_v15 = vperm.slane %v3114_v33, 0 }
 0x394   : > { %v3117_v31 = vmul.f32 %v3116_v15, %v8276_v40  ;;  %v3118_v58 = vmul.f32 %v3116_v15, %v8282_v34  ;;  %v3119_v11 = vmul.f32 %v3116_v15, %v8305_v1  ;;  %v3120_v13 = vmul.f32 %v3116_v15, %v8336_v43  ;;  %v5323_v40 = vld [vmem:[%s9854_s14 + $0x28] sm:$0xff]  ;;  %v5322_v43 = vld [vmem:[%s9854_s14 + $0x20] sm:$0xff] }
 0x395   : > { %v3121_v34 = vmul.f32 %v3116_v15, %v8361_v2  ;;  %v3122_v1 = vmul.f32 %v3116_v15, %v8370_v37  ;;  %3316 = vmatpush.bf16.msrb.mxu1 %v5323_v40  ;;  %v3123_v24 = vmul.f32 %v3116_v15, %v8377_v54  ;;  %v3124_v56 = vmul.f32 %v3116_v15, %v8384_v48  ;;  %v5321_v2 = vld [vmem:[%s9854_s14 + $0x18] sm:$0xff]  ;;  %v5320_v37 = vld [vmem:[%s9854_s14 + $0x10] sm:$0xff]  ;;  %v5318_v54 = vld [vmem:[%s9854_s14] sm:$0xff] }
 0x396   : > { %v3125_v63 = vpack.c.bf16 %v3118_v58, %v3117_v31  ;;  %v3126_v28 = vpack.c.bf16 %v3120_v13, %v3119_v11  ;;  %v3563_v40 = vld [vmem:[%s9857_s17] sm:$0x7] }
 0x397   : > { %v3127_v44 = vpack.c.bf16 %v3122_v1, %v3121_v34  ;;  %v3128_v14 = vpack.c.bf16 %v3124_v56, %v3123_v24 }
 0x398   : > { %3201 = vmatmul.bf16.vlgmr.msra.gmra.mxu3 %v3125_v63 }
 0x399   : > { %3317 = vmatpush.bf16.msrb.mxu1 %v5322_v43  ;;  %v8518_v43 = vperm.slane %v3563_v40, 1 }
 0x39d   : > { %3318 = vmatpush.bf16.msrb.mxu1 %v5321_v2 }
 0x3a1   : > { %3319 = vmatpush.bf16.msrb.mxu1 %v5320_v37 }
 0x3a5   : > { %3320 = vmatpush.bf16.msrb.mxu1 %v5319_v21 }
 0x3a8   : > { %3206 = vmatmul.bf16.gmra.mxu3 %v3126_v28 }
 0x3a9   : > { %3321 = vmatpush.bf16.msrb.mxu1 %v5318_v54  ;;  %v8527_v54 = vperm.slane %v3563_v40, 0 }
 0x3b8   : > { %3211 = vmatmul.bf16.gmra.mxu3 %v3127_v44 }
 0x3c8   : > { %3216 = vmatmul.bf16.gmra.mxu3 %v3128_v14 }
 0x41b   : > { %v3202_v48 = vpop.f32.mrf.mxu3 }
 0x41c   : > { %v3226_v49 = vmul.f32 %v5524_v38, %v3202_v48  ;;  %v3608_v48 = vmul.f32 0.0, %v8518_v43 }
 0x41e   : > { %v8471_v17 = vadd.f32 %v5525_v4, %v3226_v49 }
 0x420   : > { %10044 = vst [vmem:[#allocation46_spill] sm:$0xff] %v8471_v17 }
 0x423   : > { %v3204_v52 = vpop.f32.mrf.mxu3 }
 0x424   : > { %v3227_v27 = vmul.f32 %v5524_v38, %v3204_v52 }
 0x426   : > { %v8473_v0 = vadd.f32 %v5525_v4, %v3227_v27 }
 0x428   : > { %10045 = vst [vmem:[#allocation47_spill] sm:$0xff] %v8473_v0  ;;  %v3246_v16 = vpack.c.bf16 %v8473_v0, %v8471_v17 }
 0x42a   : > { %3322 = vmatmul.bf16.vlgmr.msrb.gmra.mxu1 %v3246_v16 }
 0x42b   : > { %v3207_v9 = vpop.f32.mrf.mxu3 }
 0x42c   : > { %v3228_v32 = vmul.f32 %v5524_v38, %v3207_v9 }
 0x42e   : > { %v8477_v6 = vadd.f32 %v5525_v4, %v3228_v32  ;;  %v8537_v32 = vmul.f32 0.0, %v8527_v54 }
 0x430   : > { %10046 = vst [vmem:[#allocation48_spill] sm:$0xff] %v8477_v6 }
 0x433   : > { %v3209_v39 = vpop.f32.mrf.mxu3 }
 0x434   : > { %v3229_v42 = vmul.f32 %v5524_v38, %v3209_v39  ;;  %v3624_v39 = vrot.slane %v3608_v48, 1 }
 0x436   : > { %v8479_v41 = vadd.f32 %v5525_v4, %v3229_v42 }
 0x438   : > { %10047 = vst [vmem:[#allocation49_spill] sm:$0xff] %v8479_v41  ;;  %v3247_v22 = vpack.c.bf16 %v8479_v41, %v8477_v6 }
 0x43a   : > { %3327 = vmatmul.bf16.gmra.mxu1 %v3247_v22  ;;  %v3564_v22 = vld [vmem:[%s9857_s17 + $0x4] sm:$0x7] }
 0x43b   : > { %v3212_v36 = vpop.f32.mrf.mxu3 }
 0x43c   : > { %v3230_v46 = vmul.f32 %v5524_v38, %v3212_v36 }
 0x43e   : > { %v8483_v12 = vadd.f32 %v5525_v4, %v3230_v46 }
 0x440   : > { %10048 = vst [vmem:[#allocation50_spill] sm:$0xff] %v8483_v12 }
 0x443   : > { %v3214_v62 = vpop.f32.mrf.mxu3 }
 0x444   : > { %v3231_v20 = vmul.f32 %v5524_v38, %v3214_v62 }
 0x446   : > { %v8485_v19 = vadd.f32 %v5525_v4, %v3231_v20 }
 0x448   : > { %10049 = vst [vmem:[#allocation51_spill] sm:$0xff] %v8485_v19  ;;  %v3248_v25 = vpack.c.bf16 %v8485_v19, %v8483_v12  ;;  %v4572_v19 = vld [vmem:[%s9860_s20 + $0x68] sm:$0xff] }
 0x44a   : > { %3332 = vmatmul.bf16.gmra.mxu1 %v3248_v25  ;;  %v3640_v25 = vadd.f32 %v3624_v39, %v8537_v32 }
 0x44b   : > { %v3217_v47 = vpop.f32.mrf.mxu3 }
 0x44c   : > { %v3232_v60 = vmul.f32 %v5524_v38, %v3217_v47 }
 0x44e   : > { %v8489_v23 = vadd.f32 %v5525_v4, %v3232_v60  ;;  %v8549_v60 = vperm.slane %v3564_v22, 0 }
 0x450   : > { %10050 = vst [vmem:[#allocation52_spill] sm:$0xff] %v8489_v23 }
 0x453   : > { %v3219_v7 = vpop.f32.mrf.mxu3 }
 0x454   : > { %v3233_v45 = vmul.f32 %v5524_v38, %v3219_v7  ;;  %v8530_v38 = vperm.slane %v3563_v40, 2 }
 0x456   : > { %v8491_v59 = vadd.f32 %v5525_v4, %v3233_v45  ;;  %v3657_v42 = vmul.f32 0.0, %v8530_v38  ;;  %v8552_v45 = vperm.slane %v3564_v22, 1 }
 0x458   : > { %10051 = vst [vmem:[#allocation53_spill] sm:$0xff] %v8491_v59  ;;  %v3249_v29 = vpack.c.bf16 %v8491_v59, %v8489_v23  ;;  %v8547_v47 = vrot.slane %v3657_v42, 2 }
 0x45a   : > { %3337 = vmatmul.bf16.gmra.mxu1 %v3249_v29  ;;  %v8554_v29 = vperm.slane %v3564_v22, 2 }
 0x4a7   : > { %v3323_v35 = vpop.f32.mrf.mxu1 }
 0x4a8   : > { %v3347_v8 = vmul.f32 %v8495_v61, %v3323_v35 }
 0x4aa   : > { %v3359_v57 = vadd.f32 %v8497_v3, %v3347_v8 }
 0x4ac   : > { %v5246_v5 = vmul.f32 -1.442695, %v3359_v57 }
 0x4ae   : > { %5700 = vpow2.f32 %v5246_v5 }
 0x4af   : > { %v3325_v18 = vpop.f32.mrf.mxu1 }
 0x4b0   : > { %v3348_v10 = vmul.f32 %v8495_v61, %v3325_v18 }
 0x4b2   : > { %v8503_v51 = vadd.f32 %v8497_v3, %v3348_v10  ;;  %v3729_v10 = vadd.f32 %v8547_v47, %v3640_v25 }
 0x4b4   : > { %v5701_v26 = vpop.eup %5700  ;;  %v5247_v30 = vmul.f32 -1.442695, %v8503_v51 }
 0x4b5   : > { %v3391_v55 = vadd.f32 1.0, %v5701_v26 }
 0x4b7   : > { %5702 = vrcp.f32 %v3391_v55  ;;  %v3328_v15 = vpop.f32.mrf.mxu1  ;;  %v3410_v14 = vand.u32 2147483648, %v3391_v55  ;;  %vm3404_vm13 = vweird.f32 %v3391_v55  ;;  %v3408_v37 = vand.u32 2147483647, %v3391_v55 }
 0x4b8   : > { %5704 = vpow2.f32 %v5247_v30  ;;  %v3349_v58 = vmul.f32 %v8495_v61, %v3328_v15 }
 0x4b9   : > { %v3411_v52 = vor.u32 1.1754944e-38, %v3410_v14  ;;  %vm3409_vm0 = vcmp.eq.f32.partialorder %v3408_v37, 8.507059e+37 }
 0x4ba   : > { %v8508_v11 = vadd.f32 %v8497_v3, %v3349_v58  ;;  %v3853_v58 = vmul.f32 0.0, %v8554_v29 }
 0x4bc   : > { %v5248_v53 = vmul.f32 -1.442695, %v8508_v11 }
 0x4bd   : > { %v5703_v33 = vpop.eup %5702 }
 0x4be   : > { %v3400_v31 = vmul.f32 %v5703_v33, %v3391_v55  ;;  %v5705_v63 = vpop.eup %5704  ;;  %vm3405_vm11 = vweird.f32 %v5703_v33  ;;  %v8567_v55 = vmul.f32 0.0, %v8549_v60 }
 0x4bf   : > { %v8510_v28 = vadd.f32 1.0, %v5705_v63  ;;  %v3330_v34 = vpop.f32.mrf.mxu1  ;;  %vm3406_vm15 = vmor %vm3404_vm13, %vm3405_vm11 }
 0x4c0   : > { %v3401_v13 = vsub.f32 1.0, %v3400_v31  ;;  %v3350_v1 = vmul.f32 %v8495_v61, %v3330_v34 }
 0x4c1   : > { %5706 = vrcp.f32 %v8510_v28  ;;  %v3425_v5 = vand.u32 2147483648, %v8510_v28  ;;  %vm3419_vm3 = vweird.f32 %v8510_v28  ;;  %v3423_v30 = vand.u32 2147483647, %v8510_v28 }
 0x4c2   : > { %5708 = vpow2.f32 %v5248_v53  ;;  %v3402_v50 = vmul.f32 %v5703_v33, %v3401_v13  ;;  %v8523_v2 = vadd.f32 %v8497_v3, %v3350_v1 }
 0x4c3   : > { %v3426_v1 = vor.u32 1.1754944e-38, %v3425_v5  ;;  %vm3424_vm4 = vcmp.eq.f32.partialorder %v3423_v30, 8.507059e+37 }
 0x4c4   : > { %v3403_v24 = vadd.f32 %v5703_v33, %v3402_v50  ;;  %v5249_v16 = vmul.f32 -1.442695, %v8523_v2 }
 0x4c6   : > { %v3407_v4 = vsel %vm3406_vm15, %v5703_v33, %v3403_v24  ;;  %v8574_v33 = vld [vmem:[%s9857_s17 + $0x8] sm:$0x7] }
 0x4c7   : > { %v8520_v44 = vpop.eup %5706  ;;  %v3412_v9 = vsel %vm3409_vm0, %v3411_v52, %v3407_v4  ;;  %v3333_v62 = vpop.f32.mrf.mxu1  ;;  %v8594_v14 = vperm.slane %v8574_v33, 0 }
 0x4c8   : > { %v5709_v56 = vpop.eup %5708  ;;  %v3415_v21 = vmul.f32 %v8520_v44, %v8510_v28  ;;  %v3519_v46 = vmul.f32 %v3412_v9, %v3359_v57  ;;  %v3351_v7 = vmul.f32 %v8495_v61, %v3333_v62  ;;  %vm3420_vm1 = vweird.f32 %v8520_v44 }
 0x4c9   : > { %v8532_v49 = vadd.f32 1.0, %v5709_v56  ;;  %vm8579_vm2 = vmor %vm3419_vm3, %vm3420_vm1  ;;  %v3786_v56 = vadd.f32 %v8567_v55, %v3729_v10 }
 0x4ca   : > { %v3416_v27 = vsub.f32 1.0, %v3415_v21  ;;  %v8559_v8 = vadd.f32 %v8497_v3, %v3351_v7  ;;  %v3609_v57 = vmul.f32 %v8518_v43, %v3519_v46  ;;  %v3659_v15 = vmul.f32 %v8530_v38, %v3519_v46 }
 0x4cb   : > { %5710 = vrcp.f32 %v8532_v49  ;;  %v3803_v31 = vmul.f32 %v8552_v45, %v3519_v46  ;;  %v3771_v53 = vmul.f32 %v8549_v60, %v3519_v46  ;;  %v3852_v28 = vmul.f32 %v8554_v29, %v3519_v46 }
 0x4cc   : > { %v3417_v36 = vmul.f32 %v8520_v44, %v3416_v27  ;;  %5712 = vpow2.f32 %v5249_v16  ;;  %v5250_v40 = vmul.f32 -1.442695, %v8559_v8  ;;  %v3625_v34 = vrot.slane %v3609_v57, 1 }
 0x4cd   : > { %v3819_v21 = vrot.slane %v3803_v31, 1  ;;  %v3787_v52 = vadd.f32 %v3771_v53, %v3729_v10  ;;  %v3884_v27 = vrot.slane %v3852_v28, 2  ;;  %v8597_v16 = vrot.slane %v3853_v58, 2 }
 0x4ce   : > { %v3418_v35 = vadd.f32 %v8520_v44, %v3417_v36  ;;  %v3642_v9 = vadd.f32 %v3625_v34, %v8537_v32  ;;  %v3594_v22 = vmul.f32 %v8527_v54, %v3519_v46  ;;  %v8611_v7 = vmul.f32 0.0, %v8594_v14 }
 0x4cf   : > { %v3335_v37 = vpop.f32.mrf.mxu1  ;;  %v3835_v25 = vadd.f32 %v3819_v21, %v3786_v56  ;;  %vm3434_vm6 = vweird.f32 %v8532_v49  ;;  %v3438_v31 = vand.u32 2147483647, %v8532_v49  ;;  %v3440_v58 = vand.u32 2147483648, %v8532_v49 }
 0x4d0   : > { %v3422_v50 = vsel %vm8579_vm2, %v8520_v44, %v3418_v35  ;;  %v3352_v4 = vmul.f32 %v8495_v61, %v3335_v37  ;;  %v3692_v44 = vrot.slane %v3659_v15, 2  ;;  %v3643_v57 = vadd.f32 %v3625_v34, %v3594_v22 }
 0x4d1   : > { %v8544_v20 = vpop.eup %5710  ;;  %v3427_v48 = vsel %vm3424_vm4, %v3426_v1, %v3422_v50  ;;  %v3924_v53 = vadd.f32 %v3884_v27, %v3835_v25  ;;  %vm3439_vm9 = vcmp.eq.f32.partialorder %v3438_v31, 8.507059e+37 }
 0x4d2   : > { %v3430_v18 = vmul.f32 %v8544_v20, %v8532_v49  ;;  %v5713_v26 = vpop.eup %5712  ;;  %v8602_v42 = vadd.f32 %v8497_v3, %v3352_v4  ;;  %v8606_v36 = vmul.f32 %v3427_v48, %v8503_v51  ;;  %v3694_v5 = vsel %vm2165_vm7, %v3692_v44, %v8547_v47 }
 0x4d3   : > { %v8583_v13 = vadd.f32 1.0, %v5713_v26  ;;  %v3886_v26 = vsel %vm2165_vm7, %v3884_v27, %v8597_v16  ;;  %v3731_v10 = vadd.f32 %v3692_v44, %v3642_v9  ;;  %vm3435_vm5 = vweird.f32 %v8544_v20 }
 0x4d4   : > { %v3431_v24 = vsub.f32 1.0, %v3430_v18  ;;  %10054 = vst [vmem:[#allocation54_spill] sm:$0xff] %v8606_v36  ;;  %v5251_v35 = vmul.f32 -1.442695, %v8602_v42  ;;  %v3836_v18 = vadd.f32 %v3819_v21, %v3787_v52  ;;  %v3610_v15 = vmul.f32 %v8518_v43, %v8606_v36  ;;  %vm8633_vm8 = vmor %vm3434_vm6, %vm3435_vm5 }
 0x4d5   : > { %5714 = vrcp.f32 %v8583_v13  ;;  %v3661_v1 = vmul.f32 %v8530_v38, %v8606_v36  ;;  %v8639_v49 = vadd.f32 %v8567_v55, %v3731_v10  ;;  %v3441_v4 = vor.u32 1.1754944e-38, %v3440_v58 }
 0x4d6   : > { %5716 = vpow2.f32 %v5250_v40  ;;  %v3432_v39 = vmul.f32 %v8544_v20, %v3431_v24  ;;  %v3732_v40 = vadd.f32 %v3694_v5, %v3643_v57  ;;  %v8629_v34 = vadd.f32 %v3886_v26, %v3836_v18 }
 0x4d7   : > { %v3338_v63 = vpop.f32.mrf.mxu1  ;;  %5718 = vpow2.f32 %v5251_v35  ;;  %v3626_v48 = vrot.slane %v3610_v15, 1  ;;  %v8650_v52 = vadd.f32 %v8611_v7, %v3924_v53  ;;  %v3596_v27 = vmul.f32 %v8527_v54, %v8606_v36 }
 0x4d8   : > { %v3433_v51 = vadd.f32 %v8544_v20, %v3432_v39  ;;  %10055 = vst [vmem:[#allocation55_spill] sm:$0xff] %v8629_v34  ;;  %v3353_v56 = vmul.f32 %v8495_v61, %v3338_v63  ;;  %v3455_v22 = vand.u32 2147483648, %v8583_v13  ;;  %v3773_v57 = vmul.f32 %v8549_v60, %v8606_v36 }
 0x4d9   : > { %10058 = vst [vmem:[#allocation56_spill] sm:$0xff] %v8650_v52  ;;  %v8662_v5 = vmul.f32 %v8552_v45, %v8606_v36  ;;  %vm3449_vm12 = vweird.f32 %v8583_v13  ;;  %v3453_v18 = vand.u32 2147483647, %v8583_v13  ;;  %v3644_v26 = vadd.f32 %v3626_v48, %v8537_v32 }
 0x4da   : > { %v3437_v37 = vsel %vm8633_vm8, %v8544_v20, %v3433_v51  ;;  %v8647_v44 = vadd.f32 %v8497_v3, %v3353_v56  ;;  %v3695_v20 = vrot.slane %v3661_v1, 2  ;;  %v3645_v31 = vadd.f32 %v3626_v48, %v3596_v27 }
 0x4db   : > { %v8608_v62 = vpop.eup %5714  ;;  %v3442_v39 = vsel %vm3439_vm9, %v3441_v4, %v3437_v37  ;;  %v8688_v24 = vadd.f32 %v3773_v57, %v3732_v40  ;;  %vm3454_vm11 = vcmp.eq.f32.partialorder %v3453_v18, 8.507059e+37 }
 0x4dc   : > { %v5717_v46 = vpop.eup %5716  ;;  %v3445_v30 = vmul.f32 %v8608_v62, %v8583_v13  ;;  %vm3450_vm10 = vweird.f32 %v8608_v62  ;;  %v5252_v25 = vmul.f32 -1.442695, %v8647_v44  ;;  %v8678_v58 = vmul.f32 %v3442_v39, %v8508_v11 }
 0x4dd   : > { %v8627_v50 = vadd.f32 1.0, %v5717_v46  ;;  %v5719_v35 = vpop.eup %5718  ;;  %v8669_v46 = vmul.f32 %v8554_v29, %v8606_v36  ;;  %vm8671_vm14 = vmor %vm3449_vm12, %vm3450_vm10  ;;  %v3697_v53 = vsel %vm2165_vm7, %v3695_v20, %v8547_v47  ;;  %v8693_v11 = vmul.f32 %v8594_v14, %v8606_v36 }
 0x4de   : > { %v3446_v28 = vsub.f32 1.0, %v3445_v30  ;;  %v8675_v51 = vadd.f32 1.0, %v5719_v35  ;;  %10061 = vst [vmem:[#allocation57_spill] sm:$0xff] %v8678_v58  ;;  %v3598_v48 = vmul.f32 %v8527_v54, %v8678_v58  ;;  %v3734_v4 = vadd.f32 %v3697_v53, %v3645_v31 }
 0x4df   : > { %5720 = vrcp.f32 %v8627_v50  ;;  %v3340_v30 = vpop.f32.mrf.mxu1  ;;  %10062 = vst [vmem:[#allocation58_spill] sm:$0xff] %v8693_v11  ;;  %v3470_v40 = vand.u32 2147483648, %v8627_v50  ;;  %v3611_v39 = vmul.f32 %v8518_v43, %v8678_v58  ;;  %v8721_v10 = vmul.f32 %v8552_v45, %v8678_v58 }
 0x4e0   : > { %v3447_v21 = vmul.f32 %v8608_v62, %v3446_v28  ;;  %5722 = vpow2.f32 %v5252_v25  ;;  %v3354_v63 = vmul.f32 %v8495_v61, %v3340_v30  ;;  %v3456_v28 = vor.u32 1.1754944e-38, %v3455_v22  ;;  %v4573_v61 = vld [vmem:[%s9860_s20 + $0x70] sm:$0xff] }
 0x4e1   : > { %5724 = vrcp.f32 %v8675_v51  ;;  %v8709_v25 = vmul.f32 %v8530_v38, %v8678_v58  ;;  %vm3464_vm15 = vweird.f32 %v8627_v50  ;;  %v8726_v31 = vmul.f32 %v8554_v29, %v8678_v58 }
 0x4e2   : > { %v3448_v9 = vadd.f32 %v8608_v62, %v3447_v21  ;;  %v8702_v27 = vadd.f32 %v8497_v3, %v3354_v63  ;;  %v3627_v63 = vrot.slane %v3611_v39, 1  ;;  %vm3479_vm2 = vweird.f32 %v8675_v51 }
 0x4e3   : > { %v10070_v36 = vrot.slane %v8709_v25, 2 }
 0x4e4   : > { %v3452_v13 = vsel %vm8671_vm14, %v8608_v62, %v3448_v9  ;;  %v8695_v62 = vadd.f32 %v3695_v20, %v3644_v26  ;;  %v3468_v20 = vand.u32 2147483647, %v8627_v50  ;;  %v5253_v3 = vmul.f32 -1.442695, %v8702_v27 }
 0x4e5   : > { %v5721_v15 = vpop.eup %5720  ;;  %v3457_v37 = vsel %vm3454_vm11, %v3456_v28, %v3452_v13  ;;  %v3775_v26 = vmul.f32 %v8549_v60, %v8678_v58  ;;  %v8732_v28 = vmul.f32 %v8594_v14, %v8678_v58  ;;  %v3700_v11 = vsel %vm2165_vm7, %v10070_v36, %v8547_v47 }
 0x4e6   : > { %v3460_v1 = vmul.f32 %v5721_v15, %v8627_v50  ;;  %v5723_v9 = vpop.eup %5722  ;;  %vm3465_vm13 = vweird.f32 %v5721_v15  ;;  %v8712_v35 = vmul.f32 %v3457_v37, %v8523_v2  ;;  %v3471_v2 = vor.u32 1.1754944e-38, %v3470_v40 }
 0x4e7   : > { %v8714_v57 = vadd.f32 1.0, %v5723_v9  ;;  %v5725_v18 = vpop.eup %5724  ;;  %vm3466_vm0 = vmor %vm3464_vm15, %vm3465_vm13  ;;  %vm3469_vm1 = vcmp.eq.f32.partialorder %v3468_v20, 8.507059e+37  ;;  %10063 = vst [vmem:[#allocation59_spill] sm:$0xff] %v8732_v28  ;;  %v8739_v40 = vadd.f32 %v3775_v26, %v3734_v4  ;;  %v3483_v20 = vand.u32 2147483647, %v8675_v51 }
 0x4e8   : > { %v3461_v21 = vsub.f32 1.0, %v3460_v1  ;;  %v3475_v13 = vmul.f32 %v5725_v18, %v8675_v51  ;;  %v8736_v50 = vmul.f32 %v8518_v43, %v8712_v35  ;;  %vm3480_vm3 = vweird.f32 %v5725_v18 }
 0x4e9   : > { %5726 = vrcp.f32 %v8714_v57  ;;  %v8754_v4 = vmul.f32 %v8530_v38, %v8712_v35  ;;  %vm3481_vm4 = vmor %vm3479_vm2, %vm3480_vm3  ;;  %vm3484_vm5 = vcmp.eq.f32.partialorder %v3483_v20, 8.507059e+37  ;;  %v3500_v23 = vand.u32 2147483648, %v8714_v57 }
 0x4ea   : > { %v3462_v22 = vmul.f32 %v5721_v15, %v3461_v21  ;;  %5728 = vpow2.f32 %v5253_v3  ;;  %v3476_v37 = vsub.f32 1.0, %v3475_v13  ;;  %v8748_v3 = vadd.f32 %v3627_v63, %v8537_v32 }
 0x4eb   : > { %v8762_v13 = vmul.f32 %v8549_v60, %v8712_v35  ;;  %vm3494_vm6 = vweird.f32 %v8714_v57  ;;  %v10071_v36 = vrot.slane %v8754_v4, 2 }
 0x4ec   : > { %v3463_v30 = vadd.f32 %v5721_v15, %v3462_v22  ;;  %v3477_v22 = vmul.f32 %v5725_v18, %v3476_v37  ;;  %v3498_v37 = vand.u32 2147483647, %v8714_v57 }
 0x4ee   : > { %v3467_v53 = vsel %vm3466_vm0, %v5721_v15, %v3463_v30  ;;  %v3485_v15 = vand.u32 2147483648, %v8675_v51  ;;  %v8750_v30 = vadd.f32 %v3627_v63, %v3598_v48  ;;  %v8766_v48 = vmul.f32 %v8552_v45, %v8712_v35 }
 0x4ef   : > { %v3472_v1 = vsel %vm3469_vm1, %v3471_v2, %v3467_v53  ;;  %v5727_v26 = vpop.eup %5726  ;;  %v3628_v2 = vrot.slane %v8736_v50, 1  ;;  %v3478_v53 = vadd.f32 %v5725_v18, %v3477_v22  ;;  %v4574_v50 = vld [vmem:[%s9860_s20 + $0x78] sm:$0xff]  ;;  %vm8797_vm9 = vcmp.eq.f32.partialorder %v3498_v37, 8.507059e+37 }
 0x4f0   : > { %v8744_v39 = vmul.f32 %v3472_v1, %v8559_v8  ;;  %v3600_v8 = vmul.f32 %v8527_v54, %v8712_v35  ;;  %v5729_v1 = vpop.eup %5728  ;;  %v3486_v63 = vor.u32 1.1754944e-38, %v3485_v15  ;;  %v3490_v51 = vmul.f32 %v5727_v26, %v8714_v57  ;;  %4576 = vmatpush.msra.mxu1 %v4574_v50  ;;  %v4569_v15 = vld [vmem:[%s9860_s20 + $0x50] sm:$0xff] }
 0x4f1   : > { %v3482_v9 = vsel %vm3481_vm4, %v5725_v18, %v3478_v53  ;;  %v8780_v56 = vadd.f32 1.0, %v5729_v1  ;;  %v8794_v18 = vperm.slane %v8574_v33, 2  ;;  %vm3495_vm8 = vweird.f32 %v5727_v26 }
 0x4f2   : > { %v8778_v22 = vmul.f32 %v8518_v43, %v8744_v39  ;;  %v3487_v21 = vsel %vm3484_vm5, %v3486_v63, %v3482_v9  ;;  %v3491_v59 = vsub.f32 1.0, %v3490_v51  ;;  %v8787_v12 = vadd.f32 %v3628_v2, %v3600_v8  ;;  %4577 = vmatpush.msra.mxu1 %v4573_v61  ;;  %v4571_v8 = vld [vmem:[%s9860_s20 + $0x60] sm:$0xff]  ;;  %v4570_v51 = vld [vmem:[%s9860_s20 + $0x58] sm:$0xff]  ;;  %vm3496_vm10 = vmor %vm3494_vm6, %vm3495_vm8 }
 0x4f3   : > { %v8790_v41 = vmul.f32 %v3487_v21, %v8602_v42  ;;  %5730 = vrcp.f32 %v8780_v56  ;;  %v3602_v57 = vmul.f32 %v8527_v54, %v8744_v39  ;;  %v8816_v53 = vmul.f32 %v8530_v38, %v8744_v39  ;;  %v4568_v9 = vld [vmem:[%s9860_s20 + $0x48] sm:$0xff] }
 0x4f4   : > { %v3492_v20 = vmul.f32 %v5727_v26, %v3491_v59  ;;  %v3629_v42 = vrot.slane %v8778_v22, 1  ;;  %v8810_v59 = vperm.slane %v8574_v33, 1  ;;  %4578 = vmatpush.msra.mxu1 %v4572_v19  ;;  %v3501_v63 = vor.u32 1.1754944e-38, %v3500_v23 }
 0x4f5   : > { %v3614_v21 = vmul.f32 %v8518_v43, %v8790_v41  ;;  %v3669_v61 = vmul.f32 %v8530_v38, %v8790_v41  ;;  %v3513_v37 = vand.u32 2147483647, %v8780_v56  ;;  %v4049_v19 = vmul.f32 0.0, %v8794_v18 }
 0x4f6   : > { %v3493_v1 = vadd.f32 %v5727_v26, %v3492_v20  ;;  %v8823_v33 = vmul.f32 0.0, %v8810_v59  ;;  %4579 = vmatpush.msra.mxu1 %v4571_v8  ;;  %v8828_v22 = vmul.f32 %v8549_v60, %v8744_v39  ;;  %v3648_v6 = vadd.f32 %v3628_v2, %v8537_v32 }
 0x4f7   : > { %v3630_v50 = vrot.slane %v3614_v21, 1  ;;  %v3707_v23 = vrot.slane %v3669_v61, 2  ;;  %v3515_v17 = vand.u32 2147483648, %v8780_v56  ;;  %v3604_v8 = vmul.f32 %v8527_v54, %v8790_v41 }
 0x4f8   : > { %10066 = vst [vmem:[#allocation60_spill] sm:$0xff] %v8823_v33  ;;  %v3497_v20 = vsel %vm3496_vm10, %v5727_v26, %v3493_v1  ;;  %4580 = vmatpush.msra.mxu1 %v4570_v51  ;;  %v3650_v52 = vadd.f32 %v3629_v42, %v8537_v32  ;;  %vm3509_vm12 = vweird.f32 %v8780_v56  ;;  %vm8849_vm14 = vcmp.eq.f32.partialorder %v3513_v37, 8.507059e+37  ;;  %v4567_v37 = vld [vmem:[%s9860_s20 + $0x40] sm:$0xff]  ;;  %v4566_v51 = vld [vmem:[%s9860_s20 + $0x38] sm:$0xff] }
 0x4f9   : > { %v5731_v0 = vpop.eup %5730  ;;  %v3502_v21 = vsel %vm8797_vm9, %v3501_v63, %v3497_v20  ;;  %v3652_v2 = vadd.f32 %v3630_v50, %v8537_v32  ;;  %v3653_v63 = vadd.f32 %v3630_v50, %v3604_v8  ;;  %v8854_v20 = vrot.slane %v4049_v19, 2 }
 0x4fa   : > { %v8841_v26 = vmul.f32 %v3502_v21, %v8647_v44  ;;  %v3505_v61 = vmul.f32 %v5731_v0, %v8780_v56  ;;  %4581 = vmatpush.msra.mxu1 %v4569_v15  ;;  %v3709_v58 = vsel %vm2165_vm7, %v3707_v23, %v8547_v47  ;;  %v3516_v50 = vor.u32 1.1754944e-38, %v3515_v17 }
 0x4fb   : > { %10069 = vst [vmem:[#allocation61_spill] sm:$0xff] %v8854_v20  ;;  %vm3510_vm11 = vweird.f32 %v5731_v0  ;;  %v3742_v17 = vadd.f32 %v3709_v58, %v3653_v63  ;;  %v3651_v20 = vadd.f32 %v3629_v42, %v3602_v57  ;;  %v10072_v56 = vrot.slane %v8709_v25, 2  ;;  %v4563_v25 = vld [vmem:[%s9860_s20 + $0x20] sm:$0xff] }
 0x4fc   : > { %v3506_v44 = vsub.f32 1.0, %v3505_v61  ;;  %v3615_v21 = vmul.f32 %v8518_v43, %v8841_v26  ;;  %v3671_v28 = vmul.f32 %v8530_v38, %v8841_v26  ;;  %v3783_v19 = vmul.f32 %v8549_v60, %v8841_v26  ;;  %4582 = vmatpush.msra.mxu1 %v4568_v9  ;;  %vm3511_vm13 = vmor %vm3509_vm12, %vm3510_vm11 }
 0x4fd   : > { %v3809_v15 = vmul.f32 %v8552_v45, %v8841_v26  ;;  %v3864_v43 = vmul.f32 %v8554_v29, %v8841_v26  ;;  %v3741_v61 = vadd.f32 %v3707_v23, %v3652_v2  ;;  %v3606_v9 = vmul.f32 %v8527_v54, %v8841_v26  ;;  %v4565_v23 = vld [vmem:[%s9860_s20 + $0x30] sm:$0xff] }
 0x4fe   : > { %v3507_v8 = vmul.f32 %v5731_v0, %v3506_v44  ;;  %v3631_v38 = vrot.slane %v3615_v21, 1  ;;  %v3710_v33 = vrot.slane %v3671_v28, 2  ;;  %4583 = vmatpush.msra.mxu1 %v4567_v37  ;;  %v3704_v2 = vrot.slane %v8816_v53, 2  ;;  %v4564_v53 = vld [vmem:[%s9860_s20 + $0x28] sm:$0xff] }
 0x4ff   : > { %v3825_v44 = vrot.slane %v3809_v15, 1  ;;  %v3799_v28 = vadd.f32 %v3783_v19, %v3742_v17  ;;  %v3902_v42 = vrot.slane %v3864_v43, 2  ;;  %v3703_v54 = vsel %vm2165_vm7, %v10071_v36, %v8547_v47 }
 0x500   : > { %v3508_v34 = vadd.f32 %v5731_v0, %v3507_v8  ;;  %v3654_v58 = vadd.f32 %v3631_v38, %v8537_v32  ;;  %4584 = vmatpush.msra.mxu1 %v4566_v51  ;;  %v3655_v63 = vadd.f32 %v3631_v38, %v3606_v9  ;;  %v3798_v21 = vadd.f32 %v8567_v55, %v3741_v61 }
 0x501   : > { %v3735_v32 = vadd.f32 %v10072_v56, %v8748_v3  ;;  %v3712_v37 = vsel %vm2165_vm7, %v3710_v33, %v8547_v47  ;;  %v3706_v3 = vsel %vm2165_vm7, %v3704_v2, %v8547_v47  ;;  %v3738_v1 = vadd.f32 %v3703_v54, %v8787_v12  ;;  %v4562_v47 = vld [vmem:[%s9860_s20 + $0x18] sm:$0xff] }
 0x502   : > { %v3512_v57 = vsel %vm3511_vm13, %v5731_v0, %v3508_v34  ;;  %4585 = vmatpush.msra.mxu1 %v4565_v23  ;;  %v3736_v0 = vadd.f32 %v3700_v11, %v8750_v30  ;;  %v10073_v34 = vmov %v10071_v36  ;;  %v3847_v43 = vadd.f32 %v3825_v44, %v3798_v21  ;;  %v4561_v23 = vld [vmem:[%s9860_s20 + $0x10] sm:$0xff] }
 0x503   : > { %v3517_v51 = vsel %vm8849_vm14, %v3516_v50, %v3512_v57  ;;  %v3737_v19 = vadd.f32 %v10073_v34, %v3648_v6  ;;  %v3743_v50 = vadd.f32 %v3710_v33, %v3654_v58  ;;  %v3848_v8 = vadd.f32 %v3825_v44, %v3799_v28 }
 0x504   : > { %v3526_v15 = vmul.f32 %v3517_v51, %v8702_v27  ;;  %v3904_v11 = vsel %vm2165_vm7, %v3902_v42, %v8597_v16  ;;  %4586 = vmatpush.msra.mxu1 %v4564_v53  ;;  %v3739_v30 = vadd.f32 %v3704_v2, %v3650_v52  ;;  %v3744_v6 = vadd.f32 %v3712_v37, %v3655_v63 }
 0x505   : > { %v3740_v61 = vadd.f32 %v3706_v3, %v3651_v20  ;;  %v3781_v52 = vmul.f32 %v8549_v60, %v8790_v41  ;;  %v3936_v44 = vadd.f32 %v3902_v42, %v3847_v43  ;;  %v3790_v2 = vadd.f32 %v8567_v55, %v8695_v62 }
 0x506   : > { %v3785_v27 = vmul.f32 %v8549_v60, %v3526_v15  ;;  %v3810_v4 = vmul.f32 %v8552_v45, %v3526_v15  ;;  %v3866_v38 = vmul.f32 %v8554_v29, %v3526_v15  ;;  %v3979_v12 = vmul.f32 %v8594_v14, %v3526_v15  ;;  %4587 = vmatpush.msra.mxu1 %v4563_v25  ;;  %v4560_v60 = vld [vmem:[%s9860_s20 + $0x8] sm:$0xff] }
 0x507   : > { %v4005_v33 = vmul.f32 %v8810_v59, %v3526_v15  ;;  %v3800_v58 = vadd.f32 %v8567_v55, %v3743_v50  ;;  %v3937_v36 = vadd.f32 %v3904_v11, %v3848_v8  ;;  %v8931_v54 = vmul.f32 %v8794_v18, %v3526_v15 }
 0x508   : > { %v3801_v17 = vadd.f32 %v3785_v27, %v3744_v6  ;;  %v3826_v9 = vrot.slane %v3810_v4, 1  ;;  %v3905_v28 = vrot.slane %v3866_v38, 2  ;;  %4588 = vmatpush.msra.mxu1 %v4562_v47  ;;  %v3792_v42 = vadd.f32 %v8567_v55, %v3735_v32  ;;  %v4559_v32 = vld [vmem:[%s9860_s20] sm:$0xff] }
 0x509   : > { %v4021_v20 = vrot.slane %v4005_v33, 1  ;;  %v3807_v57 = vmul.f32 %v8552_v45, %v8744_v39  ;;  %v3808_v62 = vmul.f32 %v8552_v45, %v8790_v41  ;;  %v3995_v21 = vadd.f32 %v3979_v12, %v3937_v36 }
 0x50a   : > { %v3849_v63 = vadd.f32 %v3826_v9, %v3800_v58  ;;  %4589 = vmatpush.msra.mxu1 %v4561_v23  ;;  %v3793_v53 = vadd.f32 %v8762_v13, %v3736_v0  ;;  %v3794_v56 = vadd.f32 %v8567_v55, %v3737_v19  ;;  %v3850_v51 = vadd.f32 %v3826_v9, %v3801_v17 }
 0x50b   : > { %v3994_v37 = vadd.f32 %v8611_v7, %v3936_v44  ;;  %v3795_v34 = vadd.f32 %v8828_v22, %v3738_v1  ;;  %v3796_v15 = vadd.f32 %v8567_v55, %v3739_v30  ;;  %v3907_v45 = vsel %vm2165_vm7, %v3905_v28, %v8597_v16 }
 0x50c   : > { %v4098_v43 = vrot.slane %v8931_v54, 2  ;;  %4590 = vmatpush.msra.mxu1 %v4560_v60  ;;  %v3797_v13 = vadd.f32 %v3781_v52, %v3740_v61  ;;  %v3822_v0 = vrot.slane %v8766_v48, 1  ;;  %v3823_v25 = vrot.slane %v3807_v57, 1 }
 0x50d   : > { %v8953_v19 = vadd.f32 %v4021_v20, %v3994_v37  ;;  %v3824_v3 = vrot.slane %v3808_v62, 1  ;;  %v10074_v50 = vrot.slane %v8662_v5, 1  ;;  %v3938_v22 = vadd.f32 %v3905_v28, %v3849_v63 }
 0x50e   : > { %v8958_v1 = vadd.f32 %v4021_v20, %v3995_v21  ;;  %4591 = vmatpush.msra.mxu1 %v4559_v32  ;;  %v3858_v30 = vmul.f32 %v8554_v29, %v8712_v35  ;;  %v8965_v48 = vadd.f32 %v3907_v45, %v3850_v51  ;;  %v10076_v6 = vrot.slane %v8721_v10, 1 }
 0x50f   : > { %v3837_v8 = vadd.f32 %v10074_v50, %v8639_v49  ;;  %v10075_v55 = vmov %v10074_v50  ;;  %v3860_v4 = vmul.f32 %v8554_v29, %v8744_v39  ;;  %v3862_v49 = vmul.f32 %v8554_v29, %v8790_v41 }
 0x510   : > { %v3838_v11 = vadd.f32 %v10075_v55, %v8688_v24  ;;  %v3839_v27 = vadd.f32 %v10076_v6, %v3790_v2  ;;  %v10077_v38 = vmov %v10076_v6  ;;  %v3841_v5 = vadd.f32 %v3822_v0, %v3792_v42 }
 0x511   : > { %v3840_v47 = vadd.f32 %v10077_v38, %v8739_v40  ;;  %v3890_v24 = vrot.slane %v8726_v31, 2  ;;  %v3893_v12 = vrot.slane %v3858_v30, 2  ;;  %v3842_v33 = vadd.f32 %v3822_v0, %v3793_v53  ;;  %v10082_v0 = vld [vmem:[#allocation54_spill] sm:$0xff] }
 0x512   : > { %v10078_v61 = vrot.slane %v8669_v46, 2  ;;  %v3896_v17 = vrot.slane %v3860_v4, 2  ;;  %v3899_v9 = vrot.slane %v3862_v49, 2  ;;  %v3843_v44 = vadd.f32 %v3823_v25, %v3794_v56 }
 0x513   : > { %v3844_v23 = vadd.f32 %v3823_v25, %v3795_v34  ;;  %v3845_v2 = vadd.f32 %v3824_v3, %v3796_v15  ;;  %v3892_v29 = vsel %vm2165_vm7, %v3890_v24, %v8597_v16  ;;  %v8984_v10 = vadd.f32 %v8611_v7, %v3938_v22  ;;  %v10080_v34 = vld [vmem:[#allocation55_spill] sm:$0xff]  ;;  %v10081_v15 = vld [vmem:[#allocation58_spill] sm:$0xff] }
 0x514   : > { %v3889_v52 = vsel %vm2165_vm7, %v10078_v61, %v8597_v16  ;;  %v3846_v40 = vadd.f32 %v3824_v3, %v3797_v13  ;;  %v3895_v31 = vsel %vm2165_vm7, %v3893_v12, %v8597_v16  ;;  %v3898_v58 = vsel %vm2165_vm7, %v3896_v17, %v8597_v16  ;;  %v10083_v3 = vld [vmem:[#allocation57_spill] sm:$0xff]  ;;  %v10084_v22 = vld [vmem:[#allocation59_spill] sm:$0xff] }
 0x515   : > { %v3901_v28 = vsel %vm2165_vm7, %v3899_v9, %v8597_v16  ;;  %v10079_v36 = vmov %v10078_v61  ;;  %v3927_v60 = vadd.f32 %v3889_v52, %v3838_v11  ;;  %v3971_v42 = vmul.f32 %v8594_v14, %v8712_v35 }
 0x516   : > { %v3926_v20 = vadd.f32 %v10079_v36, %v3837_v8  ;;  %v3928_v57 = vadd.f32 %v3890_v24, %v3839_v27  ;;  %v3929_v62 = vadd.f32 %v3892_v29, %v3840_v47  ;;  %v3930_v63 = vadd.f32 %v3893_v12, %v3841_v5 }
 0x517   : > { %v3973_v21 = vmul.f32 %v8594_v14, %v8744_v39  ;;  %v3931_v53 = vadd.f32 %v3895_v31, %v3842_v33  ;;  %v3932_v56 = vadd.f32 %v3896_v17, %v3843_v44  ;;  %v3933_v51 = vadd.f32 %v3898_v58, %v3844_v23  ;;  %v10085_v23 = vld [vmem:[#allocation56_spill] sm:$0xff] }
 0x518   : > { %v3934_v37 = vadd.f32 %v3899_v9, %v3845_v2  ;;  %v3935_v32 = vadd.f32 %v3901_v28, %v3846_v40  ;;  %v3975_v16 = vmul.f32 %v8594_v14, %v8790_v41  ;;  %v3977_v46 = vmul.f32 %v8594_v14, %v8841_v26 }
 0x519   : > { %v3983_v45 = vadd.f32 %v10081_v15, %v10080_v34  ;;  %v3984_v13 = vadd.f32 %v8611_v7, %v3926_v20  ;;  %v3999_v25 = vmul.f32 %v8810_v59, %v10082_v0  ;;  %v4000_v50 = vmul.f32 %v8810_v59, %v10083_v3 }
 0x51a   : > { %v4001_v8 = vmul.f32 %v8810_v59, %v8712_v35  ;;  %v3985_v55 = vadd.f32 %v10084_v22, %v3927_v60  ;;  %v4002_v11 = vmul.f32 %v8810_v59, %v8744_v39  ;;  %v4003_v14 = vmul.f32 %v8810_v59, %v8790_v41 }
 0x51b   : > { %v4004_v30 = vmul.f32 %v8810_v59, %v8841_v26  ;;  %v3986_v6 = vadd.f32 %v8611_v7, %v3928_v57  ;;  %v3987_v27 = vadd.f32 %v3971_v42, %v3929_v62  ;;  %v4015_v4 = vrot.slane %v3999_v25, 1 }
 0x51c   : > { %v4016_v49 = vrot.slane %v4000_v50, 1  ;;  %v3988_v38 = vadd.f32 %v8611_v7, %v3930_v63  ;;  %v3989_v47 = vadd.f32 %v3973_v21, %v3931_v53  ;;  %v3990_v5 = vadd.f32 %v8611_v7, %v3932_v56 }
 0x51d   : > { %v3991_v24 = vadd.f32 %v3975_v16, %v3933_v51  ;;  %v3992_v12 = vadd.f32 %v8611_v7, %v3934_v37  ;;  %v4017_v33 = vrot.slane %v4001_v8, 1  ;;  %v4048_v61 = vmul.f32 %v8794_v18, %v10082_v0  ;;  %v9035_v51 = vld [vmem:[#allocation23] ss:$0 sm:$0xff] }
 0x51e   : > { %v4050_v59 = vmul.f32 %v8794_v18, %v10083_v3  ;;  %v3993_v52 = vadd.f32 %v3977_v46, %v3935_v32  ;;  %v4018_v17 = vrot.slane %v4002_v11, 1  ;;  %v4019_v9 = vrot.slane %v4003_v14, 1  ;;  %v9051_v14 = vld [vmem:[#allocation25] ss:$0 sm:$0xff] }
 0x51f   : > { %v4020_v44 = vrot.slane %v4004_v30, 1  ;;  %v4031_v2 = vadd.f32 %v4015_v4, %v10085_v23  ;;  %v4032_v29 = vadd.f32 %v4015_v4, %v3983_v45  ;;  %v4033_v40 = vadd.f32 %v4016_v49, %v3984_v13 }
 0x520   : > { %v4034_v31 = vadd.f32 %v4016_v49, %v3985_v55  ;;  %v4052_v58 = vmul.f32 %v8794_v18, %v8712_v35  ;;  %v4054_v28 = vmul.f32 %v8794_v18, %v8744_v39  ;;  %v4056_v36 = vmul.f32 %v8794_v18, %v8790_v41  ;;  %v10086_v35 = vld [vmem:[#allocation61_spill] sm:$0xff] }
 0x521   : > { %v4058_v20 = vmul.f32 %v8794_v18, %v8841_v26  ;;  %v4035_v60 = vadd.f32 %v4017_v33, %v3986_v6  ;;  %v4036_v42 = vadd.f32 %v4017_v33, %v3987_v27  ;;  %v4080_v57 = vrot.slane %v4048_v61, 2 }
 0x522   : > { %v4083_v62 = vrot.slane %v4050_v59, 2  ;;  %v4037_v63 = vadd.f32 %v4018_v17, %v3988_v38  ;;  %v4038_v21 = vadd.f32 %v4018_v17, %v3989_v47  ;;  %v4086_v53 = vrot.slane %v4052_v58, 2  ;;  %v10087_v47 = vld [vmem:[#allocation60_spill] sm:$0xff] }
 0x523   : > { %v4089_v56 = vrot.slane %v4054_v28, 2  ;;  %v4082_v37 = vsel %vm2165_vm7, %v4080_v57, %v10086_v35  ;;  %v4092_v41 = vrot.slane %v4056_v36, 2  ;;  %v4120_v32 = vadd.f32 %v4080_v57, %v4031_v2 }
 0x524   : > { %v4085_v39 = vsel %vm2165_vm7, %v4083_v62, %v10086_v35  ;;  %v4039_v16 = vadd.f32 %v4019_v9, %v3990_v5  ;;  %v4088_v18 = vsel %vm2165_vm7, %v4086_v53, %v10086_v35  ;;  %v4095_v26 = vrot.slane %v4058_v20, 2 }
 0x525   : > { %v4122_v46 = vadd.f32 %v4083_v62, %v4033_v40  ;;  %v4091_v34 = vsel %vm2165_vm7, %v4089_v56, %v10086_v35  ;;  %v4121_v15 = vadd.f32 %v4082_v37, %v4032_v29  ;;  %v4123_v45 = vadd.f32 %v4085_v39, %v4034_v31 }
 0x526   : > { %v4124_v13 = vadd.f32 %v4086_v53, %v4035_v60  ;;  %v3997_v0 = vadd.f32 %v8611_v7, %v8965_v48  ;;  %v4040_v25 = vadd.f32 %v4019_v9, %v3991_v24  ;;  %v4041_v3 = vadd.f32 %v4020_v44, %v3992_v12 }
 0x527   : > { %v4125_v50 = vadd.f32 %v4088_v18, %v4036_v42  ;;  %v4094_v8 = vsel %vm2165_vm7, %v4092_v41, %v10086_v35  ;;  %v4126_v22 = vadd.f32 %v4089_v56, %v4037_v63  ;;  %v4140_v55 = vmul.f32 %v9035_v51, %v4120_v32 }
 0x528   : > { %v4141_v11 = vmul.f32 %v9035_v51, %v4121_v15  ;;  %v4042_v30 = vadd.f32 %v4020_v44, %v3993_v52  ;;  %v4127_v6 = vadd.f32 %v4091_v34, %v4038_v21  ;;  %v4142_v27 = vmul.f32 %v9035_v51, %v4122_v46 }
 0x529   : > { %v4143_v4 = vmul.f32 %v9035_v51, %v4123_v45  ;;  %v4100_v7 = vsel %vm2165_vm7, %v4098_v43, %v10086_v35  ;;  %v4097_v48 = vsel %vm2165_vm7, %v4095_v26, %v10086_v35  ;;  %v4128_v49 = vadd.f32 %v4092_v41, %v4039_v16 }
 0x52a   : > { %v4144_v38 = vmul.f32 %v9035_v51, %v4124_v13  ;;  %v10088_v5 = vrot.slane %v10087_v47, 1  ;;  %v4129_v12 = vadd.f32 %v4094_v8, %v4040_v25  ;;  %v4130_v33 = vadd.f32 %v4095_v26, %v4041_v3 }
 0x52b   : > { %v4145_v61 = vmul.f32 %v9035_v51, %v4125_v50  ;;  %v4146_v59 = vmul.f32 %v9035_v51, %v4126_v22  ;;  %v9068_v52 = vadd.f32 %v9051_v14, %v4140_v55  ;;  %v9071_v17 = vadd.f32 %v9051_v14, %v4141_v11 }
 0x52c   : > { %v4045_v24 = vadd.f32 %v10088_v5, %v8984_v10  ;;  %v9074_v9 = vadd.f32 %v9051_v14, %v4142_v27  ;;  %v10089_v44 = vmov %v10088_v5  ;;  %v4131_v2 = vadd.f32 %v4097_v48, %v4042_v30 }
 0x52d   : > { %v4046_v23 = vadd.f32 %v10089_v44, %v3997_v0  ;;  %v4147_v10 = vmul.f32 %v9035_v51, %v4127_v6  ;;  %v9080_v29 = vadd.f32 %v9051_v14, %v4143_v4  ;;  %v4132_v40 = vadd.f32 %v4098_v43, %v8953_v19 }
 0x52e   : > { %v4133_v31 = vadd.f32 %v4100_v7, %v8958_v1  ;;  %v4148_v58 = vmul.f32 %v9035_v51, %v4128_v49  ;;  %v9088_v28 = vadd.f32 %v9051_v14, %v4144_v38  ;;  %v4134_v36 = vadd.f32 %v10086_v35, %v4045_v24 }
 0x52f   : > { %v4149_v20 = vmul.f32 %v9035_v51, %v4129_v12  ;;  %v4150_v60 = vmul.f32 %v9035_v51, %v4130_v33  ;;  %v9094_v42 = vadd.f32 %v9051_v14, %v4145_v61  ;;  %v9097_v57 = vadd.f32 %v9051_v14, %v4146_v59 }
 0x530   : > { %v5254_v54 = vmul.f32 -1.442695, %v9068_v52  ;;  %v5255_v43 = vmul.f32 -1.442695, %v9071_v17  ;;  %v5256_v19 = vmul.f32 -1.442695, %v9074_v9  ;;  %v4135_v1 = vadd.f32 %v10086_v35, %v4046_v23 }
 0x531   : > { %v4151_v62 = vmul.f32 %v9035_v51, %v4131_v2  ;;  %v9105_v63 = vadd.f32 %v9051_v14, %v4147_v10  ;;  %v5257_v21 = vmul.f32 -1.442695, %v9080_v29  ;;  %v4152_v53 = vmul.f32 %v9035_v51, %v4132_v40 }
 0x532   : > { %v9110_v56 = vadd.f32 %v9051_v14, %v4148_v58  ;;  %5732 = vpow2.f32 %v5254_v54  ;;  %v5258_v37 = vmul.f32 -1.442695, %v9088_v28  ;;  %v4153_v39 = vmul.f32 %v9035_v51, %v4133_v31 }
 0x533   : > { %v9115_v41 = vadd.f32 %v9051_v14, %v4149_v20  ;;  %5734 = vpow2.f32 %v5255_v43  ;;  %v5259_v35 = vmul.f32 -1.442695, %v9094_v42  ;;  %v4154_v32 = vmul.f32 %v9035_v51, %v4134_v36 }
 0x534   : > { %v9120_v16 = vadd.f32 %v9051_v14, %v4150_v60  ;;  %5736 = vpow2.f32 %v5256_v19  ;;  %v5260_v18 = vmul.f32 -1.442695, %v9097_v57  ;;  %v4155_v26 = vmul.f32 %v9035_v51, %v4135_v1 }
 0x535   : > { %v9125_v46 = vadd.f32 %v9051_v14, %v4151_v62  ;;  %5738 = vpow2.f32 %v5257_v21  ;;  %v5261_v34 = vmul.f32 -1.442695, %v9105_v63  ;;  %v9129_v15 = vadd.f32 %v9051_v14, %v4152_v53 }
 0x536   : > { %5740 = vpow2.f32 %v5258_v37  ;;  %v5262_v45 = vmul.f32 -1.442695, %v9110_v56  ;;  %v9133_v13 = vadd.f32 %v9051_v14, %v4153_v39  ;;  %v5263_v0 = vmul.f32 -1.442695, %v9115_v41 }
 0x537   : > { %5742 = vpow2.f32 %v5259_v35  ;;  %v9137_v51 = vadd.f32 %v9051_v14, %v4154_v32  ;;  %v5264_v3 = vmul.f32 -1.442695, %v9120_v16  ;;  %v9141_v8 = vadd.f32 %v9051_v14, %v4155_v26 }
 0x538   : > { %v5733_v25 = vpop.eup %5732  ;;  %5744 = vpow2.f32 %v5260_v18  ;;  %v5265_v22 = vmul.f32 -1.442695, %v9125_v46  ;;  %v5266_v11 = vmul.f32 -1.442695, %v9129_v15  ;;  %v5267_v6 = vmul.f32 -1.442695, %v9133_v13 }
 0x539   : > { %v5735_v50 = vpop.eup %5734  ;;  %10090 = vst [vmem:[#allocation55_spill] sm:$0xff] %v9141_v8  ;;  %5746 = vpow2.f32 %v5261_v34  ;;  %v5268_v4 = vmul.f32 -1.442695, %v9137_v51  ;;  %v5269_v14 = vmul.f32 -1.442695, %v9141_v8  ;;  %v9148_v49 = vadd.f32 1.0, %v5733_v25 }
 0x53a   : > { %v5737_v55 = vpop.eup %5736  ;;  %5748 = vpow2.f32 %v5262_v45  ;;  %v9150_v47 = vadd.f32 1.0, %v5735_v50 }
 0x53b   : > { %v5739_v30 = vpop.eup %5738  ;;  %5750 = vpow2.f32 %v5263_v0  ;;  %v9152_v24 = vadd.f32 1.0, %v5737_v55  ;;  %v4251_v40 = vand.u32 2147483648, %v9148_v49  ;;  %v4249_v60 = vand.u32 2147483647, %v9148_v49 }
 0x53c   : > { %v5741_v27 = vpop.eup %5740  ;;  %5752 = vpow2.f32 %v5264_v3  ;;  %v9154_v33 = vadd.f32 1.0, %v5739_v30  ;;  %v4266_v58 = vand.u32 2147483648, %v9150_v47  ;;  %v4264_v54 = vand.u32 2147483647, %v9150_v47 }
 0x53d   : > { %v5743_v7 = vpop.eup %5742  ;;  %5754 = vpow2.f32 %v5265_v22  ;;  %v9156_v59 = vadd.f32 1.0, %v5741_v27  ;;  %v4281_v43 = vand.u32 2147483648, %v9152_v24  ;;  %v9177_v62 = vor.u32 1.1754944e-38, %v4251_v40 }
 0x53e   : > { %v5745_v48 = vpop.eup %5744  ;;  %5756 = vpow2.f32 %v5266_v11  ;;  %v9159_v23 = vadd.f32 1.0, %v5743_v7  ;;  %v4296_v21 = vand.u32 2147483648, %v9154_v33  ;;  %v9187_v35 = vor.u32 1.1754944e-38, %v4266_v58 }
 0x53f   : > { %v5747_v38 = vpop.eup %5746  ;;  %5758 = vpow2.f32 %v5267_v6  ;;  %v9162_v10 = vadd.f32 1.0, %v5745_v48  ;;  %v4279_v32 = vand.u32 2147483647, %v9152_v24  ;;  %v4294_v0 = vand.u32 2147483647, %v9154_v33 }
 0x540   : > { %v5749_v5 = vpop.eup %5748  ;;  %5760 = vpow2.f32 %v5268_v4  ;;  %v9175_v1 = vadd.f32 1.0, %v5747_v38  ;;  %vm4245_vm7 = vweird.f32 %v9148_v49  ;;  %v9206_v55 = vor.u32 1.1754944e-38, %v4281_v43 }
 0x541   : > { %v5751_v12 = vpop.eup %5750  ;;  %5762 = vpow2.f32 %v5269_v14  ;;  %v9183_v37 = vadd.f32 1.0, %v5749_v5  ;;  %vm4260_vm15 = vweird.f32 %v9150_v47  ;;  %v9215_v4 = vor.u32 1.1754944e-38, %v4296_v21 }
 0x542   : > { %v5753_v61 = vpop.eup %5752  ;;  %5764 = vrcp.f32 %v9148_v49  ;;  %v9192_v26 = vadd.f32 1.0, %v5751_v12  ;;  %vm4275_vm0 = vweird.f32 %v9152_v24  ;;  %v4309_v5 = vand.u32 2147483647, %v9156_v59 }
 0x543   : > { %v5755_v44 = vpop.eup %5754  ;;  %5766 = vrcp.f32 %v9150_v47  ;;  %v9194_v34 = vadd.f32 1.0, %v5753_v61  ;;  %vm4290_vm1 = vweird.f32 %v9154_v33  ;;  %vm4305_vm3 = vweird.f32 %v9156_v59 }
 0x544   : > { %v5757_v2 = vpop.eup %5756  ;;  %5768 = vrcp.f32 %v9152_v24  ;;  %v9201_v3 = vadd.f32 1.0, %v5755_v44  ;;  %vm9239_vm2 = vcmp.eq.f32.partialorder %v4249_v60, 8.507059e+37  ;;  %vm9249_vm6 = vcmp.eq.f32.partialorder %v4264_v54, 8.507059e+37 }
 0x545   : > { %v5759_v31 = vpop.eup %5758  ;;  %5770 = vrcp.f32 %v9154_v33  ;;  %v9210_v30 = vadd.f32 1.0, %v5757_v2  ;;  %v4311_v2 = vand.u32 2147483648, %v9156_v59  ;;  %vm9253_vm8 = vcmp.eq.f32.partialorder %v4279_v32, 8.507059e+37 }
 0x546   : > { %v5761_v36 = vpop.eup %5760  ;;  %5772 = vrcp.f32 %v9156_v59  ;;  %v9219_v14 = vadd.f32 1.0, %v5759_v31  ;;  %vm9260_vm10 = vcmp.eq.f32.partialorder %v4294_v0, 8.507059e+37  ;;  %vm9268_vm14 = vcmp.eq.f32.partialorder %v4309_v5, 8.507059e+37 }
 0x547   : > { %v5763_v20 = vpop.eup %5762  ;;  %5774 = vrcp.f32 %v9159_v23  ;;  %v4339_v5 = vand.u32 2147483647, %v9162_v10 }
 0x548   : > { %v9173_v19 = vpop.eup %5764  ;;  %5776 = vrcp.f32 %v9162_v10 }
 0x549   : > { %v9181_v53 = vpop.eup %5766  ;;  %v4241_v39 = vmul.f32 %v9173_v19, %v9148_v49  ;;  %vm4246_vm5 = vweird.f32 %v9173_v19  ;;  %5778 = vrcp.f32 %v9175_v1 }
 0x54a   : > { %v9190_v18 = vpop.eup %5768  ;;  %v4256_v45 = vmul.f32 %v9181_v53, %v9150_v47  ;;  %vm4261_vm9 = vweird.f32 %v9181_v53  ;;  %vm9277_vm11 = vmor %vm4245_vm7, %vm4246_vm5  ;;  %5780 = vrcp.f32 %v9183_v37 }
 0x54b   : > { %v9199_v25 = vpop.eup %5770  ;;  %v4242_v50 = vsub.f32 1.0, %v4241_v39  ;;  %v4271_v22 = vmul.f32 %v9190_v18, %v9152_v24  ;;  %v9237_v39 = vadd.f32 1.0, %v5761_v36  ;;  %vm4276_vm12 = vweird.f32 %v9190_v18  ;;  %vm9287_vm4 = vmor %vm4260_vm15, %vm4261_vm9 }
 0x54c   : > { %v9208_v11 = vpop.eup %5772  ;;  %v4257_v6 = vsub.f32 1.0, %v4256_v45  ;;  %v4286_v27 = vmul.f32 %v9199_v25, %v9154_v33  ;;  %vm4291_vm13 = vweird.f32 %v9199_v25  ;;  %vm9300_vm5 = vmor %vm4275_vm0, %vm4276_vm12  ;;  %5782 = vrcp.f32 %v9192_v26 }
 0x54d   : > { %v9217_v7 = vpop.eup %5774  ;;  %v4272_v48 = vsub.f32 1.0, %v4271_v22  ;;  %v4301_v38 = vmul.f32 %v9208_v11, %v9156_v59  ;;  %v4243_v61 = vmul.f32 %v9173_v19, %v4242_v50  ;;  %vm4306_vm7 = vweird.f32 %v9208_v11  ;;  %vm9317_vm0 = vmor %vm4290_vm1, %vm4291_vm13 }
 0x54e   : > { %v9225_v12 = vpop.eup %5776  ;;  %v4287_v44 = vsub.f32 1.0, %v4286_v27  ;;  %v4316_v40 = vmul.f32 %v9217_v7, %v9159_v23  ;;  %v4258_v31 = vmul.f32 %v9181_v53, %v4257_v6  ;;  %v4324_v6 = vand.u32 2147483647, %v9159_v23 }
 0x54f   : > { %v4273_v58 = vmul.f32 %v9190_v18, %v4272_v48  ;;  %v4302_v43 = vsub.f32 1.0, %v4301_v38  ;;  %v4331_v21 = vmul.f32 %v9225_v12, %v9162_v10  ;;  %v9246_v27 = vadd.f32 1.0, %v5763_v20  ;;  %v9376_v45 = vpop.eup %5778 }
 0x550   : > { %v4288_v50 = vmul.f32 %v9199_v25, %v4287_v44  ;;  %v4317_v22 = vsub.f32 1.0, %v4316_v40  ;;  %v4244_v44 = vadd.f32 %v9173_v19, %v4243_v61  ;;  %v4312_v40 = vor.u32 1.1754944e-38, %v4311_v2 }
 0x551   : > { %v4303_v60 = vmul.f32 %v9208_v11, %v4302_v43  ;;  %v4332_v38 = vsub.f32 1.0, %v4331_v21  ;;  %v4259_v8 = vadd.f32 %v9181_v53, %v4258_v31  ;;  %v4274_v32 = vadd.f32 %v9190_v18, %v4273_v58 }
 0x552   : > { %v4318_v54 = vmul.f32 %v9217_v7, %v4317_v22  ;;  %v4289_v2 = vadd.f32 %v9199_v25, %v4288_v50  ;;  %v4326_v31 = vand.u32 2147483648, %v9159_v23  ;;  %v4341_v21 = vand.u32 2147483648, %v9162_v10 }
 0x553   : > { %v4333_v61 = vmul.f32 %v9225_v12, %v4332_v38  ;;  %v4304_v49 = vadd.f32 %v9208_v11, %v4303_v60  ;;  %v4248_v50 = vsel %vm9277_vm11, %v9173_v19, %v4244_v44  ;;  %vm4321_vm15 = vweird.f32 %v9217_v7 }
 0x554   : > { %v4319_v22 = vadd.f32 %v9217_v7, %v4318_v54  ;;  %vm4336_vm9 = vweird.f32 %v9225_v12  ;;  %v4263_v60 = vsel %vm9287_vm4, %v9181_v53, %v4259_v8  ;;  %v4278_v19 = vsel %vm9300_vm5, %v9190_v18, %v4274_v32  ;;  %vm9328_vm4 = vmor %vm4305_vm3, %vm4306_vm7 }
 0x555   : > { %v4334_v38 = vadd.f32 %v9225_v12, %v4333_v61  ;;  %v4293_v8 = vsel %vm9317_vm0, %v9199_v25, %v4289_v2  ;;  %vm9332_vm12 = vcmp.eq.f32.partialorder %v4324_v6, 8.507059e+37  ;;  %v4327_v18 = vor.u32 1.1754944e-38, %v4326_v31 }
 0x556   : > { %vm4335_vm1 = vweird.f32 %v9162_v10  ;;  %v9340_v44 = vsel %vm9239_vm2, %v9177_v62, %v4248_v50  ;;  %v4308_v59 = vsel %vm9328_vm4, %v9208_v11, %v4304_v49  ;;  %vm10113_vm3 = vweird.f32 %v9159_v23 }
 0x557   : > { %vm9347_vm11 = vmor %vm10113_vm3, %vm4321_vm15  ;;  %vm9351_vm13 = vcmp.eq.f32.partialorder %v4339_v5, 8.507059e+37  ;;  %v9359_v10 = vsel %vm9249_vm6, %v9187_v35, %v4263_v60  ;;  %v9364_v62 = vsel %vm9253_vm8, %v9206_v55, %v4278_v19  ;;  %5784 = vrcp.f32 %v9194_v34 }
 0x558   : > { %v4323_v23 = vsel %vm9347_vm11, %v9217_v7, %v4319_v22  ;;  %vm9371_vm2 = vmor %vm4335_vm1, %vm4336_vm9  ;;  %v9381_v35 = vsel %vm9260_vm10, %v9215_v4, %v4293_v8  ;;  %v4342_v7 = vor.u32 1.1754944e-38, %v4341_v21  ;;  %v4356_v48 = vand.u32 2147483648, %v9175_v1  ;;  %v9395_v4 = vpop.eup %5780 }
 0x559   : > { %v4338_v55 = vsel %vm9371_vm2, %v9225_v12, %v4334_v38  ;;  %v9389_v36 = vsel %vm9268_vm14, %v4312_v40, %v4308_v59  ;;  %v4346_v54 = vmul.f32 %v9376_v45, %v9175_v1  ;;  %v4354_v32 = vand.u32 2147483647, %v9175_v1  ;;  %v9411_v31 = vpop.eup %5782 }
 0x55a   : > { %v4371_v20 = vand.u32 2147483648, %v9183_v37  ;;  %v9399_v61 = vsel %vm9332_vm12, %v4327_v18, %v4323_v23  ;;  %vm4350_vm6 = vweird.f32 %v9175_v1  ;;  %v4386_v12 = vand.u32 2147483648, %v9192_v26 }
 0x55b   : > { %5786 = vrcp.f32 %v9201_v3  ;;  %v9406_v40 = vsel %vm9351_vm13, %v4342_v7, %v4338_v55  ;;  %v4347_v43 = vsub.f32 1.0, %v4346_v54  ;;  %v4361_v0 = vmul.f32 %v9395_v4, %v9183_v37 }
 0x55c   : > { %v4401_v2 = vand.u32 2147483648, %v9194_v34  ;;  %v4357_v5 = vor.u32 1.1754944e-38, %v4356_v48  ;;  %v4369_v58 = vand.u32 2147483647, %v9183_v37  ;;  %v4384_v49 = vand.u32 2147483647, %v9192_v26 }
 0x55d   : > { %5788 = vrcp.f32 %v9210_v30  ;;  %v9416_v21 = vpop.eup %5784  ;;  %v4348_v50 = vmul.f32 %v9376_v45, %v4347_v43  ;;  %vm9419_vm8 = vcmp.eq.f32.partialorder %v4354_v32, 8.507059e+37  ;;  %v4362_v22 = vsub.f32 1.0, %v4361_v0 }
 0x55e   : > { %vm4365_vm10 = vweird.f32 %v9183_v37  ;;  %v9424_v60 = vor.u32 1.1754944e-38, %v4371_v20  ;;  %v4376_v19 = vmul.f32 %v9411_v31, %v9192_v26  ;;  %vm4351_vm14 = vweird.f32 %v9376_v45 }
 0x55f   : > { %vm4380_vm7 = vweird.f32 %v9192_v26  ;;  %v9430_v24 = vor.u32 1.1754944e-38, %v4386_v12  ;;  %v4391_v38 = vmul.f32 %v9416_v21, %v9194_v34  ;;  %v4399_v8 = vand.u32 2147483647, %v9194_v34  ;;  %vm9456_vm9 = vmor %vm4350_vm6, %vm4351_vm14 }
 0x560   : > { %v4349_v53 = vadd.f32 %v9376_v45, %v4348_v50  ;;  %v4377_v33 = vsub.f32 1.0, %v4376_v19  ;;  %vm4395_vm5 = vweird.f32 %v9194_v34  ;;  %v9437_v18 = vor.u32 1.1754944e-38, %v4401_v2 }
 0x561   : > { %v4414_v59 = vand.u32 2147483647, %v9201_v3  ;;  %v9440_v25 = vpop.eup %5786  ;;  %v4363_v6 = vmul.f32 %v9395_v4, %v4362_v22  ;;  %v4392_v23 = vsub.f32 1.0, %v4391_v38  ;;  %v4416_v11 = vand.u32 2147483648, %v9201_v3 }
 0x562   : > { %5790 = vrcp.f32 %v9219_v14  ;;  %v4378_v55 = vmul.f32 %v9411_v31, %v4377_v33  ;;  %v4406_v7 = vmul.f32 %v9440_v25, %v9201_v3  ;;  %v4429_v48 = vand.u32 2147483647, %v9210_v30 }
 0x563   : > { %v9450_v54 = vpop.eup %5788  ;;  %vm4366_vm0 = vweird.f32 %v9395_v4  ;;  %vm9461_vm4 = vcmp.eq.f32.partialorder %v4369_v58, 8.507059e+37  ;;  %vm4381_vm12 = vweird.f32 %v9411_v31  ;;  %v4393_v12 = vmul.f32 %v9416_v21, %v4392_v23 }
 0x564   : > { %v4353_v1 = vsel %vm9456_vm9, %v9376_v45, %v4349_v53  ;;  %vm9471_vm3 = vcmp.eq.f32.partialorder %v4384_v49, 8.507059e+37  ;;  %vm4396_vm11 = vweird.f32 %v9416_v21  ;;  %vm9476_vm13 = vcmp.eq.f32.partialorder %v4399_v8, 8.507059e+37  ;;  %vm9501_vm14 = vmor %vm4365_vm10, %vm4366_vm0 }
 0x565   : > { %v4407_v2 = vsub.f32 1.0, %v4406_v7  ;;  %v4421_v58 = vmul.f32 %v9450_v54, %v9210_v30  ;;  %v4364_v50 = vadd.f32 %v9395_v4, %v4363_v6  ;;  %vm9483_vm2 = vcmp.eq.f32.partialorder %v4414_v59, 8.507059e+37  ;;  %vm9512_vm15 = vmor %vm4380_vm7, %vm4381_vm12 }
 0x566   : > { %v4417_v45 = vor.u32 1.1754944e-38, %v4416_v11  ;;  %v4431_v49 = vand.u32 2147483648, %v9210_v30  ;;  %v4379_v19 = vadd.f32 %v9411_v31, %v4378_v55  ;;  %v4394_v38 = vadd.f32 %v9416_v21, %v4393_v12  ;;  %vm9527_vm10 = vmor %vm4395_vm5, %vm4396_vm11 }
 0x567   : > { %v4408_v8 = vmul.f32 %v9440_v25, %v4407_v2  ;;  %v4422_v53 = vsub.f32 1.0, %v4421_v58  ;;  %vm9491_vm6 = vcmp.eq.f32.partialorder %v4429_v48, 8.507059e+37  ;;  %v4358_v59 = vsel %vm9419_vm8, %v4357_v5, %v4353_v1 }
 0x568   : > { %v5791_v23 = vpop.eup %5790  ;;  %vm4411_vm9 = vweird.f32 %v9440_v25  ;;  %vm4440_vm1 = vweird.f32 %v9219_v14  ;;  %5792 = vrcp.f32 %v9237_v39  ;;  %vm4426_vm8 = vweird.f32 %v9450_v54 }
 0x569   : > { %v4409_v37 = vadd.f32 %v9440_v25, %v4408_v8  ;;  %v4423_v47 = vmul.f32 %v9450_v54, %v4422_v53  ;;  %v4436_v11 = vmul.f32 %v5791_v23, %v9219_v14  ;;  %v4368_v55 = vsel %vm9501_vm14, %v9395_v4, %v4364_v50 }
 0x56a   : > { %v4432_v7 = vor.u32 1.1754944e-38, %v4431_v49  ;;  %v4444_v48 = vand.u32 2147483647, %v9219_v14  ;;  %v4446_v32 = vand.u32 2147483648, %v9219_v14  ;;  %v4383_v12 = vsel %vm9512_vm15, %v9411_v31, %v4379_v19 }
 0x56b   : > { %v4398_v4 = vsel %vm9527_vm10, %v9416_v21, %v4394_v38  ;;  %vm10140_vm7 = vweird.f32 %v9201_v3  ;;  %v4424_v1 = vadd.f32 %v9450_v54, %v4423_v47  ;;  %v4437_v2 = vsub.f32 1.0, %v4436_v11 }
 0x56c   : > { %vm9543_vm5 = vmor %vm10140_vm7, %vm4411_vm9  ;;  %vm10143_vm15 = vweird.f32 %v9210_v30  ;;  %v4459_v21 = vand.u32 2147483647, %v9237_v39  ;;  %v4461_v3 = vand.u32 2147483648, %v9237_v39  ;;  %5794 = vrcp.f32 %v9246_v27 }
 0x56d   : > { %v4413_v58 = vsel %vm9543_vm5, %v9440_v25, %v4409_v37  ;;  %vm9553_vm0 = vmor %vm10143_vm15, %vm4426_vm8  ;;  %v4373_v50 = vsel %vm9461_vm4, %v9424_v60, %v4368_v55  ;;  %v4438_v49 = vmul.f32 %v5791_v23, %v4437_v2  ;;  %vm4441_vm12 = vweird.f32 %v5791_v23  ;;  %v4627_v55 = vld [vmem:[%s9862_s22 + $0x58] sm:$0xff] }
 0x56e   : > { %v4428_v25 = vsel %vm9553_vm0, %v9450_v54, %v4424_v1  ;;  %v5793_v30 = vpop.eup %5792  ;;  %v4388_v19 = vsel %vm9471_vm3, %v9430_v24, %v4383_v12  ;;  %v4403_v38 = vsel %vm9476_vm13, %v9437_v18, %v4398_v4  ;;  %vm9572_vm11 = vcmp.eq.f32.partialorder %v4444_v48, 8.507059e+37  ;;  %vm9584_vm3 = vmor %vm4440_vm1, %vm4441_vm12 }
 0x56f   : > { %v4447_v60 = vor.u32 1.1754944e-38, %v4446_v32  ;;  %v4418_v20 = vsel %vm9483_vm2, %v4417_v45, %v4413_v58  ;;  %v4439_v54 = vadd.f32 %v5791_v23, %v4438_v49  ;;  %v4451_v53 = vmul.f32 %v5793_v30, %v9237_v39 }
 0x570   : > { %vm4455_vm4 = vweird.f32 %v9237_v39  ;;  %v4433_v24 = vsel %vm9491_vm6, %v4432_v7, %v4428_v25  ;;  %vm9588_vm13 = vcmp.eq.f32.partialorder %v4459_v21, 8.507059e+37  ;;  %v4462_v0 = vor.u32 1.1754944e-38, %v4461_v3 }
 0x571   : > { %v4474_v22 = vand.u32 2147483647, %v9246_v27  ;;  %v4476_v45 = vand.u32 2147483648, %v9246_v27  ;;  %v4443_v6 = vsel %vm9584_vm3, %v5791_v23, %v4439_v54  ;;  %v4452_v33 = vsub.f32 1.0, %v4451_v53 }
 0x572   : > { %vm4470_vm2 = vweird.f32 %v9246_v27  ;;  %v9599_v14 = vmul.f32 %v9340_v44, %v9068_v52  ;;  %v9603_v5 = vmul.f32 %v9359_v10, %v9071_v17  ;;  %v5795_v37 = vpop.eup %5794  ;;  %vm4456_vm1 = vweird.f32 %v5793_v30 }
 0x573   : > { %v9607_v47 = vmul.f32 %v9364_v62, %v9074_v9  ;;  %v9611_v23 = vmul.f32 %v9381_v35, %v9080_v29  ;;  %v9615_v11 = vmul.f32 %v9389_v36, %v9088_v28  ;;  %v4453_v52 = vmul.f32 %v5793_v30, %v4452_v33  ;;  %vm4457_vm9 = vmor %vm4455_vm4, %vm4456_vm1 }
 0x574   : > { %v4466_v44 = vmul.f32 %v5795_v37, %v9246_v27  ;;  %v9620_v17 = vmul.f32 %v9399_v61, %v9094_v42  ;;  %v9624_v10 = vmul.f32 %v9406_v40, %v9097_v57  ;;  %v4448_v9 = vsel %vm9572_vm11, %v4447_v60, %v4443_v6 }
 0x575   : > { %v9629_v29 = vmul.f32 %v4358_v59, %v9105_v63  ;;  %v9632_v28 = vmul.f32 %v4373_v50, %v9110_v56  ;;  %v9635_v62 = vmul.f32 %v4388_v19, %v9115_v41  ;;  %v4454_v35 = vadd.f32 %v5793_v30, %v4453_v52  ;;  %v10154_v50 = vld [vmem:[#allocation55_spill] sm:$0xff] }
 0x576   : > { %v4467_v36 = vsub.f32 1.0, %v4466_v44  ;;  %vm4471_vm6 = vweird.f32 %v5795_v37  ;;  %vm4512_vm14 = vcmask 1040384   ;;  %v4513_v42 = vrot.slane %v9599_v14, 7 }
 0x577   : > { %v4514_v57 = vrot.slane %v9603_v5, 7  ;;  %v4516_v63 = vrot.slane %v9607_v47, 7  ;;  %v4517_v56 = vrot.slane %v9611_v23, 7  ;;  %v4458_v61 = vsel %vm4457_vm9, %v5793_v30, %v4454_v35  ;;  %vm4472_vm10 = vmor %vm4470_vm2, %vm4471_vm6 }
 0x578   : > { %v4468_v40 = vmul.f32 %v5795_v37, %v4467_v36  ;;  %v4519_v41 = vrot.slane %v9615_v11, 7  ;;  %v4520_v59 = vrot.slane %v9620_v17, 7  ;;  %vm9646_vm8 = vcmp.eq.f32.partialorder %v4474_v22, 8.507059e+37  ;;  %v4575_v36 = vld [vmem:[%s9861_s21] sm:$0x1] }
 0x579   : > { %v9651_v39 = vmul.f32 %v4403_v38, %v9120_v16  ;;  %v9654_v26 = vmul.f32 %v4418_v20, %v9125_v46  ;;  %v4522_v7 = vrot.slane %v9624_v10, 7  ;;  %v4463_v48 = vsel %vm9588_vm13, %v4462_v0, %v4458_v61  ;;  %v4629_v61 = vld [vmem:[%s9862_s22 + $0x68] sm:$0xff] }
 0x57a   : > { %v4469_v32 = vadd.f32 %v5795_v37, %v4468_v40  ;;  %v4518_v12 = vsel %vm4512_vm14, %v4516_v63, %v4517_v56  ;;  %v4523_v4 = vrot.slane %v9629_v29, 7  ;;  %v4477_v34 = vor.u32 1.1754944e-38, %v4476_v45 }
 0x57b   : > { %v9665_v16 = vmul.f32 %v4433_v24, %v9129_v15  ;;  %v9668_v46 = vmul.f32 %v4448_v9, %v9133_v13  ;;  %v4515_v1 = vsel %vm4512_vm14, %v4513_v42, %v4514_v57  ;;  %v4521_v58 = vsel %vm4512_vm14, %v4519_v41, %v4520_v59  ;;  %v4631_v42 = vld [vmem:[%s9862_s22 + $0x78] sm:$0xff]  ;;  %v4630_v57 = vld [vmem:[%s9862_s22 + $0x70] sm:$0xff]  ;;  %v4628_v41 = vld [vmem:[%s9862_s22 + $0x60] sm:$0xff] }
 0x57c   : > { %v4473_v2 = vsel %vm4472_vm10, %v5795_v37, %v4469_v32  ;;  %v4525_v31 = vrot.slane %v9632_v28, 7  ;;  %v4526_v21 = vrot.slane %v9635_v62, 7  ;;  %v9677_v3 = vmul.f32 %v4463_v48, %v9137_v51  ;;  %4633 = vmatpush.msra.mxu2 %v4631_v42  ;;  %v5333_v59 = vld [vmem:[#allocation26 + $0x38] sm:$0xff]  ;;  %v4626_v48 = vld [vmem:[%s9862_s22 + $0x50] sm:$0xff]  ;;  %v4625_v32 = vld [vmem:[%s9862_s22 + $0x48] sm:$0xff] }
 0x57d   : > { %v4478_v27 = vsel %vm9646_vm8, %v4477_v34, %v4473_v2  ;;  %v4545_v15 = vadd.f32 %v4518_v12, %v4515_v1  ;;  %v4524_v13 = vsel %vm4512_vm14, %v4522_v7, %v4523_v4  ;;  %v4528_v49 = vrot.slane %v9651_v39, 7  ;;  %4805 = vmatpush.bf16.msrb.mxu3 %v5333_v59  ;;  %v5332_v7 = vld [vmem:[#allocation26 + $0x30] sm:$0xff]  ;;  %v5331_v12 = vld [vmem:[#allocation26 + $0x28] sm:$0xff]  ;;  %v4624_v34 = vld [vmem:[%s9862_s22 + $0x40] sm:$0xff] }
 0x57e   : > { %v9680_v25 = vmul.f32 %v4478_v27, %v10154_v50  ;;  %v4529_v30 = vrot.slane %v9654_v26, 7  ;;  %v4527_v38 = vsel %vm4512_vm14, %v4525_v31, %v4526_v21  ;;  %v4531_v8 = vrot.slane %v9665_v16, 7  ;;  %4634 = vmatpush.msra.mxu2 %v4630_v57  ;;  %v4623_v2 = vld [vmem:[%s9862_s22 + $0x38] sm:$0xff]  ;;  %v4621_v31 = vld [vmem:[%s9862_s22 + $0x28] sm:$0xff]  ;;  %v4620_v21 = vld [vmem:[%s9862_s22 + $0x20] sm:$0xff] }
 0x57f   : > { %v4546_v19 = vadd.f32 %v4545_v15, %v4521_v58  ;;  %v4532_v60 = vrot.slane %v9668_v46, 7  ;;  %v4534_v54 = vrot.slane %v9677_v3, 7  ;;  %v4622_v58 = vld [vmem:[%s9862_s22 + $0x30] sm:$0xff]  ;;  %v4619_v50 = vld [vmem:[%s9862_s22 + $0x18] sm:$0xff]  ;;  %vm4866_vm13 = vcmask 64512  }
 0x580   : > { %v4530_v51 = vsel %vm4512_vm14, %v4528_v49, %v4529_v30  ;;  %v4535_v53 = vrot.slane %v9680_v25, 7  ;;  %4635 = vmatpush.msra.mxu2 %v4629_v61  ;;  %v4618_v49 = vld [vmem:[%s9862_s22 + $0x10] sm:$0xff] }
 0x581   : > { %v4547_v20 = vadd.f32 %v4546_v19, %v4524_v13  ;;  %v4533_v18 = vsel %vm4512_vm14, %v4531_v8, %v4532_v60  ;;  %4806 = vmatpush.bf16.msrb.mxu3 %v5332_v7  ;;  %v4617_v8 = vld [vmem:[%s9862_s22 + $0x8] sm:$0xff] }
 0x582   : > { %v4536_v0 = vsel %vm4512_vm14, %v4534_v54, %v4535_v53  ;;  %4636 = vmatpush.msra.mxu2 %v4628_v41 }
 0x583   : > { %v4548_v24 = vadd.f32 %v4547_v20, %v4527_v38  ;;  %v4616_v20 = vld [vmem:[%s9862_s22] sm:$0xff] }
 0x584   : > { %4637 = vmatpush.msra.mxu2 %v4627_v55 }
 0x585   : > { %v4549_v43 = vadd.f32 %v4548_v24, %v4530_v51  ;;  %4807 = vmatpush.bf16.msrb.mxu3 %v5331_v12 }
 0x586   : > { %4638 = vmatpush.msra.mxu2 %v4626_v48 }
 0x587   : > { %v4550_v22 = vadd.f32 %v4549_v43, %v4533_v18  ;;  %v4632_v18 = vld [vmem:[%s10155_s7] sm:$0x1]  ;;  %v5330_v43 = vld [vmem:[#allocation26 + $0x20] sm:$0xff] }
 0x588   : > { %4639 = vmatpush.msra.mxu2 %v4625_v32 }
 0x589   : > { %v4551_v45 = vadd.f32 %v4550_v22, %v4536_v0  ;;  %4808 = vmatpush.bf16.msrb.mxu3 %v5330_v43 }
 0x58a   : > { %4640 = vmatpush.msra.mxu2 %v4624_v34 }
 0x58b   : > { %v4552_v6 = vrot.slane %v4551_v45, 4 }
 0x58c   : > { %4641 = vmatpush.msra.mxu2 %v4623_v2 }
 0x58d   : > { %v4553_v33 = vadd.f32 %v4552_v6, %v4551_v45  ;;  %v5329_v45 = vld [vmem:[#allocation26 + $0x18] sm:$0xff] }
 0x58e   : > { %4642 = vmatpush.msra.mxu2 %v4622_v58  ;;  %4809 = vmatpush.bf16.msrb.mxu3 %v5329_v45 }
 0x58f   : > { %v4554_v37 = vrot.slane %v4553_v33, 2 }
 0x590   : > { %4643 = vmatpush.msra.mxu2 %v4621_v31 }
 0x591   : > { %v4555_v52 = vadd.f32 %v4554_v37, %v4553_v33  ;;  %v5328_v33 = vld [vmem:[#allocation26 + $0x10] sm:$0xff]  ;;  %v5327_v37 = vld [vmem:[#allocation26 + $0x8] sm:$0xff] }
 0x592   : > { %4644 = vmatpush.msra.mxu2 %v4620_v21  ;;  %4810 = vmatpush.bf16.msrb.mxu3 %v5328_v33 }
 0x593   : > { %v4556_v44 = vrot.slane %v4555_v52, 1 }
 0x594   : > { %4645 = vmatpush.msra.mxu2 %v4619_v50 }
 0x595   : > { %v4557_v9 = vadd.f32 %v4556_v44, %v4555_v52 }
 0x596   : > { %4646 = vmatpush.msra.mxu2 %v4618_v49  ;;  %4811 = vmatpush.bf16.msrb.mxu3 %v5327_v37  ;;  %v10159_v37 = vld [vmem:[#allocation46_spill] sm:$0xff] }
 0x597   : > { %v4558_v35 = vmul.f32 0.015625, %v4557_v9  ;;  %v5326_v9 = vld [vmem:[#allocation26] sm:$0xff] }
 0x598   : > { %4647 = vmatpush.msra.mxu2 %v4617_v8 }
 0x599   : > { %4592 = vmatmul.f32.vlgmr.msra.gmra.mxu1 %v4558_v35 }
 0x59a   : > { %4648 = vmatpush.msra.mxu2 %v4616_v20  ;;  %4812 = vmatpush.bf16.msrb.mxu3 %v5326_v9 }
 0x616   : > { %v4593_v63 = vpop.f32.mrf.mxu1 }
 0x617   : > { %v4594_v56 = vadd.f32 %v4593_v63, %v4575_v36 }
 0x619   : > { %v5270_v40 = vmul.f32 -1.442695, %v4594_v56 }
 0x61b   : > { %5796 = vpow2.f32 %v5270_v40 }
 0x621   : > { %v5797_v4 = vpop.eup %5796 }
 0x622   : > { %v4599_v1 = vadd.f32 1.0, %v5797_v4 }
 0x624   : > { %5798 = vrcp.f32 %v4599_v1  ;;  %v4611_v30 = vand.u32 2147483648, %v4599_v1  ;;  %v4609_v38 = vand.u32 2147483647, %v4599_v1  ;;  %vm4605_vm5 = vweird.f32 %v4599_v1 }
 0x626   : > { %v4612_v51 = vor.u32 1.1754944e-38, %v4611_v30  ;;  %vm4610_vm0 = vcmp.eq.f32.partialorder %v4609_v38, 8.507059e+37 }
 0x62a   : > { %v5799_v27 = vpop.eup %5798 }
 0x62b   : > { %v4601_v15 = vmul.f32 %v5799_v27, %v4599_v1  ;;  %vm4606_vm7 = vweird.f32 %v5799_v27 }
 0x62c   : > { %vm4607_vm15 = vmor %vm4605_vm5, %vm4606_vm7 }
 0x62d   : > { %v4602_v13 = vsub.f32 1.0, %v4601_v15 }
 0x62f   : > { %v4603_v19 = vmul.f32 %v5799_v27, %v4602_v13 }
 0x631   : > { %v4604_v60 = vadd.f32 %v5799_v27, %v4603_v19 }
 0x633   : > { %v4608_v54 = vsel %vm4607_vm15, %v5799_v27, %v4604_v60 }
 0x634   : > { %v4613_v53 = vsel %vm4610_vm0, %v4612_v51, %v4608_v54 }
 0x635   : > { %v4615_v24 = vmul.f32 %v4613_v53, %v4594_v56 }
 0x637   : > { %4649 = vmatmul.f32.vlgmr.msra.gmra.mxu2 %v4615_v24 }
 0x6ba   : > { %v4650_v0 = vpop.f32.mrf.mxu2 }
 0x6bb   : > { %v4651_v22 = vadd.f32 %v4650_v0, %v4632_v18 }
 0x6bd   : > { %v5271_v6 = vmul.f32 -1.442695, %v4651_v22 }
 0x6bf   : > { %5800 = vpow2.f32 %v5271_v6 }
 0x6c5   : > { %v5801_v52 = vpop.eup %5800 }
 0x6c6   : > { %v4656_v44 = vadd.f32 1.0, %v5801_v52 }
 0x6c8   : > { %5802 = vrcp.f32 %v4656_v44  ;;  %v4668_v57 = vand.u32 2147483648, %v4656_v44  ;;  %v4666_v56 = vand.u32 2147483647, %v4656_v44  ;;  %vm4662_vm11 = vweird.f32 %v4656_v44 }
 0x6ca   : > { %v4669_v40 = vor.u32 1.1754944e-38, %v4668_v57  ;;  %vm4667_vm3 = vcmp.eq.f32.partialorder %v4666_v56, 8.507059e+37 }
 0x6ce   : > { %v5803_v35 = vpop.eup %5802 }
 0x6cf   : > { %v4658_v36 = vmul.f32 %v5803_v35, %v4656_v44  ;;  %vm4663_vm12 = vweird.f32 %v5803_v35 }
 0x6d0   : > { %vm4664_vm4 = vmor %vm4662_vm11, %vm4663_vm12 }
 0x6d1   : > { %v4659_v42 = vsub.f32 1.0, %v4658_v36  ;;  %v10160_v36 = vld [vmem:[#allocation47_spill] sm:$0xff] }
 0x6d3   : > { %v4660_v63 = vmul.f32 %v5803_v35, %v4659_v42 }
 0x6d5   : > { %v4661_v61 = vadd.f32 %v5803_v35, %v4660_v63 }
 0x6d7   : > { %v4665_v41 = vsel %vm4664_vm4, %v5803_v35, %v4661_v61  ;;  %v10161_v61 = vld [vmem:[#allocation48_spill] sm:$0xff] }
 0x6d8   : > { %v4670_v59 = vsel %vm4667_vm3, %v4669_v40, %v4665_v41 }
 0x6d9   : > { %v4672_v55 = vperm.slane %v4670_v59, 0 }
 0x6db   : > { %v4673_v7 = vmul.f32 %v4672_v55, %v9599_v14  ;;  %v4674_v48 = vmul.f32 %v4672_v55, %v9603_v5  ;;  %v4675_v32 = vmul.f32 %v4672_v55, %v9607_v47  ;;  %v4676_v12 = vmul.f32 %v4672_v55, %v9611_v23 }
 0x6dc   : > { %v4677_v27 = vmul.f32 %v4672_v55, %v9615_v11  ;;  %v4678_v14 = vmul.f32 %v4672_v55, %v9620_v17  ;;  %v4679_v5 = vmul.f32 %v4672_v55, %v9624_v10  ;;  %v4680_v47 = vmul.f32 %v4672_v55, %v9629_v29 }
 0x6dd   : > { %v4705_v4 = vrot.slane %v4673_v7, 7  ;;  %v4706_v34 = vrot.slane %v4674_v48, 7  ;;  %v4708_v1 = vrot.slane %v4675_v32, 7  ;;  %v4709_v2 = vrot.slane %v4676_v12, 7  ;;  %v10162_v7 = vld [vmem:[#allocation49_spill] sm:$0xff] }
 0x6de   : > { %v4711_v15 = vrot.slane %v4677_v27, 7  ;;  %v4712_v23 = vrot.slane %v4678_v14, 7  ;;  %v4714_v50 = vrot.slane %v4679_v5, 7  ;;  %v4715_v13 = vrot.slane %v4680_v47, 7 }
 0x6df   : > { %v4707_v58 = vsel %vm4512_vm14, %v4705_v4, %v4706_v34  ;;  %v4710_v31 = vsel %vm4512_vm14, %v4708_v1, %v4709_v2  ;;  %v4681_v38 = vmul.f32 %v4672_v55, %v9632_v28  ;;  %v4682_v11 = vmul.f32 %v4672_v55, %v9635_v62  ;;  %v10163_v34 = vld [vmem:[#allocation50_spill] sm:$0xff] }
 0x6e0   : > { %v4737_v21 = vpack.c.bf16 %v4710_v31, %v4707_v58  ;;  %v4713_v49 = vsel %vm4512_vm14, %v4711_v15, %v4712_v23  ;;  %v4716_v30 = vsel %vm4512_vm14, %v4714_v50, %v4715_v13  ;;  %v4683_v17 = vmul.f32 %v4672_v55, %v9651_v39  ;;  %v10165_v15 = vld [vmem:[#allocation52_spill] sm:$0xff] }
 0x6e1   : > { %v4738_v19 = vpack.c.bf16 %v4716_v30, %v4713_v49  ;;  %v4684_v10 = vmul.f32 %v4672_v55, %v9654_v26  ;;  %v4717_v8 = vrot.slane %v4681_v38, 7  ;;  %v4718_v29 = vrot.slane %v4682_v11, 7  ;;  %v10168_v30 = vld [vmem:[#allocation53_spill] sm:$0xff] }
 0x6e2   : > { %4813 = vmatmul.bf16.vlgmr.msrb.gmra.mxu3 %v4737_v21  ;;  %v4720_v60 = vrot.slane %v4683_v17, 7  ;;  %v4685_v24 = vmul.f32 %v4672_v55, %v9665_v16  ;;  %v4686_v28 = vmul.f32 %v4672_v55, %v9668_v46  ;;  %v4687_v62 = vmul.f32 %v4672_v55, %v9677_v3  ;;  %v5530_v16 = vld [vmem:[%s10157_s2] ss:$0 sm:$0xff]  ;;  %v10164_v21 = vld [vmem:[#allocation51_spill] sm:$0xff]  ;;  %s4890_s2 = sshll.u32 %s4887_s8, 4  ;;  %s4891_s2 = int_to_ptr.hbm [resolvable:$true] %s4890_s2 }
 0x6e3   : > { %v4721_v20 = vrot.slane %v4684_v10, 7  ;;  %v4719_v51 = vsel %vm4512_vm14, %v4717_v8, %v4718_v29  ;;  %v4688_v39 = vmul.f32 %v4672_v55, %v9680_v25  ;;  %v5531_v46 = vld [vmem:[%s10158_s10] ss:$0 sm:$0xff]  ;;  %s6240_s30 = sshra.s32 %s4891_s2, 4  ;;  %s6241_s30 = int_to_ptr.hbm [resolvable:$true] %s6240_s30 }
 0x6e4   : > { %v4723_v26 = vrot.slane %v4685_v24, 7  ;;  %v4724_v18 = vrot.slane %v4686_v28, 7  ;;  %v4726_v43 = vrot.slane %v4687_v62, 7  ;;  %s6242_s11 = scalar_lea.hbm %s6241_s30, 64  ;;  %p6247_p3 = scmp.lt.s32.totalorder %s6241_s30, %s10166_s0 }
 0x6e5   : > { %v4722_v54 = vsel %vm4512_vm14, %v4720_v60, %v4721_v20  ;;  %v4727_v0 = vrot.slane %v4688_v39, 7  ;;  %p6243_p0 = scmp.ne.s32.totalorder %s6241_s30, %s6242_s11  ;;  %p6248_p4 = scmp.lt.s32.totalorder %s6246_s29, %s6242_s11 }
 0x6e6   : > { %v4739_v53 = vpack.c.bf16 %v4722_v54, %v4719_v51  ;;  %v4725_v22 = vsel %vm4512_vm14, %v4723_v26, %v4724_v18 }
 0x6e7   : > { %v4728_v45 = vsel %vm4512_vm14, %v4726_v43, %v4727_v0  ;;  %p6244_p1 = pnand %p6243_p0, %p6518_p5  ;;  %p6249_p7 = por %p6248_p4, %p6247_p3 }
 0x6e8   : > { %v4740_v6 = vpack.c.bf16 %v4728_v45, %v4725_v22 }
 0x6e9   : > { %p6245_p2 = pneg %p6244_p1 }
 0x6eb   : > { %p6250_p8 = pnand %p6249_p7, %p6245_p2 }
 0x6f2   : > { %4818 = vmatmul.bf16.gmra.mxu3 %v4738_v19 }
 0x702   : > { %4823 = vmatmul.bf16.gmra.mxu3 %v4739_v53 }
 0x712   : > { %4828 = vmatmul.bf16.gmra.mxu3 %v4740_v6 }
 0x765   : > { %v4814_v3 = vpop.f32.mrf.mxu3 }
 0x766   : > { %v4838_v25 = vmul.f32 %v5530_v16, %v4814_v3 }
 0x768   : > { %v4850_v33 = vadd.f32 %v5531_v46, %v4838_v25 }
 0x76a   : > { %v4858_v52 = vadd.f32 %v4850_v33, %v10159_v37 }
 0x76c   : > { %4867 = vst.msk [vmem:[%s9781_s26] sm:$0xff] %vm4866_vm13, %v4858_v52 }
 0x76d   : > { %v4816_v44 = vpop.f32.mrf.mxu3 }
 0x76e   : > { %v4839_v9 = vmul.f32 %v5530_v16, %v4816_v44 }
 0x770   : > { %v4851_v35 = vadd.f32 %v5531_v46, %v4839_v9 }
 0x772   : > { %v4859_v42 = vadd.f32 %v4851_v35, %v10160_v36 }
 0x774   : > { %4868 = vst.msk [vmem:[%s9781_s26 + $0x8] sm:$0xff] %vm4866_vm13, %v4859_v42 }
 0x775   : > { %v4819_v57 = vpop.f32.mrf.mxu3 }
 0x776   : > { %v4840_v63 = vmul.f32 %v5530_v16, %v4819_v57 }
 0x778   : > { %v4852_v56 = vadd.f32 %v5531_v46, %v4840_v63 }
 0x77a   : > { %v4860_v40 = vadd.f32 %v4852_v56, %v10161_v61 }
 0x77c   : > { %4869 = vst.msk [vmem:[%s9781_s26 + $0x10] sm:$0xff] %vm4866_vm13, %v4860_v40 }
 0x77d   : > { %v4821_v41 = vpop.f32.mrf.mxu3 }
 0x77e   : > { %v4841_v59 = vmul.f32 %v5530_v16, %v4821_v41 }
 0x780   : > { %v4853_v55 = vadd.f32 %v5531_v46, %v4841_v59 }
 0x782   : > { %v4861_v48 = vadd.f32 %v4853_v55, %v10162_v7 }
 0x784   : > { %4870 = vst.msk [vmem:[%s9781_s26 + $0x18] sm:$0xff] %vm4866_vm13, %v4861_v48 }
 0x785   : > { %v4824_v32 = vpop.f32.mrf.mxu3 }
 0x786   : > { %v4842_v12 = vmul.f32 %v5530_v16, %v4824_v32 }
 0x788   : > { %v4854_v4 = vadd.f32 %v5531_v46, %v4842_v12 }
 0x78a   : > { %v4862_v1 = vadd.f32 %v4854_v4, %v10163_v34 }
 0x78c   : > { %4871 = vst.msk [vmem:[%s9781_s26 + $0x20] sm:$0xff] %vm4866_vm13, %v4862_v1 }
 0x78d   : > { %v4826_v2 = vpop.f32.mrf.mxu3 }
 0x78e   : > { %v4843_v58 = vmul.f32 %v5530_v16, %v4826_v2 }
 0x790   : > { %v4855_v31 = vadd.f32 %v5531_v46, %v4843_v58 }
 0x792   : > { %v4863_v27 = vadd.f32 %v4855_v31, %v10164_v21 }
 0x794   : > { %4872 = vst.msk [vmem:[%s9781_s26 + $0x28] sm:$0xff] %vm4866_vm13, %v4863_v27 }
 0x795   : > { %v4829_v14 = vpop.f32.mrf.mxu3 }
 0x796   : > { %v4844_v5 = vmul.f32 %v5530_v16, %v4829_v14 }
 0x798   : > { %v4856_v47 = vadd.f32 %v5531_v46, %v4844_v5 }
 0x79a   : > { %v4864_v23 = vadd.f32 %v4856_v47, %v10165_v15 }
 0x79c   : > { %4873 = vst.msk [vmem:[%s9781_s26 + $0x30] sm:$0xff] %vm4866_vm13, %v4864_v23 }
 0x79d   : > { %v4831_v50 = vpop.f32.mrf.mxu3 }
 0x79e   : > { %v4845_v13 = vmul.f32 %v5530_v16, %v4831_v50 }
 0x7a0   : > { %v4857_v49 = vadd.f32 %v5531_v46, %v4845_v13 }
 0x7a2   : > { %v4865_v19 = vadd.f32 %v4857_v49, %v10168_v30 }
 0x7a4   : > { %4874 = vst.msk [vmem:[%s9781_s26 + $0x38] sm:$0xff] %vm4866_vm13, %v4865_v19 }
 0x7a5   : > { %6253 = shalt.err (!%p6250_p8)
}
 0x7a6   : > { %s6338_s25 = smov 128   ;;  %s6339_s28 = smov 8  }
 0x7a7   : > { %5392 = dma.vmem_to_hbm [thread:$0]  (%p6518_p5), %s4889_s23, 1024, %s4891_s2, %s4876_s9, %s6338_s25, %s6338_s25, %s6339_s28  }
 0x7a8 PF: > { %s10169_s26 = sld [smem:[#allocation41_spill]] }
 0x7a9   : > { %s10170_s8 = sld [smem:[#allocation38_spill]] }
 0x7ae   : > { %p5469_p9 = scmp.ge.s32.totalorder %s10169_s26, 2 }
 0x7af   : > { %s4905_s10 = sand.u32 1, %s10170_s8  }
 0x7b0   : > { %p5438_p10 = pnand %p5469_p9, %p6522_p6  ;;  %s4906_s1 = scalar_lea.sflag [#allocation7], %s4905_s10 }
 0x7b2   : > { %p5439_p11 = pneg %p5438_p10 }
 0x7b4   : > { %6303 = dma.done.wait (%p5439_p11), %s4906_s1, 1024  }
 0x7b5   : > { %6305 = vsyncadd (%p5439_p11), %s4906_s1, 4294966272  ;;  %s10172_s30 = sld [smem:[#allocation42_spill]] }
 0x7b6   : > { %s10173_s7 = sld [smem:[#allocation39_spill]] }
 0x7b7   : > { %s10174_s4 = sld [smem:[#allocation40_spill]] }
 0x7b8   : > { %s10175_s8 = sld [smem:[#allocation43_spill]] }
 0x7bb   : > { %p45_p12 = scmp.ge.s32.totalorder %s10172_s30, 4  }
 0x7bd   :  { %47 = sbr.rel (!%p45_p12) target bundleno = 28 (0x1c), region = 233 }
 0x7c2   :  { %4912 = vsyncpa [#allocation6], 1 }
 0x7c3   :  { %4914 = vsyncpa [#allocation6 + $0x1], 1 }
 0x7c4   :  { %4915 = vsyncpa [#allocation9], 1 }
 0x7c5   :  { %4916 = vsyncpa [#allocation12], 1 }
 0x7c6   :  { %4917 = vsyncpa [#allocation15], 1 }
 0x7c7   :  { %4918 = vsyncpa [#allocation18], 1 }
 0x7c8   :  { %4919 = vsyncpa [#allocation21], 1 }
 0x7c9   :  { %4920 = vsyncpa [#allocation24], 1 }
 0x7ca   :  { %4921 = vsyncpa [#allocation27], 1 }
 0x7cb   :  { %4922 = vsyncpa [#allocation7], 1 }
 0x7cc   :  { %4924 = vsyncpa [#allocation7 + $0x1], 1 }

</bundles_post_ra>
